<compile_context>
chip_gen: v7x
topology: tpu7x:2x2x1
jax: 0.10.0
libtpu: 0.0.40
codegen_flags: <defaults>
</compile_context>

<pallas_src>
import functools
import math

import jax
import jax.numpy as jnp
from jax import lax
from jax.experimental import pallas as pl
from jax.experimental.pallas import tpu as pltpu

_VMEM_LIMIT = 32 * 1024 * 1024   # scoped-VMEM cap with headroom on v5e/v6e/v7x
_EPS = 1e-5


def _tile(dim, preferred, align):
    """Largest tile <= preferred that divides `dim` and respects `align`; else full dim."""
    if dim <= preferred:
        return dim
    t = (preferred // align) * align
    while t >= align:
        if dim % t == 0:
            return t
        t -= align
    return dim


# ---------------- tiled matmul + bias (+ optional ReLU) ----------------------

def _matmul_bias_kernel(x_ref, w_ref, b_ref, o_ref, acc_ref, *, activation):
    @pl.when(pl.program_id(2) == 0)
    def _init():
        acc_ref[...] = jnp.zeros_like(acc_ref)

    acc_ref[...] += jnp.dot(
        x_ref[...].astype(jnp.bfloat16),
        w_ref[...].astype(jnp.bfloat16),
        preferred_element_type=jnp.float32)

    @pl.when(pl.program_id(2) == pl.num_programs(2) - 1)
    def _finalize():
        out = acc_ref[...] + b_ref[...]
        if activation == "relu":
            out = jnp.maximum(out, 0.0)
        o_ref[...] = out.astype(o_ref.dtype)


def matmul_bias(x, w, b, activation=None, *, tm=256, tn=256, tk=512):
    """x: (M, K), w: (K, N), b: (N,) -> (M, N). Tiled, pipelined, f32 accumulate."""
    M, K = x.shape
    N = w.shape[1]
    tm = _tile(M, tm, 8)
    tn = _tile(N, tn, 128)
    tk = _tile(K, tk, 128)
    kernel = functools.partial(_matmul_bias_kernel, activation=activation)
    return pl.pallas_call(
        kernel,
        out_shape=jax.ShapeDtypeStruct((M, N), jnp.float32),
        grid=(M // tm, N // tn, K // tk),
        in_specs=[
            pl.BlockSpec((tm, tk), lambda i, j, k: (i, k)),
            pl.BlockSpec((tk, tn), lambda i, j, k: (k, j)),
            pl.BlockSpec((1, tn), lambda i, j, k: (0, j)),
        ],
        out_specs=pl.BlockSpec((tm, tn), lambda i, j, k: (i, j)),
        scratch_shapes=[pltpu.VMEM((tm, tn), jnp.float32)],
        compiler_params=pltpu.CompilerParams(
            dimension_semantics=("parallel", "parallel", "arbitrary"),
            vmem_limit_bytes=_VMEM_LIMIT),
    )(x, w, b.reshape(1, N))


# ------------- fused attention block: LN(x_q + MHA(x_q, x_kv)) ---------------

def _mha_block_kernel(q_ref, kv_ref, wqkv_ref, bqkv_ref, wo_ref, bo_ref,
                      g_ref, beta_ref, o_ref, *, num_heads, scale, eps):
    x_q = q_ref[0]                              # (Sq, D) f32 (also the residual)
    x_kv = kv_ref[0]                            # (Sk, D) f32
    xq16 = x_q.astype(jnp.bfloat16)
    xkv16 = x_kv.astype(jnp.bfloat16)
    wqkv = wqkv_ref[...].astype(jnp.bfloat16)   # (3, H, D, hd)
    bqkv = bqkv_ref[...]                        # (3, H, 1, hd) f32
    wo = wo_ref[...].astype(jnp.bfloat16)       # (H, hd, D)

    # residual + out-proj bias; per-head out-proj contributions accumulate below.
    y = x_q + bo_ref[...]
    for h in range(num_heads):
        q_h = jnp.dot(xq16, wqkv[0, h], preferred_element_type=jnp.float32) + bqkv[0, h]
        k_h = jnp.dot(xkv16, wqkv[1, h], preferred_element_type=jnp.float32) + bqkv[1, h]
        v_h = jnp.dot(xkv16, wqkv[2, h], preferred_element_type=jnp.float32) + bqkv[2, h]
        # scores: contract head dims directly (no materialized k transpose)
        s = lax.dot_general(q_h.astype(jnp.bfloat16), k_h.astype(jnp.bfloat16),
                            (((1,), (1,)), ((), ())),
                            preferred_element_type=jnp.float32) * scale
        s = s - jnp.max(s, axis=-1, keepdims=True)
        p = jnp.exp(s)
        p = p * pl.reciprocal(jnp.sum(p, axis=-1, keepdims=True), approx=True)
        o_h = jnp.dot(p.astype(jnp.bfloat16), v_h.astype(jnp.bfloat16),
                      preferred_element_type=jnp.float32)               # (Sq, hd)
        y = y + jnp.dot(o_h.astype(jnp.bfloat16), wo[h],
                        preferred_element_type=jnp.float32)             # (Sq, D)

    mean = jnp.mean(y, axis=-1, keepdims=True)
    var = jnp.mean((y - mean) ** 2, axis=-1, keepdims=True)
    o_ref[0] = (y - mean) * lax.rsqrt(var + eps) * g_ref[...] + beta_ref[...]


def mha_block(q_in, kv_in, attn_p, gamma, beta, num_heads):
    """LayerNorm(q_in + MultiheadAttention(q_in, kv_in, kv_in)); one kernel, grid over B."""
    B, Sq, D = q_in.shape
    Sk = kv_in.shape[1]
    hd = D // num_heads
    wq, wk, wv = jnp.split(attn_p["in_proj_w"], 3, axis=0)   # (D, D) each, (out, in)
    bq, bk, bv = jnp.split(attn_p["in_proj_b"], 3, axis=0)

    def per_head_w(w):   # (D_out, D_in) -> (H, D_in, hd): x @ per_head_w[h] == per-head proj
        return w.reshape(num_heads, hd, D).transpose(0, 2, 1)

    w_qkv = jnp.stack([per_head_w(wq), per_head_w(wk), per_head_w(wv)])    # (3, H, D, hd)
    b_qkv = jnp.stack([bq, bk, bv]).reshape(3, num_heads, 1, hd)           # (3, H, 1, hd)
    w_o = attn_p["out_proj_w"].T.reshape(num_heads, hd, D)                 # (H, hd, D)
    b_o = attn_p["out_proj_b"].reshape(1, D)

    kernel = functools.partial(_mha_block_kernel, num_heads=num_heads,
                               scale=1.0 / math.sqrt(hd), eps=_EPS)
    # TODO(synk): for very long sequences this holds full (S, D) and (S, S) per batch
    # element in VMEM; a flash-style Sk tiling would be needed at that scale.
    return pl.pallas_call(
        kernel,
        out_shape=jax.ShapeDtypeStruct((B, Sq, D), jnp.float32),
        grid=(B,),
        in_specs=[
            pl.BlockSpec((1, Sq, D), lambda b: (b, 0, 0)),
            pl.BlockSpec((1, Sk, D), lambda b: (b, 0, 0)),
            pl.BlockSpec((3, num_heads, D, hd), lambda b: (0, 0, 0, 0)),
            pl.BlockSpec((3, num_heads, 1, hd), lambda b: (0, 0, 0, 0)),
            pl.BlockSpec((num_heads, hd, D), lambda b: (0, 0, 0)),
            pl.BlockSpec((1, D), lambda b: (0, 0)),
            pl.BlockSpec((1, D), lambda b: (0, 0)),
            pl.BlockSpec((1, D), lambda b: (0, 0)),
        ],
        out_specs=pl.BlockSpec((1, Sq, D), lambda b: (b, 0, 0)),
        compiler_params=pltpu.CompilerParams(
            dimension_semantics=("parallel",),
            vmem_limit_bytes=_VMEM_LIMIT),
    )(q_in, kv_in, w_qkv, b_qkv, w_o, b_o, gamma.reshape(1, D), beta.reshape(1, D))


# -------------- fused FFN block: LN(x + W2 relu(W1 x + b1) + b2) -------------

def _ffn_block_kernel(x_ref, w1_ref, b1_ref, w2_ref, b2_ref, g_ref, beta_ref,
                      o_ref, *, eps):
    x = x_ref[...]                                           # (tm, D) f32
    h = jnp.dot(x.astype(jnp.bfloat16), w1_ref[...].astype(jnp.bfloat16),
                preferred_element_type=jnp.float32) + b1_ref[...]
    h = jnp.maximum(h, 0.0)                                  # hidden stays in VMEM/regs
    y = jnp.dot(h.astype(jnp.bfloat16), w2_ref[...].astype(jnp.bfloat16),
                preferred_element_type=jnp.float32) + b2_ref[...]
    y = x + y                                                # residual
    mean = jnp.mean(y, axis=-1, keepdims=True)
    var = jnp.mean((y - mean) ** 2, axis=-1, keepdims=True)
    o_ref[...] = (y - mean) * lax.rsqrt(var + eps) * g_ref[...] + beta_ref[...]


def ffn_block(x, lin1_w, lin1_b, lin2_w, lin2_b, gamma, beta, *, block_rows=256):
    B, S, D = x.shape
    M = B * S
    F = lin1_w.shape[0]
    tm = _tile(M, block_rows, 8)
    kernel = functools.partial(_ffn_block_kernel, eps=_EPS)
    out = pl.pallas_call(
        kernel,
        out_shape=jax.ShapeDtypeStruct((M, D), jnp.float32),
        grid=(M // tm,),
        in_specs=[
            pl.BlockSpec((tm, D), lambda i: (i, 0)),
            pl.BlockSpec((D, F), lambda i: (0, 0)),
            pl.BlockSpec((1, F), lambda i: (0, 0)),
            pl.BlockSpec((F, D), lambda i: (0, 0)),
            pl.BlockSpec((1, D), lambda i: (0, 0)),
            pl.BlockSpec((1, D), lambda i: (0, 0)),
            pl.BlockSpec((1, D), lambda i: (0, 0)),
        ],
        out_specs=pl.BlockSpec((tm, D), lambda i: (i, 0)),
        compiler_params=pltpu.CompilerParams(
            dimension_semantics=("parallel",),
            vmem_limit_bytes=_VMEM_LIMIT),
    )(x.reshape(M, D), lin1_w.T, lin1_b.reshape(1, F), lin2_w.T,
      lin2_b.reshape(1, D), gamma.reshape(1, D), beta.reshape(1, D))
    return out.reshape(B, S, D)


# ------------------------------ model glue ----------------------------------

def encoder_layer(x, p, num_heads):
    """Post-LN TransformerEncoderLayer (PyTorch default), ReLU FFN; dropout skipped."""
    x = mha_block(x, x, p["self_attn"], p["norm1_g"], p["norm1_b"], num_heads)
    x = ffn_block(x, p["lin1_w"], p["lin1_b"], p["lin2_w"], p["lin2_b"],
                  p["norm2_g"], p["norm2_b"])
    return x


def decoder_layer(tgt, memory, p, num_heads):
    """Post-LN TransformerDecoderLayer: self-attn, cross-attn, FFN."""
    tgt = mha_block(tgt, tgt, p["self_attn"], p["norm1_g"], p["norm1_b"], num_heads)
    tgt = mha_block(tgt, memory, p["cross_attn"], p["norm2_g"], p["norm2_b"], num_heads)
    tgt = ffn_block(tgt, p["lin1_w"], p["lin1_b"], p["lin2_w"], p["lin2_b"],
                    p["norm3_g"], p["norm3_b"])
    return tgt


def feature_extractor(x, p):
    # TODO(synk): frozen pretrained resnet18 backbone replaced by a single frozen
    # conv3x3(stride 2, pad 1) + ReLU; the conv uses XLA's native MXU conv (per perf
    # review) instead of im2col glue + a Pallas matmul.
    y = lax.conv_general_dilated(
        x, p["conv_w"], window_strides=(2, 2), padding=((1, 1), (1, 1)),
        dimension_numbers=("NCHW", "OIHW", "NCHW"))
    y = jnp.maximum(y + p["conv_b"][None, :, None, None], 0.0)
    return y                                                   # (B, D, H/2, W/2) NCHW


def image_compression_transformer(x, params, *, num_heads,
                                  num_encoder_layers, num_decoder_layers):
    feats = feature_extractor(x, params["feature_extractor"])   # (B, D, Hf, Wf)
    B, D = feats.shape[0], feats.shape[1]
    # Mirrors torch `features.view(B, -1, C)` on a contiguous NCHW tensor
    # (row-major reinterpretation, no transpose).
    feats = feats.reshape(B, -1, D)                              # (B, S, D)
    enc = feats
    for li in range(num_encoder_layers):
        enc = encoder_layer(enc, params["encoder"][li], num_heads)
    # TODO(synk): reference calls decoder(encoded) without a memory arg (invalid in
    # PyTorch); we interpret it as tgt = memory = encoded features.
    dec = enc
    for li in range(num_decoder_layers):
        dec = decoder_layer(dec, enc, params["decoder"][li], num_heads)
    B2, S, _ = dec.shape
    out = matmul_bias(dec.reshape(B2 * S, D), params["out_w"].T, params["out_b"])
    return out.reshape(B2, S, D)


# ------------------------------ param init ----------------------------------

def init_params(key, in_channels, feature_dim, ffn_dim, num_enc, num_dec):
    keys = iter(jax.random.split(key, 256))

    def w(shape, scale=0.02):
        return (scale * jax.random.normal(next(keys), shape)).astype(jnp.float32)

    def zeros(n):
        return jnp.zeros((n,), jnp.float32)

    def ones(n):
        return jnp.ones((n,), jnp.float32)

    def attn():
        return {
            "in_proj_w": w((3 * feature_dim, feature_dim)),
            "in_proj_b": zeros(3 * feature_dim),
            "out_proj_w": w((feature_dim, feature_dim)),
            "out_proj_b": zeros(feature_dim),
        }

    def enc_layer():
        return {
            "self_attn": attn(),
            "lin1_w": w((ffn_dim, feature_dim)), "lin1_b": zeros(ffn_dim),
            "lin2_w": w((feature_dim, ffn_dim)), "lin2_b": zeros(feature_dim),
            "norm1_g": ones(feature_dim), "norm1_b": zeros(feature_dim),
            "norm2_g": ones(feature_dim), "norm2_b": zeros(feature_dim),
        }

    def dec_layer():
        d = enc_layer()
        d["cross_attn"] = attn()
        d["norm3_g"] = ones(feature_dim)
        d["norm3_b"] = zeros(feature_dim)
        return d

    return {
        "feature_extractor": {
            "conv_w": w((feature_dim, in_channels, 3, 3)),
            "conv_b": zeros(feature_dim),
        },
        "encoder": [enc_layer() for _ in range(num_enc)],
        "decoder": [dec_layer() for _ in range(num_dec)],
        "out_w": w((feature_dim, feature_dim)),
        "out_b": zeros(feature_dim),
    }


# --------------------------------- main --------------------------------------

if __name__ == "__main__":
    key = jax.random.PRNGKey(0)
    kx, kp = jax.random.split(key)

    B, C, H, W = 2, 4, 16, 16
    feature_dim, num_heads = 32, 4
    num_encoder_layers, num_decoder_layers = 1, 1
    ffn_dim = 64  # TODO(synk): PyTorch default dim_feedforward=2048, scaled to fit small shapes.

    x = jax.random.normal(kx, (B, C, H, W), dtype=jnp.float32)
    params = init_params(kp, C, feature_dim, ffn_dim,
                         num_encoder_layers, num_decoder_layers)

    fwd = jax.jit(functools.partial(
        image_compression_transformer,
        num_heads=num_heads,
        num_encoder_layers=num_encoder_layers,
        num_decoder_layers=num_decoder_layers))

    out = fwd(x, params)
    jax.block_until_ready(out)
    assert out.shape == (B, (H // 2) * (W // 2), feature_dim), out.shape
    assert bool(jnp.all(jnp.isfinite(out)))
    print("KERNEL_OK")
</pallas_src>

<mosaic_0001>
module attributes {stable_mosaic.version = 11 : i64} {
  func.func @_mha_block_kernel(%arg0: i32, %arg1: memref<1x64x32xf32, #tpu.memory_space<vmem>>, %arg2: memref<1x64x32xf32, #tpu.memory_space<vmem>>, %arg3: memref<3x4x32x8xf32, #tpu.memory_space<vmem>>, %arg4: memref<3x4x1x8xf32, #tpu.memory_space<vmem>>, %arg5: memref<4x8x32xf32, #tpu.memory_space<vmem>>, %arg6: memref<1x32xf32, #tpu.memory_space<vmem>>, %arg7: memref<1x32xf32, #tpu.memory_space<vmem>>, %arg8: memref<1x32xf32, #tpu.memory_space<vmem>>, %arg9: memref<1x64x32xf32, #tpu.memory_space<vmem>>) attributes {dimension_semantics = [#tpu.dimension_semantics<parallel>], iteration_bounds = array<i64: 2>, scalar_prefetch = 0 : i64, scratch_operands = 0 : i64, tpu.core_type = #tpu.core_type<tc>, window_params = [{transform_indices = @transform_0, window_bounds = array<i64: 1, 64, 32>}, {transform_indices = @transform_1, window_bounds = array<i64: 1, 64, 32>}, {pipeline_mode = #tpu.pipeline_mode<synchronous>, transform_indices = @transform_2, window_bounds = array<i64: 3, 4, 32, 8>}, {pipeline_mode = #tpu.pipeline_mode<synchronous>, transform_indices = @transform_3, window_bounds = array<i64: 3, 4, 1, 8>}, {pipeline_mode = #tpu.pipeline_mode<synchronous>, transform_indices = @transform_4, window_bounds = array<i64: 4, 8, 32>}, {pipeline_mode = #tpu.pipeline_mode<synchronous>, transform_indices = @transform_5, window_bounds = array<i64: 1, 32>}, {pipeline_mode = #tpu.pipeline_mode<synchronous>, transform_indices = @transform_6, window_bounds = array<i64: 1, 32>}, {pipeline_mode = #tpu.pipeline_mode<synchronous>, transform_indices = @transform_7, window_bounds = array<i64: 1, 32>}, {transform_indices = @transform_8, window_bounds = array<i64: 1, 64, 32>}]} {
    %c0 = arith.constant 0 : index
    %c0_0 = arith.constant 0 : index
    %c0_1 = arith.constant 0 : index
    %0 = vector.load %arg1[%c0, %c0_0, %c0_1] : memref<1x64x32xf32, #tpu.memory_space<vmem>>, vector<1x64x32xf32>
    %1 = vector.shape_cast %0 : vector<1x64x32xf32> to vector<64x32xf32>
    %c0_2 = arith.constant 0 : index
    %c0_3 = arith.constant 0 : index
    %c0_4 = arith.constant 0 : index
    %2 = vector.load %arg2[%c0_2, %c0_3, %c0_4] : memref<1x64x32xf32, #tpu.memory_space<vmem>>, vector<1x64x32xf32>
    %3 = vector.shape_cast %2 : vector<1x64x32xf32> to vector<64x32xf32>
    %4 = arith.truncf %1 : vector<64x32xf32> to vector<64x32xbf16>
    %5 = arith.truncf %3 : vector<64x32xf32> to vector<64x32xbf16>
    %c0_5 = arith.constant 0 : index
    %c0_6 = arith.constant 0 : index
    %c0_7 = arith.constant 0 : index
    %c0_8 = arith.constant 0 : index
    %6 = vector.load %arg3[%c0_5, %c0_6, %c0_7, %c0_8] : memref<3x4x32x8xf32, #tpu.memory_space<vmem>>, vector<3x4x32x8xf32>
    %7 = arith.truncf %6 : vector<3x4x32x8xf32> to vector<3x4x32x8xbf16>
    %c0_9 = arith.constant 0 : index
    %c0_10 = arith.constant 0 : index
    %c0_11 = arith.constant 0 : index
    %c0_12 = arith.constant 0 : index
    %8 = vector.load %arg4[%c0_9, %c0_10, %c0_11, %c0_12] : memref<3x4x1x8xf32, #tpu.memory_space<vmem>>, vector<3x4x1x8xf32>
    %c0_13 = arith.constant 0 : index
    %c0_14 = arith.constant 0 : index
    %c0_15 = arith.constant 0 : index
    %9 = vector.load %arg5[%c0_13, %c0_14, %c0_15] : memref<4x8x32xf32, #tpu.memory_space<vmem>>, vector<4x8x32xf32>
    %10 = arith.truncf %9 : vector<4x8x32xf32> to vector<4x8x32xbf16>
    %c0_16 = arith.constant 0 : index
    %c0_17 = arith.constant 0 : index
    %11 = vector.load %arg6[%c0_16, %c0_17] : memref<1x32xf32, #tpu.memory_space<vmem>>, vector<1x32xf32>
    %12 = vector.broadcast %11 : vector<1x32xf32> to vector<64x32xf32>
    %13 = arith.addf %1, %12 : vector<64x32xf32>
    %14 = vector.extract_strided_slice %7 {offsets = [0, 0, 0, 0], sizes = [1, 1, 32, 8], strides = [1, 1, 1, 1]} : vector<3x4x32x8xbf16> to vector<1x1x32x8xbf16>
    %15 = vector.shape_cast %14 : vector<1x1x32x8xbf16> to vector<32x8xbf16>
    %cst = arith.constant dense<0.000000e+00> : vector<64x8xf32>
    %16 = tpu.matmul %4, %15, %cst {dimension_numbers = #tpu.dot_dimension_numbers<[1], [0], [0], [1], [0, 0, 1, 1], [], []>} : vector<64x32xbf16>, vector<32x8xbf16>, vector<64x8xf32> -> vector<64x8xf32>
    %17 = vector.extract_strided_slice %8 {offsets = [0, 0, 0, 0], sizes = [1, 1, 1, 8], strides = [1, 1, 1, 1]} : vector<3x4x1x8xf32> to vector<1x1x1x8xf32>
    %18 = vector.shape_cast %17 : vector<1x1x1x8xf32> to vector<1x8xf32>
    %19 = vector.broadcast %18 : vector<1x8xf32> to vector<64x8xf32>
    %20 = arith.addf %16, %19 : vector<64x8xf32>
    %21 = vector.extract_strided_slice %7 {offsets = [1, 0, 0, 0], sizes = [1, 1, 32, 8], strides = [1, 1, 1, 1]} : vector<3x4x32x8xbf16> to vector<1x1x32x8xbf16>
    %22 = vector.shape_cast %21 : vector<1x1x32x8xbf16> to vector<32x8xbf16>
    %cst_18 = arith.constant dense<0.000000e+00> : vector<64x8xf32>
    %23 = tpu.matmul %5, %22, %cst_18 {dimension_numbers = #tpu.dot_dimension_numbers<[1], [0], [0], [1], [0, 0, 1, 1], [], []>} : vector<64x32xbf16>, vector<32x8xbf16>, vector<64x8xf32> -> vector<64x8xf32>
    %24 = vector.extract_strided_slice %8 {offsets = [1, 0, 0, 0], sizes = [1, 1, 1, 8], strides = [1, 1, 1, 1]} : vector<3x4x1x8xf32> to vector<1x1x1x8xf32>
    %25 = vector.shape_cast %24 : vector<1x1x1x8xf32> to vector<1x8xf32>
    %26 = vector.broadcast %25 : vector<1x8xf32> to vector<64x8xf32>
    %27 = arith.addf %23, %26 : vector<64x8xf32>
    %28 = vector.extract_strided_slice %7 {offsets = [2, 0, 0, 0], sizes = [1, 1, 32, 8], strides = [1, 1, 1, 1]} : vector<3x4x32x8xbf16> to vector<1x1x32x8xbf16>
    %29 = vector.shape_cast %28 : vector<1x1x32x8xbf16> to vector<32x8xbf16>
    %cst_19 = arith.constant dense<0.000000e+00> : vector<64x8xf32>
    %30 = tpu.matmul %5, %29, %cst_19 {dimension_numbers = #tpu.dot_dimension_numbers<[1], [0], [0], [1], [0, 0, 1, 1], [], []>} : vector<64x32xbf16>, vector<32x8xbf16>, vector<64x8xf32> -> vector<64x8xf32>
    %31 = vector.extract_strided_slice %8 {offsets = [2, 0, 0, 0], sizes = [1, 1, 1, 8], strides = [1, 1, 1, 1]} : vector<3x4x1x8xf32> to vector<1x1x1x8xf32>
    %32 = vector.shape_cast %31 : vector<1x1x1x8xf32> to vector<1x8xf32>
    %33 = vector.broadcast %32 : vector<1x8xf32> to vector<64x8xf32>
    %34 = arith.addf %30, %33 : vector<64x8xf32>
    %35 = arith.truncf %20 : vector<64x8xf32> to vector<64x8xbf16>
    %36 = arith.truncf %27 : vector<64x8xf32> to vector<64x8xbf16>
    %cst_20 = arith.constant dense<0.000000e+00> : vector<64x64xf32>
    %37 = tpu.matmul %35, %36, %cst_20 {dimension_numbers = #tpu.dot_dimension_numbers<[1], [1], [0], [0], [0, 0, 1, 0], [], []>} : vector<64x8xbf16>, vector<64x8xbf16>, vector<64x64xf32> -> vector<64x64xf32>
    %cst_21 = arith.constant 0.353553385 : f32
    %38 = vector.broadcast %cst_21 : f32 to vector<64x64xf32>
    %39 = arith.mulf %37, %38 : vector<64x64xf32>
    %cst_22 = arith.constant dense<0xFF800000> : vector<64xf32>
    %40 = vector.multi_reduction <maximumf>, %39, %cst_22 [1] : vector<64x64xf32> to vector<64xf32>
    %41 = vector.shape_cast %40 : vector<64xf32> to vector<64x1xf32>
    %42 = vector.broadcast %41 : vector<64x1xf32> to vector<64x64xf32>
    %43 = arith.subf %39, %42 : vector<64x64xf32>
    %44 = math.exp %43 : vector<64x64xf32>
    %cst_23 = arith.constant dense<0.000000e+00> : vector<64xf32>
    %45 = vector.multi_reduction <add>, %44, %cst_23 [1] : vector<64x64xf32> to vector<64xf32>
    %46 = vector.shape_cast %45 : vector<64xf32> to vector<64x1xf32>
    %47 = tpu.reciprocal %46 {approx = true} : vector<64x1xf32> -> vector<64x1xf32>
    %48 = vector.broadcast %47 : vector<64x1xf32> to vector<64x64xf32>
    %49 = arith.mulf %44, %48 : vector<64x64xf32>
    %50 = arith.truncf %49 : vector<64x64xf32> to vector<64x64xbf16>
    %51 = arith.truncf %34 : vector<64x8xf32> to vector<64x8xbf16>
    %cst_24 = arith.constant dense<0.000000e+00> : vector<64x8xf32>
    %52 = tpu.matmul %50, %51, %cst_24 {dimension_numbers = #tpu.dot_dimension_numbers<[1], [0], [0], [1], [0, 0, 1, 1], [], []>} : vector<64x64xbf16>, vector<64x8xbf16>, vector<64x8xf32> -> vector<64x8xf32>
    %53 = arith.truncf %52 : vector<64x8xf32> to vector<64x8xbf16>
    %54 = vector.extract_strided_slice %10 {offsets = [0, 0, 0], sizes = [1, 8, 32], strides = [1, 1, 1]} : vector<4x8x32xbf16> to vector<1x8x32xbf16>
    %55 = vector.shape_cast %54 : vector<1x8x32xbf16> to vector<8x32xbf16>
    %cst_25 = arith.constant dense<0.000000e+00> : vector<64x32xf32>
    %56 = tpu.matmul %53, %55, %cst_25 {dimension_numbers = #tpu.dot_dimension_numbers<[1], [0], [0], [1], [0, 0, 1, 1], [], []>} : vector<64x8xbf16>, vector<8x32xbf16>, vector<64x32xf32> -> vector<64x32xf32>
    %57 = arith.addf %13, %56 : vector<64x32xf32>
    %58 = vector.extract_strided_slice %7 {offsets = [0, 1, 0, 0], sizes = [1, 1, 32, 8], strides = [1, 1, 1, 1]} : vector<3x4x32x8xbf16> to vector<1x1x32x8xbf16>
    %59 = vector.shape_cast %58 : vector<1x1x32x8xbf16> to vector<32x8xbf16>
    %cst_26 = arith.constant dense<0.000000e+00> : vector<64x8xf32>
    %60 = tpu.matmul %4, %59, %cst_26 {dimension_numbers = #tpu.dot_dimension_numbers<[1], [0], [0], [1], [0, 0, 1, 1], [], []>} : vector<64x32xbf16>, vector<32x8xbf16>, vector<64x8xf32> -> vector<64x8xf32>
    %61 = vector.extract_strided_slice %8 {offsets = [0, 1, 0, 0], sizes = [1, 1, 1, 8], strides = [1, 1, 1, 1]} : vector<3x4x1x8xf32> to vector<1x1x1x8xf32>
    %62 = vector.shape_cast %61 : vector<1x1x1x8xf32> to vector<1x8xf32>
    %63 = vector.broadcast %62 : vector<1x8xf32> to vector<64x8xf32>
    %64 = arith.addf %60, %63 : vector<64x8xf32>
    %65 = vector.extract_strided_slice %7 {offsets = [1, 1, 0, 0], sizes = [1, 1, 32, 8], strides = [1, 1, 1, 1]} : vector<3x4x32x8xbf16> to vector<1x1x32x8xbf16>
    %66 = vector.shape_cast %65 : vector<1x1x32x8xbf16> to vector<32x8xbf16>
    %cst_27 = arith.constant dense<0.000000e+00> : vector<64x8xf32>
    %67 = tpu.matmul %5, %66, %cst_27 {dimension_numbers = #tpu.dot_dimension_numbers<[1], [0], [0], [1], [0, 0, 1, 1], [], []>} : vector<64x32xbf16>, vector<32x8xbf16>, vector<64x8xf32> -> vector<64x8xf32>
    %68 = vector.extract_strided_slice %8 {offsets = [1, 1, 0, 0], sizes = [1, 1, 1, 8], strides = [1, 1, 1, 1]} : vector<3x4x1x8xf32> to vector<1x1x1x8xf32>
    %69 = vector.shape_cast %68 : vector<1x1x1x8xf32> to vector<1x8xf32>
    %70 = vector.broadcast %69 : vector<1x8xf32> to vector<64x8xf32>
    %71 = arith.addf %67, %70 : vector<64x8xf32>
    %72 = vector.extract_strided_slice %7 {offsets = [2, 1, 0, 0], sizes = [1, 1, 32, 8], strides = [1, 1, 1, 1]} : vector<3x4x32x8xbf16> to vector<1x1x32x8xbf16>
    %73 = vector.shape_cast %72 : vector<1x1x32x8xbf16> to vector<32x8xbf16>
    %cst_28 = arith.constant dense<0.000000e+00> : vector<64x8xf32>
    %74 = tpu.matmul %5, %73, %cst_28 {dimension_numbers = #tpu.dot_dimension_numbers<[1], [0], [0], [1], [0, 0, 1, 1], [], []>} : vector<64x32xbf16>, vector<32x8xbf16>, vector<64x8xf32> -> vector<64x8xf32>
    %75 = vector.extract_strided_slice %8 {offsets = [2, 1, 0, 0], sizes = [1, 1, 1, 8], strides = [1, 1, 1, 1]} : vector<3x4x1x8xf32> to vector<1x1x1x8xf32>
    %76 = vector.shape_cast %75 : vector<1x1x1x8xf32> to vector<1x8xf32>
    %77 = vector.broadcast %76 : vector<1x8xf32> to vector<64x8xf32>
    %78 = arith.addf %74, %77 : vector<64x8xf32>
    %79 = arith.truncf %64 : vector<64x8xf32> to vector<64x8xbf16>
    %80 = arith.truncf %71 : vector<64x8xf32> to vector<64x8xbf16>
    %cst_29 = arith.constant dense<0.000000e+00> : vector<64x64xf32>
    %81 = tpu.matmul %79, %80, %cst_29 {dimension_numbers = #tpu.dot_dimension_numbers<[1], [1], [0], [0], [0, 0, 1, 0], [], []>} : vector<64x8xbf16>, vector<64x8xbf16>, vector<64x64xf32> -> vector<64x64xf32>
    %cst_30 = arith.constant 0.353553385 : f32
    %82 = vector.broadcast %cst_30 : f32 to vector<64x64xf32>
    %83 = arith.mulf %81, %82 : vector<64x64xf32>
    %cst_31 = arith.constant dense<0xFF800000> : vector<64xf32>
    %84 = vector.multi_reduction <maximumf>, %83, %cst_31 [1] : vector<64x64xf32> to vector<64xf32>
    %85 = vector.shape_cast %84 : vector<64xf32> to vector<64x1xf32>
    %86 = vector.broadcast %85 : vector<64x1xf32> to vector<64x64xf32>
    %87 = arith.subf %83, %86 : vector<64x64xf32>
    %88 = math.exp %87 : vector<64x64xf32>
    %cst_32 = arith.constant dense<0.000000e+00> : vector<64xf32>
    %89 = vector.multi_reduction <add>, %88, %cst_32 [1] : vector<64x64xf32> to vector<64xf32>
    %90 = vector.shape_cast %89 : vector<64xf32> to vector<64x1xf32>
    %91 = tpu.reciprocal %90 {approx = true} : vector<64x1xf32> -> vector<64x1xf32>
    %92 = vector.broadcast %91 : vector<64x1xf32> to vector<64x64xf32>
    %93 = arith.mulf %88, %92 : vector<64x64xf32>
    %94 = arith.truncf %93 : vector<64x64xf32> to vector<64x64xbf16>
    %95 = arith.truncf %78 : vector<64x8xf32> to vector<64x8xbf16>
    %cst_33 = arith.constant dense<0.000000e+00> : vector<64x8xf32>
    %96 = tpu.matmul %94, %95, %cst_33 {dimension_numbers = #tpu.dot_dimension_numbers<[1], [0], [0], [1], [0, 0, 1, 1], [], []>} : vector<64x64xbf16>, vector<64x8xbf16>, vector<64x8xf32> -> vector<64x8xf32>
    %97 = arith.truncf %96 : vector<64x8xf32> to vector<64x8xbf16>
    %98 = vector.extract_strided_slice %10 {offsets = [1, 0, 0], sizes = [1, 8, 32], strides = [1, 1, 1]} : vector<4x8x32xbf16> to vector<1x8x32xbf16>
    %99 = vector.shape_cast %98 : vector<1x8x32xbf16> to vector<8x32xbf16>
    %cst_34 = arith.constant dense<0.000000e+00> : vector<64x32xf32>
    %100 = tpu.matmul %97, %99, %cst_34 {dimension_numbers = #tpu.dot_dimension_numbers<[1], [0], [0], [1], [0, 0, 1, 1], [], []>} : vector<64x8xbf16>, vector<8x32xbf16>, vector<64x32xf32> -> vector<64x32xf32>
    %101 = arith.addf %57, %100 : vector<64x32xf32>
    %102 = vector.extract_strided_slice %7 {offsets = [0, 2, 0, 0], sizes = [1, 1, 32, 8], strides = [1, 1, 1, 1]} : vector<3x4x32x8xbf16> to vector<1x1x32x8xbf16>
    %103 = vector.shape_cast %102 : vector<1x1x32x8xbf16> to vector<32x8xbf16>
    %cst_35 = arith.constant dense<0.000000e+00> : vector<64x8xf32>
    %104 = tpu.matmul %4, %103, %cst_35 {dimension_numbers = #tpu.dot_dimension_numbers<[1], [0], [0], [1], [0, 0, 1, 1], [], []>} : vector<64x32xbf16>, vector<32x8xbf16>, vector<64x8xf32> -> vector<64x8xf32>
    %105 = vector.extract_strided_slice %8 {offsets = [0, 2, 0, 0], sizes = [1, 1, 1, 8], strides = [1, 1, 1, 1]} : vector<3x4x1x8xf32> to vector<1x1x1x8xf32>
    %106 = vector.shape_cast %105 : vector<1x1x1x8xf32> to vector<1x8xf32>
    %107 = vector.broadcast %106 : vector<1x8xf32> to vector<64x8xf32>
    %108 = arith.addf %104, %107 : vector<64x8xf32>
    %109 = vector.extract_strided_slice %7 {offsets = [1, 2, 0, 0], sizes = [1, 1, 32, 8], strides = [1, 1, 1, 1]} : vector<3x4x32x8xbf16> to vector<1x1x32x8xbf16>
    %110 = vector.shape_cast %109 : vector<1x1x32x8xbf16> to vector<32x8xbf16>
    %cst_36 = arith.constant dense<0.000000e+00> : vector<64x8xf32>
    %111 = tpu.matmul %5, %110, %cst_36 {dimension_numbers = #tpu.dot_dimension_numbers<[1], [0], [0], [1], [0, 0, 1, 1], [], []>} : vector<64x32xbf16>, vector<32x8xbf16>, vector<64x8xf32> -> vector<64x8xf32>
    %112 = vector.extract_strided_slice %8 {offsets = [1, 2, 0, 0], sizes = [1, 1, 1, 8], strides = [1, 1, 1, 1]} : vector<3x4x1x8xf32> to vector<1x1x1x8xf32>
    %113 = vector.shape_cast %112 : vector<1x1x1x8xf32> to vector<1x8xf32>
    %114 = vector.broadcast %113 : vector<1x8xf32> to vector<64x8xf32>
    %115 = arith.addf %111, %114 : vector<64x8xf32>
    %116 = vector.extract_strided_slice %7 {offsets = [2, 2, 0, 0], sizes = [1, 1, 32, 8], strides = [1, 1, 1, 1]} : vector<3x4x32x8xbf16> to vector<1x1x32x8xbf16>
    %117 = vector.shape_cast %116 : vector<1x1x32x8xbf16> to vector<32x8xbf16>
    %cst_37 = arith.constant dense<0.000000e+00> : vector<64x8xf32>
    %118 = tpu.matmul %5, %117, %cst_37 {dimension_numbers = #tpu.dot_dimension_numbers<[1], [0], [0], [1], [0, 0, 1, 1], [], []>} : vector<64x32xbf16>, vector<32x8xbf16>, vector<64x8xf32> -> vector<64x8xf32>
    %119 = vector.extract_strided_slice %8 {offsets = [2, 2, 0, 0], sizes = [1, 1, 1, 8], strides = [1, 1, 1, 1]} : vector<3x4x1x8xf32> to vector<1x1x1x8xf32>
    %120 = vector.shape_cast %119 : vector<1x1x1x8xf32> to vector<1x8xf32>
    %121 = vector.broadcast %120 : vector<1x8xf32> to vector<64x8xf32>
    %122 = arith.addf %118, %121 : vector<64x8xf32>
    %123 = arith.truncf %108 : vector<64x8xf32> to vector<64x8xbf16>
    %124 = arith.truncf %115 : vector<64x8xf32> to vector<64x8xbf16>
    %cst_38 = arith.constant dense<0.000000e+00> : vector<64x64xf32>
    %125 = tpu.matmul %123, %124, %cst_38 {dimension_numbers = #tpu.dot_dimension_numbers<[1], [1], [0], [0], [0, 0, 1, 0], [], []>} : vector<64x8xbf16>, vector<64x8xbf16>, vector<64x64xf32> -> vector<64x64xf32>
    %cst_39 = arith.constant 0.353553385 : f32
    %126 = vector.broadcast %cst_39 : f32 to vector<64x64xf32>
    %127 = arith.mulf %125, %126 : vector<64x64xf32>
    %cst_40 = arith.constant dense<0xFF800000> : vector<64xf32>
    %128 = vector.multi_reduction <maximumf>, %127, %cst_40 [1] : vector<64x64xf32> to vector<64xf32>
    %129 = vector.shape_cast %128 : vector<64xf32> to vector<64x1xf32>
    %130 = vector.broadcast %129 : vector<64x1xf32> to vector<64x64xf32>
    %131 = arith.subf %127, %130 : vector<64x64xf32>
    %132 = math.exp %131 : vector<64x64xf32>
    %cst_41 = arith.constant dense<0.000000e+00> : vector<64xf32>
    %133 = vector.multi_reduction <add>, %132, %cst_41 [1] : vector<64x64xf32> to vector<64xf32>
    %134 = vector.shape_cast %133 : vector<64xf32> to vector<64x1xf32>
    %135 = tpu.reciprocal %134 {approx = true} : vector<64x1xf32> -> vector<64x1xf32>
    %136 = vector.broadcast %135 : vector<64x1xf32> to vector<64x64xf32>
    %137 = arith.mulf %132, %136 : vector<64x64xf32>
    %138 = arith.truncf %137 : vector<64x64xf32> to vector<64x64xbf16>
    %139 = arith.truncf %122 : vector<64x8xf32> to vector<64x8xbf16>
    %cst_42 = arith.constant dense<0.000000e+00> : vector<64x8xf32>
    %140 = tpu.matmul %138, %139, %cst_42 {dimension_numbers = #tpu.dot_dimension_numbers<[1], [0], [0], [1], [0, 0, 1, 1], [], []>} : vector<64x64xbf16>, vector<64x8xbf16>, vector<64x8xf32> -> vector<64x8xf32>
    %141 = arith.truncf %140 : vector<64x8xf32> to vector<64x8xbf16>
    %142 = vector.extract_strided_slice %10 {offsets = [2, 0, 0], sizes = [1, 8, 32], strides = [1, 1, 1]} : vector<4x8x32xbf16> to vector<1x8x32xbf16>
    %143 = vector.shape_cast %142 : vector<1x8x32xbf16> to vector<8x32xbf16>
    %cst_43 = arith.constant dense<0.000000e+00> : vector<64x32xf32>
    %144 = tpu.matmul %141, %143, %cst_43 {dimension_numbers = #tpu.dot_dimension_numbers<[1], [0], [0], [1], [0, 0, 1, 1], [], []>} : vector<64x8xbf16>, vector<8x32xbf16>, vector<64x32xf32> -> vector<64x32xf32>
    %145 = arith.addf %101, %144 : vector<64x32xf32>
    %146 = vector.extract_strided_slice %7 {offsets = [0, 3, 0, 0], sizes = [1, 1, 32, 8], strides = [1, 1, 1, 1]} : vector<3x4x32x8xbf16> to vector<1x1x32x8xbf16>
    %147 = vector.shape_cast %146 : vector<1x1x32x8xbf16> to vector<32x8xbf16>
    %cst_44 = arith.constant dense<0.000000e+00> : vector<64x8xf32>
    %148 = tpu.matmul %4, %147, %cst_44 {dimension_numbers = #tpu.dot_dimension_numbers<[1], [0], [0], [1], [0, 0, 1, 1], [], []>} : vector<64x32xbf16>, vector<32x8xbf16>, vector<64x8xf32> -> vector<64x8xf32>
    %149 = vector.extract_strided_slice %8 {offsets = [0, 3, 0, 0], sizes = [1, 1, 1, 8], strides = [1, 1, 1, 1]} : vector<3x4x1x8xf32> to vector<1x1x1x8xf32>
    %150 = vector.shape_cast %149 : vector<1x1x1x8xf32> to vector<1x8xf32>
    %151 = vector.broadcast %150 : vector<1x8xf32> to vector<64x8xf32>
    %152 = arith.addf %148, %151 : vector<64x8xf32>
    %153 = vector.extract_strided_slice %7 {offsets = [1, 3, 0, 0], sizes = [1, 1, 32, 8], strides = [1, 1, 1, 1]} : vector<3x4x32x8xbf16> to vector<1x1x32x8xbf16>
    %154 = vector.shape_cast %153 : vector<1x1x32x8xbf16> to vector<32x8xbf16>
    %cst_45 = arith.constant dense<0.000000e+00> : vector<64x8xf32>
    %155 = tpu.matmul %5, %154, %cst_45 {dimension_numbers = #tpu.dot_dimension_numbers<[1], [0], [0], [1], [0, 0, 1, 1], [], []>} : vector<64x32xbf16>, vector<32x8xbf16>, vector<64x8xf32> -> vector<64x8xf32>
    %156 = vector.extract_strided_slice %8 {offsets = [1, 3, 0, 0], sizes = [1, 1, 1, 8], strides = [1, 1, 1, 1]} : vector<3x4x1x8xf32> to vector<1x1x1x8xf32>
    %157 = vector.shape_cast %156 : vector<1x1x1x8xf32> to vector<1x8xf32>
    %158 = vector.broadcast %157 : vector<1x8xf32> to vector<64x8xf32>
    %159 = arith.addf %155, %158 : vector<64x8xf32>
    %160 = vector.extract_strided_slice %7 {offsets = [2, 3, 0, 0], sizes = [1, 1, 32, 8], strides = [1, 1, 1, 1]} : vector<3x4x32x8xbf16> to vector<1x1x32x8xbf16>
    %161 = vector.shape_cast %160 : vector<1x1x32x8xbf16> to vector<32x8xbf16>
    %cst_46 = arith.constant dense<0.000000e+00> : vector<64x8xf32>
    %162 = tpu.matmul %5, %161, %cst_46 {dimension_numbers = #tpu.dot_dimension_numbers<[1], [0], [0], [1], [0, 0, 1, 1], [], []>} : vector<64x32xbf16>, vector<32x8xbf16>, vector<64x8xf32> -> vector<64x8xf32>
    %163 = vector.extract_strided_slice %8 {offsets = [2, 3, 0, 0], sizes = [1, 1, 1, 8], strides = [1, 1, 1, 1]} : vector<3x4x1x8xf32> to vector<1x1x1x8xf32>
    %164 = vector.shape_cast %163 : vector<1x1x1x8xf32> to vector<1x8xf32>
    %165 = vector.broadcast %164 : vector<1x8xf32> to vector<64x8xf32>
    %166 = arith.addf %162, %165 : vector<64x8xf32>
    %167 = arith.truncf %152 : vector<64x8xf32> to vector<64x8xbf16>
    %168 = arith.truncf %159 : vector<64x8xf32> to vector<64x8xbf16>
    %cst_47 = arith.constant dense<0.000000e+00> : vector<64x64xf32>
    %169 = tpu.matmul %167, %168, %cst_47 {dimension_numbers = #tpu.dot_dimension_numbers<[1], [1], [0], [0], [0, 0, 1, 0], [], []>} : vector<64x8xbf16>, vector<64x8xbf16>, vector<64x64xf32> -> vector<64x64xf32>
    %cst_48 = arith.constant 0.353553385 : f32
    %170 = vector.broadcast %cst_48 : f32 to vector<64x64xf32>
    %171 = arith.mulf %169, %170 : vector<64x64xf32>
    %cst_49 = arith.constant dense<0xFF800000> : vector<64xf32>
    %172 = vector.multi_reduction <maximumf>, %171, %cst_49 [1] : vector<64x64xf32> to vector<64xf32>
    %173 = vector.shape_cast %172 : vector<64xf32> to vector<64x1xf32>
    %174 = vector.broadcast %173 : vector<64x1xf32> to vector<64x64xf32>
    %175 = arith.subf %171, %174 : vector<64x64xf32>
    %176 = math.exp %175 : vector<64x64xf32>
    %cst_50 = arith.constant dense<0.000000e+00> : vector<64xf32>
    %177 = vector.multi_reduction <add>, %176, %cst_50 [1] : vector<64x64xf32> to vector<64xf32>
    %178 = vector.shape_cast %177 : vector<64xf32> to vector<64x1xf32>
    %179 = tpu.reciprocal %178 {approx = true} : vector<64x1xf32> -> vector<64x1xf32>
    %180 = vector.broadcast %179 : vector<64x1xf32> to vector<64x64xf32>
    %181 = arith.mulf %176, %180 : vector<64x64xf32>
    %182 = arith.truncf %181 : vector<64x64xf32> to vector<64x64xbf16>
    %183 = arith.truncf %166 : vector<64x8xf32> to vector<64x8xbf16>
    %cst_51 = arith.constant dense<0.000000e+00> : vector<64x8xf32>
    %184 = tpu.matmul %182, %183, %cst_51 {dimension_numbers = #tpu.dot_dimension_numbers<[1], [0], [0], [1], [0, 0, 1, 1], [], []>} : vector<64x64xbf16>, vector<64x8xbf16>, vector<64x8xf32> -> vector<64x8xf32>
    %185 = arith.truncf %184 : vector<64x8xf32> to vector<64x8xbf16>
    %186 = vector.extract_strided_slice %10 {offsets = [3, 0, 0], sizes = [1, 8, 32], strides = [1, 1, 1]} : vector<4x8x32xbf16> to vector<1x8x32xbf16>
    %187 = vector.shape_cast %186 : vector<1x8x32xbf16> to vector<8x32xbf16>
    %cst_52 = arith.constant dense<0.000000e+00> : vector<64x32xf32>
    %188 = tpu.matmul %185, %187, %cst_52 {dimension_numbers = #tpu.dot_dimension_numbers<[1], [0], [0], [1], [0, 0, 1, 1], [], []>} : vector<64x8xbf16>, vector<8x32xbf16>, vector<64x32xf32> -> vector<64x32xf32>
    %189 = arith.addf %145, %188 : vector<64x32xf32>
    %cst_53 = arith.constant dense<0.000000e+00> : vector<64xf32>
    %190 = vector.multi_reduction <add>, %189, %cst_53 [1] : vector<64x32xf32> to vector<64xf32>
    %191 = vector.shape_cast %190 : vector<64xf32> to vector<64x1xf32>
    %cst_54 = arith.constant 3.200000e+01 : f32
    %192 = vector.broadcast %cst_54 : f32 to vector<64x1xf32>
    %193 = arith.divf %191, %192 : vector<64x1xf32>
    %194 = vector.broadcast %193 : vector<64x1xf32> to vector<64x32xf32>
    %195 = arith.subf %189, %194 : vector<64x32xf32>
    %196 = arith.mulf %195, %195 : vector<64x32xf32>
    %cst_55 = arith.constant dense<0.000000e+00> : vector<64xf32>
    %197 = vector.multi_reduction <add>, %196, %cst_55 [1] : vector<64x32xf32> to vector<64xf32>
    %198 = vector.shape_cast %197 : vector<64xf32> to vector<64x1xf32>
    %cst_56 = arith.constant 3.200000e+01 : f32
    %199 = vector.broadcast %cst_56 : f32 to vector<64x1xf32>
    %200 = arith.divf %198, %199 : vector<64x1xf32>
    %201 = vector.broadcast %193 : vector<64x1xf32> to vector<64x32xf32>
    %202 = arith.subf %189, %201 : vector<64x32xf32>
    %cst_57 = arith.constant 9.99999974E-6 : f32
    %203 = vector.broadcast %cst_57 : f32 to vector<64x1xf32>
    %204 = arith.addf %200, %203 : vector<64x1xf32>
    %205 = math.rsqrt %204 : vector<64x1xf32>
    %206 = vector.broadcast %205 : vector<64x1xf32> to vector<64x32xf32>
    %207 = arith.mulf %202, %206 : vector<64x32xf32>
    %c0_58 = arith.constant 0 : index
    %c0_59 = arith.constant 0 : index
    %208 = vector.load %arg7[%c0_58, %c0_59] : memref<1x32xf32, #tpu.memory_space<vmem>>, vector<1x32xf32>
    %209 = vector.broadcast %208 : vector<1x32xf32> to vector<64x32xf32>
    %210 = arith.mulf %207, %209 : vector<64x32xf32>
    %c0_60 = arith.constant 0 : index
    %c0_61 = arith.constant 0 : index
    %211 = vector.load %arg8[%c0_60, %c0_61] : memref<1x32xf32, #tpu.memory_space<vmem>>, vector<1x32xf32>
    %212 = vector.broadcast %211 : vector<1x32xf32> to vector<64x32xf32>
    %213 = arith.addf %210, %212 : vector<64x32xf32>
    %c0_62 = arith.constant 0 : index
    %c0_63 = arith.constant 0 : index
    %c0_64 = arith.constant 0 : index
    %214 = vector.load %arg9[%c0_62, %c0_63, %c0_64] : memref<1x64x32xf32, #tpu.memory_space<vmem>>, vector<1x64x32xf32>
    %215 = vector.shape_cast %214 : vector<1x64x32xf32> to vector<64x32xf32>
    %216 = vector.shape_cast %213 : vector<64x32xf32> to vector<1x64x32xf32>
    tpu.vector_store %arg9[%c0_62, %c0_63, %c0_64], %216 {strides = array<i32>} : memref<1x64x32xf32, #tpu.memory_space<vmem>>, vector<1x64x32xf32>,
    return
  }
  func.func @transform_0(%arg0: i32) -> (i32, i32, i32) {
    %c0_i32 = arith.constant 0 : i32
    %c0_i32_0 = arith.constant 0 : i32
    %c0_i32_1 = arith.constant 0 : i32
    return %arg0, %c0_i32, %c0_i32_0 : i32, i32, i32
  }
  func.func @transform_1(%arg0: i32) -> (i32, i32, i32) {
    %c0_i32 = arith.constant 0 : i32
    %c0_i32_0 = arith.constant 0 : i32
    %c0_i32_1 = arith.constant 0 : i32
    return %arg0, %c0_i32, %c0_i32_0 : i32, i32, i32
  }
  func.func @transform_2(%arg0: i32) -> (i32, i32, i32, i32) {
    %c0_i32 = arith.constant 0 : i32
    %c0_i32_0 = arith.constant 0 : i32
    %c0_i32_1 = arith.constant 0 : i32
    %c0_i32_2 = arith.constant 0 : i32
    %c0_i32_3 = arith.constant 0 : i32
    return %c0_i32, %c0_i32_0, %c0_i32_1, %c0_i32_2 : i32, i32, i32, i32
  }
  func.func @transform_3(%arg0: i32) -> (i32, i32, i32, i32) {
    %c0_i32 = arith.constant 0 : i32
    %c0_i32_0 = arith.constant 0 : i32
    %c0_i32_1 = arith.constant 0 : i32
    %c0_i32_2 = arith.constant 0 : i32
    %c0_i32_3 = arith.constant 0 : i32
    return %c0_i32, %c0_i32_0, %c0_i32_1, %c0_i32_2 : i32, i32, i32, i32
  }
  func.func @transform_4(%arg0: i32) -> (i32, i32, i32) {
    %c0_i32 = arith.constant 0 : i32
    %c0_i32_0 = arith.constant 0 : i32
    %c0_i32_1 = arith.constant 0 : i32
    %c0_i32_2 = arith.constant 0 : i32
    return %c0_i32, %c0_i32_0, %c0_i32_1 : i32, i32, i32
  }
  func.func @transform_5(%arg0: i32) -> (i32, i32) {
    %c0_i32 = arith.constant 0 : i32
    %c0_i32_0 = arith.constant 0 : i32
    %c0_i32_1 = arith.constant 0 : i32
    return %c0_i32, %c0_i32_0 : i32, i32
  }
  func.func @transform_6(%arg0: i32) -> (i32, i32) {
    %c0_i32 = arith.constant 0 : i32
    %c0_i32_0 = arith.constant 0 : i32
    %c0_i32_1 = arith.constant 0 : i32
    return %c0_i32, %c0_i32_0 : i32, i32
  }
  func.func @transform_7(%arg0: i32) -> (i32, i32) {
    %c0_i32 = arith.constant 0 : i32
    %c0_i32_0 = arith.constant 0 : i32
    %c0_i32_1 = arith.constant 0 : i32
    return %c0_i32, %c0_i32_0 : i32, i32
  }
  func.func @transform_8(%arg0: i32) -> (i32, i32, i32) {
    %c0_i32 = arith.constant 0 : i32
    %c0_i32_0 = arith.constant 0 : i32
    %c0_i32_1 = arith.constant 0 : i32
    return %arg0, %c0_i32, %c0_i32_0 : i32, i32, i32
  }
}

module attributes {stable_mosaic.version = 11 : i64} {
  func.func @_ffn_block_kernel(%arg0: i32, %arg1: memref<128x32xf32, #tpu.memory_space<vmem>>, %arg2: memref<32x64xf32, #tpu.memory_space<vmem>>, %arg3: memref<1x64xf32, #tpu.memory_space<vmem>>, %arg4: memref<64x32xf32, #tpu.memory_space<vmem>>, %arg5: memref<1x32xf32, #tpu.memory_space<vmem>>, %arg6: memref<1x32xf32, #tpu.memory_space<vmem>>, %arg7: memref<1x32xf32, #tpu.memory_space<vmem>>, %arg8: memref<128x32xf32, #tpu.memory_space<vmem>>) attributes {dimension_semantics = [#tpu.dimension_semantics<parallel>], iteration_bounds = array<i64: 1>, scalar_prefetch = 0 : i64, scratch_operands = 0 : i64, tpu.core_type = #tpu.core_type<tc>, window_params = [{transform_indices = @transform_0, window_bounds = array<i64: 128, 32>}, {pipeline_mode = #tpu.pipeline_mode<synchronous>, transform_indices = @transform_1, window_bounds = array<i64: 32, 64>}, {pipeline_mode = #tpu.pipeline_mode<synchronous>, transform_indices = @transform_2, window_bounds = array<i64: 1, 64>}, {pipeline_mode = #tpu.pipeline_mode<synchronous>, transform_indices = @transform_3, window_bounds = array<i64: 64, 32>}, {pipeline_mode = #tpu.pipeline_mode<synchronous>, transform_indices = @transform_4, window_bounds = array<i64: 1, 32>}, {pipeline_mode = #tpu.pipeline_mode<synchronous>, transform_indices = @transform_5, window_bounds = array<i64: 1, 32>}, {pipeline_mode = #tpu.pipeline_mode<synchronous>, transform_indices = @transform_6, window_bounds = array<i64: 1, 32>}, {transform_indices = @transform_7, window_bounds = array<i64: 128, 32>}]} {
    %c0 = arith.constant 0 : index
    %c0_0 = arith.constant 0 : index
    %0 = vector.load %arg1[%c0, %c0_0] : memref<128x32xf32, #tpu.memory_space<vmem>>, vector<128x32xf32>
    %1 = arith.truncf %0 : vector<128x32xf32> to vector<128x32xbf16>
    %c0_1 = arith.constant 0 : index
    %c0_2 = arith.constant 0 : index
    %2 = vector.load %arg2[%c0_1, %c0_2] : memref<32x64xf32, #tpu.memory_space<vmem>>, vector<32x64xf32>
    %3 = arith.truncf %2 : vector<32x64xf32> to vector<32x64xbf16>
    %cst = arith.constant dense<0.000000e+00> : vector<128x64xf32>
    %4 = tpu.matmul %1, %3, %cst {dimension_numbers = #tpu.dot_dimension_numbers<[1], [0], [0], [1], [0, 0, 1, 1], [], []>} : vector<128x32xbf16>, vector<32x64xbf16>, vector<128x64xf32> -> vector<128x64xf32>
    %c0_3 = arith.constant 0 : index
    %c0_4 = arith.constant 0 : index
    %5 = vector.load %arg3[%c0_3, %c0_4] : memref<1x64xf32, #tpu.memory_space<vmem>>, vector<1x64xf32>
    %6 = vector.broadcast %5 : vector<1x64xf32> to vector<128x64xf32>
    %7 = arith.addf %4, %6 : vector<128x64xf32>
    %cst_5 = arith.constant 0.000000e+00 : f32
    %8 = vector.broadcast %cst_5 : f32 to vector<128x64xf32>
    %9 = arith.maximumf %7, %8 : vector<128x64xf32>
    %10 = arith.truncf %9 : vector<128x64xf32> to vector<128x64xbf16>
    %c0_6 = arith.constant 0 : index
    %c0_7 = arith.constant 0 : index
    %11 = vector.load %arg4[%c0_6, %c0_7] : memref<64x32xf32, #tpu.memory_space<vmem>>, vector<64x32xf32>
    %12 = arith.truncf %11 : vector<64x32xf32> to vector<64x32xbf16>
    %cst_8 = arith.constant dense<0.000000e+00> : vector<128x32xf32>
    %13 = tpu.matmul %10, %12, %cst_8 {dimension_numbers = #tpu.dot_dimension_numbers<[1], [0], [0], [1], [0, 0, 1, 1], [], []>} : vector<128x64xbf16>, vector<64x32xbf16>, vector<128x32xf32> -> vector<128x32xf32>
    %c0_9 = arith.constant 0 : index
    %c0_10 = arith.constant 0 : index
    %14 = vector.load %arg5[%c0_9, %c0_10] : memref<1x32xf32, #tpu.memory_space<vmem>>, vector<1x32xf32>
    %15 = vector.broadcast %14 : vector<1x32xf32> to vector<128x32xf32>
    %16 = arith.addf %13, %15 : vector<128x32xf32>
    %17 = arith.addf %0, %16 : vector<128x32xf32>
    %cst_11 = arith.constant dense<0.000000e+00> : vector<128xf32>
    %18 = vector.multi_reduction <add>, %17, %cst_11 [1] : vector<128x32xf32> to vector<128xf32>
    %19 = vector.shape_cast %18 : vector<128xf32> to vector<128x1xf32>
    %cst_12 = arith.constant 3.200000e+01 : f32
    %20 = vector.broadcast %cst_12 : f32 to vector<128x1xf32>
    %21 = arith.divf %19, %20 : vector<128x1xf32>
    %22 = vector.broadcast %21 : vector<128x1xf32> to vector<128x32xf32>
    %23 = arith.subf %17, %22 : vector<128x32xf32>
    %24 = arith.mulf %23, %23 : vector<128x32xf32>
    %cst_13 = arith.constant dense<0.000000e+00> : vector<128xf32>
    %25 = vector.multi_reduction <add>, %24, %cst_13 [1] : vector<128x32xf32> to vector<128xf32>
    %26 = vector.shape_cast %25 : vector<128xf32> to vector<128x1xf32>
    %cst_14 = arith.constant 3.200000e+01 : f32
    %27 = vector.broadcast %cst_14 : f32 to vector<128x1xf32>
    %28 = arith.divf %26, %27 : vector<128x1xf32>
    %29 = vector.broadcast %21 : vector<128x1xf32> to vector<128x32xf32>
    %30 = arith.subf %17, %29 : vector<128x32xf32>
    %cst_15 = arith.constant 9.99999974E-6 : f32
    %31 = vector.broadcast %cst_15 : f32 to vector<128x1xf32>
    %32 = arith.addf %28, %31 : vector<128x1xf32>
    %33 = math.rsqrt %32 : vector<128x1xf32>
    %34 = vector.broadcast %33 : vector<128x1xf32> to vector<128x32xf32>
    %35 = arith.mulf %30, %34 : vector<128x32xf32>
    %c0_16 = arith.constant 0 : index
    %c0_17 = arith.constant 0 : index
    %36 = vector.load %arg6[%c0_16, %c0_17] : memref<1x32xf32, #tpu.memory_space<vmem>>, vector<1x32xf32>
    %37 = vector.broadcast %36 : vector<1x32xf32> to vector<128x32xf32>
    %38 = arith.mulf %35, %37 : vector<128x32xf32>
    %c0_18 = arith.constant 0 : index
    %c0_19 = arith.constant 0 : index
    %39 = vector.load %arg7[%c0_18, %c0_19] : memref<1x32xf32, #tpu.memory_space<vmem>>, vector<1x32xf32>
    %40 = vector.broadcast %39 : vector<1x32xf32> to vector<128x32xf32>
    %41 = arith.addf %38, %40 : vector<128x32xf32>
    %c0_20 = arith.constant 0 : index
    %c0_21 = arith.constant 0 : index
    %42 = vector.load %arg8[%c0_20, %c0_21] : memref<128x32xf32, #tpu.memory_space<vmem>>, vector<128x32xf32>
    tpu.vector_store %arg8[%c0_20, %c0_21], %41 {strides = array<i32>} : memref<128x32xf32, #tpu.memory_space<vmem>>, vector<128x32xf32>,
    return
  }
  func.func @transform_0(%arg0: i32) -> (i32, i32) {
    %c0_i32 = arith.constant 0 : i32
    %c0_i32_0 = arith.constant 0 : i32
    return %arg0, %c0_i32 : i32, i32
  }
  func.func @transform_1(%arg0: i32) -> (i32, i32) {
    %c0_i32 = arith.constant 0 : i32
    %c0_i32_0 = arith.constant 0 : i32
    %c0_i32_1 = arith.constant 0 : i32
    return %c0_i32, %c0_i32_0 : i32, i32
  }
  func.func @transform_2(%arg0: i32) -> (i32, i32) {
    %c0_i32 = arith.constant 0 : i32
    %c0_i32_0 = arith.constant 0 : i32
    %c0_i32_1 = arith.constant 0 : i32
    return %c0_i32, %c0_i32_0 : i32, i32
  }
  func.func @transform_3(%arg0: i32) -> (i32, i32) {
    %c0_i32 = arith.constant 0 : i32
    %c0_i32_0 = arith.constant 0 : i32
    %c0_i32_1 = arith.constant 0 : i32
    return %c0_i32, %c0_i32_0 : i32, i32
  }
  func.func @transform_4(%arg0: i32) -> (i32, i32) {
    %c0_i32 = arith.constant 0 : i32
    %c0_i32_0 = arith.constant 0 : i32
    %c0_i32_1 = arith.constant 0 : i32
    return %c0_i32, %c0_i32_0 : i32, i32
  }
  func.func @transform_5(%arg0: i32) -> (i32, i32) {
    %c0_i32 = arith.constant 0 : i32
    %c0_i32_0 = arith.constant 0 : i32
    %c0_i32_1 = arith.constant 0 : i32
    return %c0_i32, %c0_i32_0 : i32, i32
  }
  func.func @transform_6(%arg0: i32) -> (i32, i32) {
    %c0_i32 = arith.constant 0 : i32
    %c0_i32_0 = arith.constant 0 : i32
    %c0_i32_1 = arith.constant 0 : i32
    return %c0_i32, %c0_i32_0 : i32, i32
  }
  func.func @transform_7(%arg0: i32) -> (i32, i32) {
    %c0_i32 = arith.constant 0 : i32
    %c0_i32_0 = arith.constant 0 : i32
    return %arg0, %c0_i32 : i32, i32
  }
}

module attributes {stable_mosaic.version = 11 : i64} {
  func.func @_matmul_bias_kernel(%arg0: i32, %arg1: i32, %arg2: i32, %arg3: memref<128x32xf32, #tpu.memory_space<vmem>>, %arg4: memref<32x32xf32, #tpu.memory_space<vmem>>, %arg5: memref<1x32xf32, #tpu.memory_space<vmem>>, %arg6: memref<128x32xf32, #tpu.memory_space<vmem>>, %arg7: memref<128x32xf32, #tpu.memory_space<vmem>>) attributes {dimension_semantics = [#tpu.dimension_semantics<parallel>, #tpu.dimension_semantics<parallel>, #tpu.dimension_semantics<arbitrary>], iteration_bounds = array<i64: 1, 1, 1>, scalar_prefetch = 0 : i64, scratch_operands = 1 : i64, tpu.core_type = #tpu.core_type<tc>, window_params = [{transform_indices = @transform_0, window_bounds = array<i64: 128, 32>}, {transform_indices = @transform_1, window_bounds = array<i64: 32, 32>}, {transform_indices = @transform_2, window_bounds = array<i64: 1, 32>}, {transform_indices = @transform_3, window_bounds = array<i64: 128, 32>}]} {
    %c0_i32 = arith.constant 0 : i32
    %0 = arith.cmpi eq, %arg2, %c0_i32 : i32
    %1 = arith.extui %0 : i1 to i32
    %c0_i32_0 = arith.constant 0 : i32
    %2 = arith.cmpi ne, %1, %c0_i32_0 : i32
    scf.if %2 {
      %cst_10 = arith.constant 0.000000e+00 : f32
      %14 = vector.broadcast %cst_10 : f32 to vector<128x32xf32>
      %c0_11 = arith.constant 0 : index
      %c0_12 = arith.constant 0 : index
      %15 = vector.load %arg7[%c0_11, %c0_12] : memref<128x32xf32, #tpu.memory_space<vmem>>, vector<128x32xf32>
      tpu.vector_store %arg7[%c0_11, %c0_12], %14 {strides = array<i32>} : memref<128x32xf32, #tpu.memory_space<vmem>>, vector<128x32xf32>,
    } else {
    }
    %c0 = arith.constant 0 : index
    %c0_1 = arith.constant 0 : index
    %3 = vector.load %arg7[%c0, %c0_1] : memref<128x32xf32, #tpu.memory_space<vmem>>, vector<128x32xf32>
    %c0_2 = arith.constant 0 : index
    %c0_3 = arith.constant 0 : index
    %4 = vector.load %arg3[%c0_2, %c0_3] : memref<128x32xf32, #tpu.memory_space<vmem>>, vector<128x32xf32>
    %5 = arith.truncf %4 : vector<128x32xf32> to vector<128x32xbf16>
    %c0_4 = arith.constant 0 : index
    %c0_5 = arith.constant 0 : index
    %6 = vector.load %arg4[%c0_4, %c0_5] : memref<32x32xf32, #tpu.memory_space<vmem>>, vector<32x32xf32>
    %7 = arith.truncf %6 : vector<32x32xf32> to vector<32x32xbf16>
    %cst = arith.constant dense<0.000000e+00> : vector<128x32xf32>
    %8 = tpu.matmul %5, %7, %cst {dimension_numbers = #tpu.dot_dimension_numbers<[1], [0], [0], [1], [0, 0, 1, 1], [], []>} : vector<128x32xbf16>, vector<32x32xbf16>, vector<128x32xf32> -> vector<128x32xf32>
    %9 = arith.addf %3, %8 : vector<128x32xf32>
    %c0_6 = arith.constant 0 : index
    %c0_7 = arith.constant 0 : index
    %10 = vector.load %arg7[%c0_6, %c0_7] : memref<128x32xf32, #tpu.memory_space<vmem>>, vector<128x32xf32>
    tpu.vector_store %arg7[%c0_6, %c0_7], %9 {strides = array<i32>} : memref<128x32xf32, #tpu.memory_space<vmem>>, vector<128x32xf32>,
    %c0_i32_8 = arith.constant 0 : i32
    %11 = arith.cmpi eq, %arg2, %c0_i32_8 : i32
    %12 = arith.extui %11 : i1 to i32
    %c0_i32_9 = arith.constant 0 : i32
    %13 = arith.cmpi ne, %12, %c0_i32_9 : i32
    scf.if %13 {
      %c0_10 = arith.constant 0 : index
      %c0_11 = arith.constant 0 : index
      %14 = vector.load %arg7[%c0_10, %c0_11] : memref<128x32xf32, #tpu.memory_space<vmem>>, vector<128x32xf32>
      %c0_12 = arith.constant 0 : index
      %c0_13 = arith.constant 0 : index
      %15 = vector.load %arg5[%c0_12, %c0_13] : memref<1x32xf32, #tpu.memory_space<vmem>>, vector<1x32xf32>
      %16 = vector.broadcast %15 : vector<1x32xf32> to vector<128x32xf32>
      %17 = arith.addf %14, %16 : vector<128x32xf32>
      %c0_14 = arith.constant 0 : index
      %c0_15 = arith.constant 0 : index
      %18 = vector.load %arg6[%c0_14, %c0_15] : memref<128x32xf32, #tpu.memory_space<vmem>>, vector<128x32xf32>
      tpu.vector_store %arg6[%c0_14, %c0_15], %17 {strides = array<i32>} : memref<128x32xf32, #tpu.memory_space<vmem>>, vector<128x32xf32>,
    } else {
    }
    return
  }
  func.func @transform_0(%arg0: i32, %arg1: i32, %arg2: i32) -> (i32, i32) {
    %c0_i32 = arith.constant 0 : i32
    return %arg0, %arg2 : i32, i32
  }
  func.func @transform_1(%arg0: i32, %arg1: i32, %arg2: i32) -> (i32, i32) {
    %c0_i32 = arith.constant 0 : i32
    return %arg2, %arg1 : i32, i32
  }
  func.func @transform_2(%arg0: i32, %arg1: i32, %arg2: i32) -> (i32, i32) {
    %c0_i32 = arith.constant 0 : i32
    %c0_i32_0 = arith.constant 0 : i32
    return %c0_i32, %arg1 : i32, i32
  }
  func.func @transform_3(%arg0: i32, %arg1: i32, %arg2: i32) -> (i32, i32) {
    %c0_i32 = arith.constant 0 : i32
    return %arg0, %arg1 : i32, i32
  }
}

</mosaic_0001>

<bundles_post_ra>
// kernel: image_compression_transformer.7
= control target key start
LH: loop header
LB: loop body
LE: loop exit
PB: predicated region body
PF: predicated region fallthrough
CT: control target
= control target key end

     0   :  { %vm64_vm0 = vcmask 261120   ;;  %vm229_vm1 = vcmask 523264   ;;  %s1270_s1 = inlined_call_operand.vmem [shape: f32[32,64], index: 1, kind: input, shape index: {}]   ;;  %s1271_s0 = inlined_call_operand.vmem [shape: f32[128,32], index: 0, kind: input, shape index: {}]   ;;  %s1272_s3 = inlined_call_operand.vmem [shape: f32[64,32], index: 3, kind: input, shape index: {}]   ;;  %s1273_s2 = inlined_call_operand.vmem [shape: f32[1,64], index: 2, kind: input, shape index: {}]   ;;  %s1274_s4 = inlined_call_operand.vmem [shape: f32[1,32], index: 4, kind: input, shape index: {}]   ;;  %s1275_s5 = inlined_call_operand.vmem [shape: f32[1,32], index: 5, kind: input, shape index: {}]   ;;  %s1276_s6 = inlined_call_operand.vmem [shape: f32[1,32], index: 6, kind: input, shape index: {}]   ;;  %s1277_s7 = inlined_call_operand.vmem [shape: f32[128,32], index: 7, kind: output, shape index: {}]  }
   0x1   :  { %v51_v0 = vld [vmem:[%s1270_s1] sm:$0xff]  ;;  %v52_v1 = vld [vmem:[%s1270_s1 + $0x8] sm:$0xff]  ;;  %v53_v2 = vld [vmem:[%s1270_s1 + $0x10] sm:$0xff] }
   0x2   :  { %v55_v3 = vpack.c.bf16 %v52_v1, %v51_v0  ;;  %v54_v4 = vld [vmem:[%s1270_s1 + $0x18] sm:$0xff]  ;;  %v815_v5 = vld [vmem:[%s1271_s0] sm:$0xff]  ;;  %v820_v6 = vld [vmem:[%s1271_s0 + $0x8] sm:$0xff] }
   0x3   :  { %v56_v7 = vpack.c.bf16 %v54_v4, %v53_v2  ;;  %v43_v8 = vpack.c.bf16 %v820_v6, %v815_v5  ;;  %v828_v9 = vld [vmem:[%s1271_s0 + $0x10] sm:$0xff]  ;;  %v833_v10 = vld [vmem:[%s1271_s0 + $0x18] sm:$0xff]  ;;  %v838_v11 = vld [vmem:[%s1271_s0 + $0x20] sm:$0xff] }
   0x4   :  { %684 = vmatprep.subr.bf16.mxu0 %v55_v3  ;;  %v843_v12 = vld [vmem:[%s1271_s0 + $0x28] sm:$0xff]  ;;  %v210_v13 = vld [vmem:[%s1272_s3] sm:$0xff]  ;;  %v44_v14 = vpack.c.bf16 %v833_v10, %v828_v9  ;;  %v212_v16 = vld [vmem:[%s1272_s3 + $0x10] sm:$0xff] }
   0x5   :  { %685 = vmatpush3.bf16.msra.mxu0 %v55_v3  ;;  %688 = vmatprep.mubr.msk.bf16.mxu0 %vm64_vm0, %v43_v8  ;;  %v211_v15 = vld [vmem:[%s1272_s3 + $0x8] sm:$0xff]  ;;  %v213_v17 = vld [vmem:[%s1272_s3 + $0x18] sm:$0xff]  ;;  %v45_v18 = vpack.c.bf16 %v843_v12, %v838_v11  ;;  %v866_v21 = vld [vmem:[%s1271_s0 + $0x30] sm:$0xff] }
   0x6   :  { %686 = vmatprep.subr.bf16.mxu0 %v56_v7  ;;  %v218_v19 = vpack.c.bf16 %v211_v15, %v210_v13  ;;  %v219_v20 = vpack.c.bf16 %v213_v17, %v212_v16  ;;  %v871_v22 = vld [vmem:[%s1271_s0 + $0x38] sm:$0xff]  ;;  %v876_v23 = vld [vmem:[%s1271_s0 + $0x40] sm:$0xff]  ;;  %v881_v24 = vld [vmem:[%s1271_s0 + $0x48] sm:$0xff] }
   0x7   :  { %v46_v25 = vpack.c.bf16 %v871_v22, %v866_v21  ;;  %v47_v26 = vpack.c.bf16 %v881_v24, %v876_v23  ;;  %v892_v27 = vld [vmem:[%s1271_s0 + $0x50] sm:$0xff]  ;;  %v897_v28 = vld [vmem:[%s1271_s0 + $0x58] sm:$0xff]  ;;  %v902_v29 = vld [vmem:[%s1271_s0 + $0x60] sm:$0xff] }
   0x8   :  { %704 = vmatprep.subr.bf16.mxu1 %v218_v19  ;;  %v907_v30 = vld [vmem:[%s1271_s0 + $0x68] sm:$0xff]  ;;  %v48_v31 = vpack.c.bf16 %v897_v28, %v892_v27  ;;  %v918_v33 = vld [vmem:[%s1271_s0 + $0x70] sm:$0xff]  ;;  %v923_v34 = vld [vmem:[%s1271_s0 + $0x78] sm:$0xff] }
   0x9   :  { %687 = vmatpush3.bf16.msra.mxu0 %v56_v7  ;;  %705 = vmatpush3.bf16.msra.mxu1 %v218_v19  ;;  %v49_v32 = vpack.c.bf16 %v907_v30, %v902_v29  ;;  %v50_v35 = vpack.c.bf16 %v923_v34, %v918_v33  ;;  %v214_v36 = vld [vmem:[%s1272_s3 + $0x20] sm:$0xff]  ;;  %v215_v37 = vld [vmem:[%s1272_s3 + $0x28] sm:$0xff]  ;;  %v216_v39 = vld [vmem:[%s1272_s3 + $0x30] sm:$0xff] }
   0xa   :  { %706 = vmatprep.subr.bf16.mxu1 %v219_v20  ;;  %v220_v38 = vpack.c.bf16 %v215_v37, %v214_v36  ;;  %v217_v40 = vld [vmem:[%s1272_s3 + $0x38] sm:$0xff]  ;;  %v642_v42 = vld [vmem:[%s1273_s2] ss:$0 sm:$0xff] }
   0xb   :  { %v221_v41 = vpack.c.bf16 %v217_v40, %v216_v39 }
   0xc   :  { %689 = vmatmul.mubr.msk.bf16.vlgmr.msra.gmra.mrb[0].mxu0 %vm64_vm0, %v44_v14 }
   0xd   :  { %692 = vmatprep.mubr.msk.bf16.mxu0 %vm64_vm0, %v45_v18  ;;  %707 = vmatpush3.bf16.msra.mxu1 %v219_v20 }
   0xe   :  { %708 = vmatprep.subr.bf16.mxu1 %v220_v38 }
  0x11   :  { %709 = vmatpush3.bf16.msra.mxu1 %v220_v38 }
  0x12   :  { %710 = vmatprep.subr.bf16.mxu1 %v221_v41 }
  0x14   :  { %693 = vmatmul.mubr.msk.bf16.gmra.mrb[4].mxu0 %vm64_vm0, %v46_v25 }
  0x15   :  { %696 = vmatprep.mubr.msk.bf16.mxu0 %vm64_vm0, %v47_v26  ;;  %711 = vmatpush3.bf16.msra.mxu1 %v221_v41 }
  0x1c   :  { %697 = vmatmul.mubr.msk.bf16.gmra.mrb[8].mxu0 %vm64_vm0, %v48_v31 }
  0x1d   :  { %700 = vmatprep.mubr.msk.bf16.mxu0 %vm64_vm0, %v49_v32 }
  0x24   :  { %701 = vmatmul.mubr.msk.bf16.gmra.mrb[12].mxu0 %vm64_vm0, %v50_v35 }
  0xdf   :  { %v690_v43 = vpop.f32.mrb[0].mxu0 }
  0xe0   :  { %v132_v44 = vadd.f32 %v690_v43, %v642_v42  ;;  %v123_v45 = vpop.f32.mrb[1].mxu0 }
  0xe1   :  { %v124_v46 = vadd.f32 %v642_v42, %v123_v45  ;;  %v691_v47 = vpop.f32.mrb[2].mxu0 }
  0xe2   :  { %v135_v48 = vadd.f32 %v691_v47, %v642_v42  ;;  %v126_v49 = vpop.f32.mrb[3].mxu0  ;;  %v188_v51 = vmax.f32 %v132_v44, 0.0 }
  0xe3   :  { %v127_v50 = vadd.f32 %v642_v42, %v126_v49  ;;  %v186_v53 = vmax.f32 %v124_v46, 0.0 }
  0xe4   :  { %v189_v52 = vmax.f32 %v135_v48, 0.0 }
  0xe5   :  { %v187_v54 = vmax.f32 %v127_v50, 0.0 }
  0xe6   :  { %v203_v55 = vpack.c.bf16 %v189_v52, %v188_v51  ;;  %v954_v52 = vld [vmem:[%s1274_s4] ss:$0 sm:$0xff] }
  0xe7   :  { %v694_v56 = vpop.f32.mrb[4].mxu0  ;;  %v202_v57 = vpack.c.bf16 %v187_v54, %v186_v53 }
  0xe8   :  { %v148_v58 = vadd.f32 %v694_v56, %v642_v42  ;;  %v139_v59 = vpop.f32.mrb[5].mxu0 }
  0xe9   :  { %v140_v60 = vadd.f32 %v642_v42, %v139_v59  ;;  %v695_v61 = vpop.f32.mrb[6].mxu0  ;;  %712 = vmatprep.mubr.msk.bf16.mxu1 %vm229_vm1, %v202_v57 }
  0xea   :  { %v192_v62 = vmax.f32 %v148_v58, 0.0  ;;  %v151_v63 = vadd.f32 %v695_v61, %v642_v42  ;;  %v142_v0 = vpop.f32.mrb[7].mxu0  ;;  %713 = vmatmul.mubr.msk.bf16.vlgmr.msra.gmra.mrb[0].mxu1 %vm229_vm1, %v203_v55 }
  0xeb   :  { %v143_v1 = vadd.f32 %v642_v42, %v142_v0  ;;  %v190_v3 = vmax.f32 %v140_v60, 0.0 }
  0xec   :  { %v193_v2 = vmax.f32 %v151_v63, 0.0 }
  0xed   :  { %v191_v4 = vmax.f32 %v143_v1, 0.0 }
  0xee   :  { %v205_v7 = vpack.c.bf16 %v193_v2, %v192_v62 }
  0xef   :  { %v204_v8 = vpack.c.bf16 %v191_v4, %v190_v3  ;;  %v698_v13 = vpop.f32.mrb[8].mxu0 }
  0xf0   :  { %v164_v14 = vadd.f32 %v698_v13, %v642_v42  ;;  %v155_v15 = vpop.f32.mrb[9].mxu0 }
  0xf1   :  { %v156_v16 = vadd.f32 %v642_v42, %v155_v15  ;;  %v699_v17 = vpop.f32.mrb[10].mxu0  ;;  %716 = vmatprep.mubr.msk.bf16.mxu1 %vm229_vm1, %v204_v8 }
  0xf2   :  { %v196_v18 = vmax.f32 %v164_v14, 0.0  ;;  %v167_v19 = vadd.f32 %v699_v17, %v642_v42  ;;  %v158_v20 = vpop.f32.mrb[11].mxu0  ;;  %717 = vmatmul.mubr.msk.bf16.gmra.mrb[4].mxu1 %vm229_vm1, %v205_v7 }
  0xf3   :  { %v159_v25 = vadd.f32 %v642_v42, %v158_v20  ;;  %v194_v31 = vmax.f32 %v156_v16, 0.0 }
  0xf4   :  { %v197_v26 = vmax.f32 %v167_v19, 0.0 }
  0xf5   :  { %v195_v32 = vmax.f32 %v159_v25, 0.0 }
  0xf6   :  { %v207_v35 = vpack.c.bf16 %v197_v26, %v196_v18 }
  0xf7   :  { %v206_v36 = vpack.c.bf16 %v195_v32, %v194_v31  ;;  %v702_v37 = vpop.f32.mrb[12].mxu0 }
  0xf8   :  { %v180_v38 = vadd.f32 %v702_v37, %v642_v42  ;;  %v171_v39 = vpop.f32.mrb[13].mxu0 }
  0xf9   :  { %v172_v40 = vadd.f32 %v642_v42, %v171_v39  ;;  %v703_v41 = vpop.f32.mrb[14].mxu0  ;;  %720 = vmatprep.mubr.msk.bf16.mxu1 %vm229_vm1, %v206_v36 }
  0xfa   :  { %v200_v43 = vmax.f32 %v180_v38, 0.0  ;;  %v183_v44 = vadd.f32 %v703_v41, %v642_v42  ;;  %v174_v45 = vpop.f32.mrb[15].mxu0  ;;  %721 = vmatmul.mubr.msk.bf16.gmra.mrb[8].mxu1 %vm229_vm1, %v207_v35 }
  0xfb   :  { %v175_v46 = vadd.f32 %v642_v42, %v174_v45  ;;  %v198_v48 = vmax.f32 %v172_v40, 0.0 }
  0xfc   :  { %v201_v47 = vmax.f32 %v183_v44, 0.0 }
  0xfd   :  { %v199_v49 = vmax.f32 %v175_v46, 0.0 }
  0xfe   :  { %v209_v50 = vpack.c.bf16 %v201_v47, %v200_v43 }
  0xff   :  { %v208_v51 = vpack.c.bf16 %v199_v49, %v198_v48 }
 0x101   :  { %724 = vmatprep.mubr.msk.bf16.mxu1 %vm229_vm1, %v208_v51 }
 0x102   :  { %725 = vmatmul.mubr.msk.bf16.gmra.mrb[12].mxu1 %vm229_vm1, %v209_v50 }
 0x1bd   :  { %v714_v53 = vpop.f32.mrb[0].mxu1 }
 0x1be   :  { %v297_v54 = vadd.f32 %v714_v53, %v954_v52  ;;  %v288_v55 = vpop.f32.mrb[1].mxu1 }
 0x1bf   :  { %v289_v42 = vadd.f32 %v954_v52, %v288_v55  ;;  %v715_v56 = vpop.f32.mrb[2].mxu1 }
 0x1c0   :  { %v300_v57 = vadd.f32 %v715_v56, %v954_v52  ;;  %v291_v58 = vpop.f32.mrb[3].mxu1  ;;  %v960_v59 = vadd.f32 %v297_v54, %v828_v9 }
 0x1c1   :  { %v292_v60 = vadd.f32 %v954_v52, %v291_v58  ;;  %v964_v61 = vadd.f32 %v289_v42, %v815_v5 }
 0x1c2   :  { %v373_v62 = vsel %vm64_vm0, %v960_v59, 0.0  ;;  %v969_v63 = vadd.f32 %v300_v57, %v833_v10 }
 0x1c3   :  { %374 = vadd.xlane.f32.xlu1 %v373_v62  ;;  %v367_v0 = vsel %vm64_vm0, %v964_v61, 0.0  ;;  %v974_v1 = vadd.f32 %v292_v60, %v820_v6 }
 0x1c4   :  { %368 = vadd.xlane.f32.xlu0 %v367_v0  ;;  %v376_v5 = vsel %vm64_vm0, %v969_v63, 0.0 }
 0x1c5   :  { %v718_v9 = vpop.f32.mrb[4].mxu1  ;;  %v370_v7 = vsel %vm64_vm0, %v974_v1, 0.0 }
 0x1c6   :  { %v313_v2 = vadd.f32 %v718_v9, %v954_v52  ;;  %v304_v3 = vpop.f32.mrb[5].mxu1 }
 0x1c7   :  { %v305_v4 = vadd.f32 %v954_v52, %v304_v3  ;;  %377 = vadd.xlane.f32.xlu1 %v376_v5  ;;  %v719_v10 = vpop.f32.mrb[6].mxu1 }
 0x1c8   :  { %v316_v8 = vadd.f32 %v719_v10, %v954_v52  ;;  %v307_v13 = vpop.f32.mrb[7].mxu1  ;;  %371 = vadd.xlane.f32.xlu0 %v370_v7  ;;  %v984_v6 = vadd.f32 %v313_v2, %v866_v21 }
 0x1c9   :  { %v308_v14 = vadd.f32 %v954_v52, %v307_v13  ;;  %v993_v17 = vadd.f32 %v305_v4, %v838_v11 }
 0x1ca   :  { %v385_v15 = vsel %vm64_vm0, %v984_v6, 0.0  ;;  %v990_v16 = vadd.f32 %v316_v8, %v871_v22 }
 0x1cb   :  { %v998_v19 = vadd.f32 %v308_v14, %v843_v12  ;;  %v379_v22 = vsel %vm64_vm0, %v993_v17, 0.0 }
 0x1cc   :  { %386 = vadd.xlane.f32.xlu0 %v385_v15  ;;  %v388_v18 = vsel %vm64_vm0, %v990_v16, 0.0 }
 0x1cd   :  { %389 = vadd.xlane.f32.xlu1 %v388_v18  ;;  %v722_v21 = vpop.f32.mrb[8].mxu1  ;;  %v382_v35 = vsel %vm64_vm0, %v998_v19, 0.0 }
 0x1ce   :  { %v329_v20 = vadd.f32 %v722_v21, %v954_v52  ;;  %v320_v25 = vpop.f32.mrb[9].mxu1 }
 0x1cf   :  { %v321_v26 = vadd.f32 %v954_v52, %v320_v25  ;;  %v723_v31 = vpop.f32.mrb[10].mxu1 }
 0x1d0   :  { %v332_v11 = vadd.f32 %v723_v31, %v954_v52  ;;  %v323_v32 = vpop.f32.mrb[11].mxu1  ;;  %380 = vadd.xlane.f32.xlu0 %v379_v22  ;;  %v1008_v12 = vadd.f32 %v329_v20, %v892_v27 }
 0x1d1   :  { %v324_v36 = vadd.f32 %v954_v52, %v323_v32  ;;  %383 = vadd.xlane.f32.xlu1 %v382_v35  ;;  %v1017_v39 = vadd.f32 %v321_v26, %v876_v23 }
 0x1d2   :  { %v397_v37 = vsel %vm64_vm0, %v1008_v12, 0.0  ;;  %v1014_v38 = vadd.f32 %v332_v11, %v897_v28 }
 0x1d3   :  { %v1022_v41 = vadd.f32 %v324_v36, %v881_v24  ;;  %v391_v28 = vsel %vm64_vm0, %v1017_v39, 0.0 }
 0x1d4   :  { %398 = vadd.xlane.f32.xlu0 %v397_v37  ;;  %v400_v40 = vsel %vm64_vm0, %v1014_v38, 0.0 }
 0x1d5   :  { %v726_v27 = vpop.f32.mrb[12].mxu1  ;;  %401 = vadd.xlane.f32.xlu1 %v400_v40  ;;  %v394_v47 = vsel %vm64_vm0, %v1022_v41, 0.0 }
 0x1d6   :  { %v336_v43 = vpop.f32.mrb[13].mxu1  ;;  %v345_v44 = vadd.f32 %v726_v27, %v954_v52 }
 0x1d7   :  { %v337_v45 = vadd.f32 %v954_v52, %v336_v43  ;;  %v727_v46 = vpop.f32.mrb[14].mxu1 }
 0x1d8   :  { %v339_v23 = vpop.f32.mrb[15].mxu1  ;;  %392 = vadd.xlane.f32.xlu0 %v391_v28  ;;  %v348_v48 = vadd.f32 %v727_v46, %v954_v52  ;;  %v1041_v53 = vadd.f32 %v345_v44, %v918_v33 }
 0x1d9   :  { %v340_v24 = vadd.f32 %v954_v52, %v339_v23  ;;  %395 = vadd.xlane.f32.xlu1 %v394_v47  ;;  %v1033_v49 = vadd.f32 %v337_v45, %v902_v29 }
 0x1da   :  { %v1046_v55 = vadd.f32 %v348_v48, %v923_v34  ;;  %v409_v29 = vsel %vm64_vm0, %v1041_v53, 0.0 }
 0x1db   :  { %v403_v50 = vsel %vm64_vm0, %v1033_v49, 0.0  ;;  %v1038_v51 = vadd.f32 %v340_v24, %v907_v30 }
 0x1dc   :  { %404 = vadd.xlane.f32.xlu0 %v403_v50  ;;  %v412_v52 = vsel %vm64_vm0, %v1046_v55, 0.0 }
 0x1dd   :  { %v406_v54 = vsel %vm64_vm0, %v1038_v51, 0.0 }
 0x1de   :  { %407 = vadd.xlane.f32.xlu1 %v406_v54 }
 0x1e0   :  { %410 = vadd.xlane.f32.xlu0 %v409_v29 }
 0x1e2   :  { %413 = vadd.xlane.f32.xlu1 %v412_v52 }
 0x250   :  { %v375_v30 = vpop.xlane.xlu1 %374 }
 0x251   :  { %v418_v42 = vmul.f32 0.03125, %v375_v30  ;;  %v369_v33 = vpop.xlane.xlu0 %368 }
 0x252   :  { %v416_v56 = vmul.f32 0.03125, %v369_v33 }
 0x253   :  { %v1053_v57 = vsub.f32 %v960_v59, %v418_v42 }
 0x254   :  { %v1056_v58 = vsub.f32 %v964_v61, %v416_v56  ;;  %v378_v34 = vpop.xlane.xlu1 %377 }
 0x255   :  { %v419_v60 = vmul.f32 0.03125, %v378_v34  ;;  %v372_v62 = vpop.xlane.xlu0 %371  ;;  %v450_v0 = vmul.f32 %v1053_v57, %v1053_v57 }
 0x256   :  { %v417_v9 = vmul.f32 0.03125, %v372_v62  ;;  %v448_v5 = vmul.f32 %v1056_v58, %v1056_v58 }
 0x257   :  { %v1061_v2 = vsub.f32 %v969_v63, %v419_v60  ;;  %v470_v3 = vsel %vm64_vm0, %v450_v0, 0.0 }
 0x258   :  { %v1067_v59 = vsub.f32 %v974_v1, %v417_v9  ;;  %471 = vadd.xlane.f32.xlu0 %v470_v3  ;;  %v464_v63 = vsel %vm64_vm0, %v448_v5, 0.0 }
 0x259   :  { %v387_v61 = vpop.xlane.xlu0 %386  ;;  %v451_v4 = vmul.f32 %v1061_v2, %v1061_v2 }
 0x25a   :  { %v422_v10 = vmul.f32 0.03125, %v387_v61  ;;  %v390_v7 = vpop.xlane.xlu1 %389  ;;  %v449_v14 = vmul.f32 %v1067_v59, %v1067_v59 }
 0x25b   :  { %v423_v8 = vmul.f32 0.03125, %v390_v7  ;;  %v473_v13 = vsel %vm64_vm0, %v451_v4, 0.0 }
 0x25c   :  { %v1076_v15 = vsub.f32 %v984_v6, %v422_v10  ;;  %474 = vadd.xlane.f32.xlu1 %v473_v13  ;;  %465 = vadd.xlane.f32.xlu0 %v464_v63  ;;  %v467_v31 = vsel %vm64_vm0, %v449_v14, 0.0 }
 0x25d   :  { %v1079_v1 = vsub.f32 %v990_v16, %v423_v8  ;;  %v381_v18 = vpop.xlane.xlu0 %380 }
 0x25e   :  { %v420_v21 = vmul.f32 0.03125, %v381_v18  ;;  %v384_v20 = vpop.xlane.xlu1 %383  ;;  %v454_v25 = vmul.f32 %v1076_v15, %v1076_v15 }
 0x25f   :  { %v421_v26 = vmul.f32 0.03125, %v384_v20  ;;  %v455_v22 = vmul.f32 %v1079_v1, %v1079_v1 }
 0x260   :  { %v1087_v6 = vsub.f32 %v993_v17, %v420_v21  ;;  %468 = vadd.xlane.f32.xlu1 %v467_v31  ;;  %v482_v11 = vsel %vm64_vm0, %v454_v25, 0.0 }
 0x261   :  { %v1091_v16 = vsub.f32 %v998_v19, %v421_v26  ;;  %483 = vadd.xlane.f32.xlu0 %v482_v11  ;;  %v399_v32 = vpop.xlane.xlu0 %398  ;;  %v485_v27 = vsel %vm64_vm0, %v455_v22, 0.0 }
 0x262   :  { %v426_v35 = vmul.f32 0.03125, %v399_v32  ;;  %v402_v36 = vpop.xlane.xlu1 %401  ;;  %v452_v37 = vmul.f32 %v1087_v6, %v1087_v6 }
 0x263   :  { %v427_v40 = vmul.f32 0.03125, %v402_v36  ;;  %v453_v17 = vmul.f32 %v1091_v16, %v1091_v16 }
 0x264   :  { %v1099_v43 = vsub.f32 %v1008_v12, %v426_v35  ;;  %486 = vadd.xlane.f32.xlu1 %v485_v27  ;;  %v476_v19 = vsel %vm64_vm0, %v452_v37, 0.0 }
 0x265   :  { %v1103_v44 = vsub.f32 %v1014_v38, %v427_v40  ;;  %477 = vadd.xlane.f32.xlu0 %v476_v19  ;;  %v393_v45 = vpop.xlane.xlu0 %392  ;;  %v479_v48 = vsel %vm64_vm0, %v453_v17, 0.0 }
 0x266   :  { %v424_v46 = vmul.f32 0.03125, %v393_v45  ;;  %v396_v28 = vpop.xlane.xlu1 %395  ;;  %v458_v23 = vmul.f32 %v1099_v43, %v1099_v43 }
 0x267   :  { %v425_v47 = vmul.f32 0.03125, %v396_v28  ;;  %v459_v12 = vmul.f32 %v1103_v44, %v1103_v44 }
 0x268   :  { %v1111_v24 = vsub.f32 %v1017_v39, %v424_v46  ;;  %480 = vadd.xlane.f32.xlu1 %v479_v48  ;;  %v494_v38 = vsel %vm64_vm0, %v458_v23, 0.0  ;;  %v1151_v46 = vld [vmem:[%s1275_s5] ss:$0 sm:$0xff] }
 0x269   :  { %v1115_v50 = vsub.f32 %v1022_v41, %v425_v47  ;;  %495 = vadd.xlane.f32.xlu0 %v494_v38  ;;  %v405_v54 = vpop.xlane.xlu0 %404  ;;  %v497_v42 = vsel %vm64_vm0, %v459_v12, 0.0  ;;  %v1157_v12 = vld [vmem:[%s1276_s6] ss:$0 sm:$0xff] }
 0x26a   :  { %v428_v29 = vmul.f32 0.03125, %v405_v54  ;;  %v456_v52 = vmul.f32 %v1111_v24, %v1111_v24 }
 0x26b   :  { %v408_v30 = vpop.xlane.xlu1 %407  ;;  %v457_v33 = vmul.f32 %v1115_v50, %v1115_v50 }
 0x26c   :  { %v1123_v39 = vsub.f32 %v1033_v49, %v428_v29  ;;  %v429_v56 = vmul.f32 0.03125, %v408_v30  ;;  %498 = vadd.xlane.f32.xlu1 %v497_v42  ;;  %v488_v41 = vsel %vm64_vm0, %v456_v52, 0.0 }
 0x26d   :  { %489 = vadd.xlane.f32.xlu0 %v488_v41  ;;  %v411_v34 = vpop.xlane.xlu0 %410  ;;  %v491_v3 = vsel %vm64_vm0, %v457_v33, 0.0 }
 0x26e   :  { %v1127_v60 = vsub.f32 %v1038_v51, %v429_v56  ;;  %v430_v62 = vmul.f32 0.03125, %v411_v34  ;;  %v460_v0 = vmul.f32 %v1123_v39, %v1123_v39 }
 0x26f   :  { %v414_v9 = vpop.xlane.xlu1 %413 }
 0x270   :  { %v1133_v5 = vsub.f32 %v1041_v53, %v430_v62  ;;  %v431_v49 = vmul.f32 0.03125, %v414_v9  ;;  %492 = vadd.xlane.f32.xlu1 %v491_v3  ;;  %v500_v61 = vsel %vm64_vm0, %v460_v0, 0.0  ;;  %v461_v4 = vmul.f32 %v1127_v60, %v1127_v60 }
 0x271   :  { %501 = vadd.xlane.f32.xlu0 %v500_v61 }
 0x272   :  { %v1139_v51 = vsub.f32 %v1046_v55, %v431_v49  ;;  %v503_v10 = vsel %vm64_vm0, %v461_v4, 0.0  ;;  %v462_v7 = vmul.f32 %v1133_v5, %v1133_v5 }
 0x274   :  { %504 = vadd.xlane.f32.xlu1 %v503_v10  ;;  %v506_v53 = vsel %vm64_vm0, %v462_v7, 0.0  ;;  %v463_v8 = vmul.f32 %v1139_v51, %v1139_v51 }
 0x275   :  { %507 = vadd.xlane.f32.xlu0 %v506_v53 }
 0x276   :  { %v509_v13 = vsel %vm64_vm0, %v463_v8, 0.0 }
 0x278   :  { %510 = vadd.xlane.f32.xlu1 %v509_v13 }
 0x2e5   :  { %v472_v63 = vpop.xlane.xlu0 %471 }
 0x2e6   :  { %v514_v14 = vmul.f32 0.03125, %v472_v63 }
 0x2e8   :  { %v530_v18 = vadd.f32 1e-05, %v514_v14 }
 0x2e9   :  { %v475_v55 = vpop.xlane.xlu1 %474  ;;  %v466_v21 = vpop.xlane.xlu0 %465 }
 0x2ea   :  { %728 = vrsqrt.f32 %v530_v18  ;;  %v515_v20 = vmul.f32 0.03125, %v475_v55  ;;  %v512_v25 = vmul.f32 0.03125, %v466_v21 }
 0x2ec   :  { %v531_v26 = vadd.f32 1e-05, %v515_v20  ;;  %v528_v31 = vadd.f32 1e-05, %v512_v25 }
 0x2ed   :  { %v469_v22 = vpop.xlane.xlu1 %468 }
 0x2ee   :  { %730 = vrsqrt.f32 %v531_v26  ;;  %v513_v11 = vmul.f32 0.03125, %v469_v22  ;;  %v484_v32 = vpop.xlane.xlu0 %483 }
 0x2ef   :  { %732 = vrsqrt.f32 %v528_v31  ;;  %v518_v35 = vmul.f32 0.03125, %v484_v32 }
 0x2f0   :  { %v529_v36 = vadd.f32 1e-05, %v513_v11 }
 0x2f1   :  { %v534_v37 = vadd.f32 1e-05, %v518_v35  ;;  %v487_v40 = vpop.xlane.xlu1 %486 }
 0x2f2   :  { %734 = vrsqrt.f32 %v529_v36  ;;  %v519_v27 = vmul.f32 0.03125, %v487_v40  ;;  %v478_v17 = vpop.xlane.xlu0 %477 }
 0x2f3   :  { %736 = vrsqrt.f32 %v534_v37  ;;  %v516_v19 = vmul.f32 0.03125, %v478_v17 }
 0x2f4   :  { %v729_v45 = vpop.eup %728  ;;  %v535_v28 = vadd.f32 1e-05, %v519_v27 }
 0x2f5   :  { %v562_v23 = vmul.f32 %v729_v45, %v1053_v57  ;;  %v532_v47 = vadd.f32 1e-05, %v516_v19  ;;  %v481_v48 = vpop.xlane.xlu1 %480 }
 0x2f6   :  { %738 = vrsqrt.f32 %v535_v28  ;;  %v517_v38 = vmul.f32 0.03125, %v481_v48  ;;  %v496_v54 = vpop.xlane.xlu0 %495 }
 0x2f7   :  { %v585_v29 = vmul.f32 %v1151_v46, %v562_v23  ;;  %740 = vrsqrt.f32 %v532_v47  ;;  %v522_v52 = vmul.f32 0.03125, %v496_v54 }
 0x2f8   :  { %v731_v30 = vpop.eup %730  ;;  %v533_v42 = vadd.f32 1e-05, %v517_v38 }
 0x2f9   :  { %v733_v33 = vpop.eup %732  ;;  %v608_v56 = vadd.f32 %v1157_v12, %v585_v29  ;;  %v563_v57 = vmul.f32 %v731_v30, %v1061_v2  ;;  %v538_v41 = vadd.f32 1e-05, %v522_v52  ;;  %v499_v34 = vpop.xlane.xlu1 %498 }
 0x2fa   :  { %v560_v62 = vmul.f32 %v733_v33, %v1056_v58  ;;  %742 = vrsqrt.f32 %v533_v42  ;;  %v523_v0 = vmul.f32 0.03125, %v499_v34  ;;  %v490_v9 = vpop.xlane.xlu0 %489 }
 0x2fb   :  { %624 = vst.msk [vmem:[%s1277_s7 + $0x10] sm:$0xff] %vm64_vm0, %v608_v56  ;;  %v586_v3 = vmul.f32 %v1151_v46, %v563_v57  ;;  %744 = vrsqrt.f32 %v538_v41  ;;  %v520_v49 = vmul.f32 0.03125, %v490_v9 }
 0x2fc   :  { %v735_v61 = vpop.eup %734  ;;  %v583_v4 = vmul.f32 %v1151_v46, %v560_v62  ;;  %v539_v2 = vadd.f32 1e-05, %v523_v0 }
 0x2fd   :  { %v737_v10 = vpop.eup %736  ;;  %v609_v7 = vadd.f32 %v1157_v12, %v586_v3  ;;  %v561_v58 = vmul.f32 %v735_v61, %v1067_v59  ;;  %v536_v53 = vadd.f32 1e-05, %v520_v49  ;;  %v493_v8 = vpop.xlane.xlu1 %492 }
 0x2fe   :  { %v606_v13 = vadd.f32 %v1157_v12, %v583_v4  ;;  %v566_v63 = vmul.f32 %v737_v10, %v1076_v15  ;;  %746 = vrsqrt.f32 %v539_v2  ;;  %v521_v14 = vmul.f32 0.03125, %v493_v8  ;;  %v502_v18 = vpop.xlane.xlu0 %501 }
 0x2ff   :  { %625 = vst.msk [vmem:[%s1277_s7 + $0x18] sm:$0xff] %vm64_vm0, %v609_v7  ;;  %v584_v55 = vmul.f32 %v1151_v46, %v561_v58  ;;  %748 = vrsqrt.f32 %v536_v53  ;;  %v524_v21 = vmul.f32 0.03125, %v502_v18 }
 0x300   :  { %v739_v20 = vpop.eup %738  ;;  %622 = vst.msk [vmem:[%s1277_s7] sm:$0xff] %vm64_vm0, %v606_v13  ;;  %v589_v59 = vmul.f32 %v1151_v46, %v566_v63  ;;  %v537_v15 = vadd.f32 1e-05, %v521_v14 }
 0x301   :  { %v741_v25 = vpop.eup %740  ;;  %v607_v26 = vadd.f32 %v1157_v12, %v584_v55  ;;  %v567_v31 = vmul.f32 %v739_v20, %v1079_v1  ;;  %v540_v22 = vadd.f32 1e-05, %v524_v21  ;;  %v505_v11 = vpop.xlane.xlu1 %504 }
 0x302   :  { %v612_v32 = vadd.f32 %v1157_v12, %v589_v59  ;;  %v564_v35 = vmul.f32 %v741_v25, %v1087_v6  ;;  %750 = vrsqrt.f32 %v537_v15  ;;  %v525_v36 = vmul.f32 0.03125, %v505_v11  ;;  %v508_v37 = vpop.xlane.xlu0 %507 }
 0x303   :  { %623 = vst.msk [vmem:[%s1277_s7 + $0x8] sm:$0xff] %vm64_vm0, %v607_v26  ;;  %v590_v40 = vmul.f32 %v1151_v46, %v567_v31  ;;  %752 = vrsqrt.f32 %v540_v22  ;;  %v526_v27 = vmul.f32 0.03125, %v508_v37 }
 0x304   :  { %v743_v17 = vpop.eup %742  ;;  %628 = vst.msk [vmem:[%s1277_s7 + $0x30] sm:$0xff] %vm64_vm0, %v612_v32  ;;  %v587_v1 = vmul.f32 %v1151_v46, %v564_v35  ;;  %v541_v6 = vadd.f32 1e-05, %v525_v36 }
 0x305   :  { %v745_v19 = vpop.eup %744  ;;  %v613_v45 = vadd.f32 %v1157_v12, %v590_v40  ;;  %v565_v28 = vmul.f32 %v743_v17, %v1091_v16  ;;  %v542_v23 = vadd.f32 1e-05, %v526_v27  ;;  %v511_v47 = vpop.xlane.xlu1 %510 }
 0x306   :  { %v610_v48 = vadd.f32 %v1157_v12, %v587_v1  ;;  %v570_v38 = vmul.f32 %v745_v19, %v1099_v43  ;;  %754 = vrsqrt.f32 %v541_v6  ;;  %v527_v54 = vmul.f32 0.03125, %v511_v47 }
 0x307   :  { %629 = vst.msk [vmem:[%s1277_s7 + $0x38] sm:$0xff] %vm64_vm0, %v613_v45  ;;  %v588_v29 = vmul.f32 %v1151_v46, %v565_v28  ;;  %756 = vrsqrt.f32 %v542_v23 }
 0x308   :  { %v747_v52 = vpop.eup %746  ;;  %626 = vst.msk [vmem:[%s1277_s7 + $0x20] sm:$0xff] %vm64_vm0, %v610_v48  ;;  %v593_v16 = vmul.f32 %v1151_v46, %v570_v38  ;;  %v543_v30 = vadd.f32 1e-05, %v527_v54 }
 0x309   :  { %v749_v43 = vpop.eup %748  ;;  %v611_v42 = vadd.f32 %v1157_v12, %v588_v29  ;;  %v571_v33 = vmul.f32 %v747_v52, %v1103_v44 }
 0x30a   :  { %v616_v56 = vadd.f32 %v1157_v12, %v593_v16  ;;  %v568_v57 = vmul.f32 %v749_v43, %v1111_v24  ;;  %758 = vrsqrt.f32 %v543_v30 }
 0x30b   :  { %627 = vst.msk [vmem:[%s1277_s7 + $0x28] sm:$0xff] %vm64_vm0, %v611_v42  ;;  %v594_v41 = vmul.f32 %v1151_v46, %v571_v33 }
 0x30c   :  { %v751_v34 = vpop.eup %750  ;;  %632 = vst.msk [vmem:[%s1277_s7 + $0x50] sm:$0xff] %vm64_vm0, %v616_v56  ;;  %v591_v44 = vmul.f32 %v1151_v46, %v568_v57 }
 0x30d   :  { %v753_v62 = vpop.eup %752  ;;  %v617_v0 = vadd.f32 %v1157_v12, %v594_v41  ;;  %v569_v24 = vmul.f32 %v751_v34, %v1115_v50 }
 0x30e   :  { %v614_v9 = vadd.f32 %v1157_v12, %v591_v44  ;;  %v572_v3 = vmul.f32 %v753_v62, %v1123_v39 }
 0x30f   :  { %633 = vst.msk [vmem:[%s1277_s7 + $0x58] sm:$0xff] %vm64_vm0, %v617_v0  ;;  %v592_v49 = vmul.f32 %v1151_v46, %v569_v24 }
 0x310   :  { %v755_v61 = vpop.eup %754  ;;  %630 = vst.msk [vmem:[%s1277_s7 + $0x40] sm:$0xff] %vm64_vm0, %v614_v9  ;;  %v595_v4 = vmul.f32 %v1151_v46, %v572_v3 }
 0x311   :  { %v757_v50 = vpop.eup %756  ;;  %v615_v2 = vadd.f32 %v1157_v12, %v592_v49  ;;  %v573_v39 = vmul.f32 %v755_v61, %v1127_v60 }
 0x312   :  { %v618_v10 = vadd.f32 %v1157_v12, %v595_v4  ;;  %v574_v7 = vmul.f32 %v757_v50, %v1133_v5 }
 0x313   :  { %631 = vst.msk [vmem:[%s1277_s7 + $0x48] sm:$0xff] %vm64_vm0, %v615_v2  ;;  %v596_v58 = vmul.f32 %v1151_v46, %v573_v39 }
 0x314   :  { %v759_v53 = vpop.eup %758  ;;  %634 = vst.msk [vmem:[%s1277_s7 + $0x60] sm:$0xff] %vm64_vm0, %v618_v10  ;;  %v597_v8 = vmul.f32 %v1151_v46, %v574_v7 }
 0x315   :  { %v619_v60 = vadd.f32 %v1157_v12, %v596_v58  ;;  %v575_v13 = vmul.f32 %v759_v53, %v1139_v51 }
 0x316   :  { %v620_v5 = vadd.f32 %v1157_v12, %v597_v8 }
 0x317   :  { %635 = vst.msk [vmem:[%s1277_s7 + $0x68] sm:$0xff] %vm64_vm0, %v619_v60  ;;  %v598_v63 = vmul.f32 %v1151_v46, %v575_v13 }
 0x318   :  { %636 = vst.msk [vmem:[%s1277_s7 + $0x70] sm:$0xff] %vm64_vm0, %v620_v5 }
 0x319   :  { %v621_v14 = vadd.f32 %v1157_v12, %v598_v63 }
 0x31b   :  { %637 = vst.msk [vmem:[%s1277_s7 + $0x78] sm:$0xff] %vm64_vm0, %v621_v14 }

// kernel: image_compression_transformer.11
= control target key start
LH: loop header
LB: loop body
LE: loop exit
PB: predicated region body
PF: predicated region fallthrough
CT: control target
= control target key end

     0   :  { %vm19_vm0 = vcmask 261120   ;;  %v342_v3 = vmov 0.0   ;;  %s548_s1 = inlined_call_operand.vmem [shape: f32[32,32], index: 1, kind: input, shape index: {}]   ;;  %s549_s0 = inlined_call_operand.vmem [shape: f32[128,32], index: 0, kind: input, shape index: {}]   ;;  %s550_s2 = inlined_call_operand.vmem [shape: f32[1,32], index: 2, kind: input, shape index: {}]   ;;  %s551_s3 = inlined_call_operand.vmem [shape: f32[128,32], index: 3, kind: output, shape index: {}]  }
   0x1   :  { %v76_v0 = vld [vmem:[%s548_s1] sm:$0xff]  ;;  %v77_v1 = vld [vmem:[%s548_s1 + $0x8] sm:$0xff]  ;;  %v78_v2 = vld [vmem:[%s548_s1 + $0x10] sm:$0xff]  ;;  %22 = vst.msk [vmem:[#allocation2 + $0x10] sm:$0xff] %vm19_vm0, %v342_v3 }
   0x2   :  { %20 = vst.msk [vmem:[#allocation2] sm:$0xff] %vm19_vm0, %v342_v3  ;;  %21 = vst.msk [vmem:[#allocation2 + $0x8] sm:$0xff] %vm19_vm0, %v342_v3  ;;  %v80_v4 = vpack.c.bf16 %v77_v1, %v76_v0  ;;  %v79_v5 = vld [vmem:[%s548_s1 + $0x18] sm:$0xff]  ;;  %v52_v6 = vld [vmem:[%s549_s0] sm:$0xff] }
   0x3   :  { %23 = vst.msk [vmem:[#allocation2 + $0x18] sm:$0xff] %vm19_vm0, %v342_v3  ;;  %24 = vst.msk [vmem:[#allocation2 + $0x20] sm:$0xff] %vm19_vm0, %v342_v3  ;;  %v53_v7 = vld [vmem:[%s549_s0 + $0x8] sm:$0xff]  ;;  %v81_v8 = vpack.c.bf16 %v79_v5, %v78_v2  ;;  %v60_v10 = vld [vmem:[%s549_s0 + $0x40] sm:$0xff] }
   0x4   :  { %25 = vst.msk [vmem:[#allocation2 + $0x28] sm:$0xff] %vm19_vm0, %v342_v3  ;;  %26 = vst.msk [vmem:[#allocation2 + $0x30] sm:$0xff] %vm19_vm0, %v342_v3  ;;  %v68_v9 = vpack.c.bf16 %v53_v7, %v52_v6  ;;  %v61_v11 = vld [vmem:[%s549_s0 + $0x48] sm:$0xff]  ;;  %317 = vmatprep.subr.bf16.mxu0 %v80_v4  ;;  %337 = vmatprep.subr.bf16.mxu1 %v80_v4  ;;  %v54_v13 = vld [vmem:[%s549_s0 + $0x10] sm:$0xff] }
   0x5   :  { %27 = vst.msk [vmem:[#allocation2 + $0x38] sm:$0xff] %vm19_vm0, %v342_v3  ;;  %28 = vst.msk [vmem:[#allocation2 + $0x40] sm:$0xff] %vm19_vm0, %v342_v3  ;;  %v72_v12 = vpack.c.bf16 %v61_v11, %v60_v10  ;;  %v55_v14 = vld [vmem:[%s549_s0 + $0x18] sm:$0xff]  ;;  %318 = vmatpush3.bf16.msra.mxu0 %v80_v4  ;;  %339 = vmatpush3.bf16.msra.mxu1 %v80_v4  ;;  %v62_v15 = vld [vmem:[%s549_s0 + $0x50] sm:$0xff] }
   0x6   :  { %29 = vst.msk [vmem:[#allocation2 + $0x48] sm:$0xff] %vm19_vm0, %v342_v3  ;;  %30 = vst.msk [vmem:[#allocation2 + $0x50] sm:$0xff] %vm19_vm0, %v342_v3  ;;  %v63_v16 = vld [vmem:[%s549_s0 + $0x58] sm:$0xff]  ;;  %v56_v17 = vld [vmem:[%s549_s0 + $0x20] sm:$0xff]  ;;  %319 = vmatprep.subr.bf16.mxu0 %v81_v8  ;;  %338 = vmatprep.subr.bf16.mxu1 %v81_v8  ;;  %v69_v21 = vpack.c.bf16 %v55_v14, %v54_v13 }
   0x7   :  { %31 = vst.msk [vmem:[#allocation2 + $0x58] sm:$0xff] %vm19_vm0, %v342_v3  ;;  %32 = vst.msk [vmem:[#allocation2 + $0x60] sm:$0xff] %vm19_vm0, %v342_v3  ;;  %v57_v18 = vld [vmem:[%s549_s0 + $0x28] sm:$0xff]  ;;  %v64_v19 = vld [vmem:[%s549_s0 + $0x60] sm:$0xff]  ;;  %321 = vmatprep.mubr.msk.bf16.mxu0 %vm19_vm0, %v68_v9  ;;  %329 = vmatprep.mubr.msk.bf16.mxu1 %vm19_vm0, %v72_v12  ;;  %v73_v22 = vpack.c.bf16 %v63_v16, %v62_v15 }
   0x8   :  { %33 = vst.msk [vmem:[#allocation2 + $0x68] sm:$0xff] %vm19_vm0, %v342_v3  ;;  %34 = vst.msk [vmem:[#allocation2 + $0x70] sm:$0xff] %vm19_vm0, %v342_v3  ;;  %v65_v20 = vld [vmem:[%s549_s0 + $0x68] sm:$0xff]  ;;  %v70_v23 = vpack.c.bf16 %v57_v18, %v56_v17  ;;  %v58_v25 = vld [vmem:[%s549_s0 + $0x30] sm:$0xff] }
   0x9   :  { %35 = vst.msk [vmem:[#allocation2 + $0x78] sm:$0xff] %vm19_vm0, %v342_v3  ;;  %320 = vmatpush3.bf16.msra.mxu0 %v81_v8  ;;  %340 = vmatpush3.bf16.msra.mxu1 %v81_v8  ;;  %v74_v24 = vpack.c.bf16 %v65_v20, %v64_v19  ;;  %v59_v26 = vld [vmem:[%s549_s0 + $0x38] sm:$0xff]  ;;  %v66_v27 = vld [vmem:[%s549_s0 + $0x70] sm:$0xff]  ;;  %v36_v33 = vld [vmem:[#allocation2] sm:$0xff] }
   0xa   :  { %v67_v28 = vld [vmem:[%s549_s0 + $0x78] sm:$0xff]  ;;  %v71_v29 = vpack.c.bf16 %v59_v26, %v58_v25  ;;  %v38_v31 = vld [vmem:[#allocation2 + $0x10] sm:$0xff]  ;;  %v37_v43 = vld [vmem:[#allocation2 + $0x8] sm:$0xff] }
   0xb   :  { %v75_v30 = vpack.c.bf16 %v67_v28, %v66_v27  ;;  %v39_v37 = vld [vmem:[#allocation2 + $0x18] sm:$0xff]  ;;  %v42_v55 = vld [vmem:[#allocation2 + $0x30] sm:$0xff]  ;;  %v40_v57 = vld [vmem:[#allocation2 + $0x20] sm:$0xff] }
   0xc   :  { %322 = vmatmul.mubr.msk.bf16.vlgmr.msra.gmra.mrb[0].mxu0 %vm19_vm0, %v69_v21  ;;  %330 = vmatmul.mubr.msk.bf16.vlgmr.msra.gmra.mrb[0].mxu1 %vm19_vm0, %v73_v22  ;;  %v44_v34 = vld [vmem:[#allocation2 + $0x40] sm:$0xff]  ;;  %v43_v62 = vld [vmem:[#allocation2 + $0x38] sm:$0xff]  ;;  %v41_v4 = vld [vmem:[#allocation2 + $0x28] sm:$0xff] }
   0xd   :  { %325 = vmatprep.mubr.msk.bf16.mxu0 %vm19_vm0, %v70_v23  ;;  %333 = vmatprep.mubr.msk.bf16.mxu1 %vm19_vm0, %v74_v24  ;;  %v46_v32 = vld [vmem:[#allocation2 + $0x50] sm:$0xff]  ;;  %v45_v44 = vld [vmem:[#allocation2 + $0x48] sm:$0xff]  ;;  %v458_v59 = vld [vmem:[%s550_s2] ss:$0 sm:$0xff] }
   0xe   :  { %v47_v38 = vld [vmem:[#allocation2 + $0x58] sm:$0xff]  ;;  %v48_v58 = vld [vmem:[#allocation2 + $0x60] sm:$0xff] }
   0xf   :  { %v50_v56 = vld [vmem:[#allocation2 + $0x70] sm:$0xff]  ;;  %v49_v5 = vld [vmem:[#allocation2 + $0x68] sm:$0xff] }
  0x10   :  { %v51_v63 = vld [vmem:[#allocation2 + $0x78] sm:$0xff] }
  0x14   :  { %326 = vmatmul.mubr.msk.bf16.gmra.mrb[4].mxu0 %vm19_vm0, %v71_v29  ;;  %334 = vmatmul.mubr.msk.bf16.gmra.mrb[4].mxu1 %vm19_vm0, %v75_v30 }
  0xdf   :  { %v323_v35 = vpop.f32.mrb[0].mxu0  ;;  %v331_v36 = vpop.f32.mrb[0].mxu1 }
  0xe0   :  { %v206_v39 = vadd.f32 %v323_v35, %v38_v31  ;;  %v214_v40 = vadd.f32 %v331_v36, %v46_v32  ;;  %v141_v41 = vpop.f32.mrb[1].mxu0  ;;  %v173_v42 = vpop.f32.mrb[1].mxu1 }
  0xe1   :  { %v204_v45 = vadd.f32 %v141_v41, %v36_v33  ;;  %v212_v46 = vadd.f32 %v173_v42, %v44_v34  ;;  %v324_v47 = vpop.f32.mrb[2].mxu0  ;;  %v332_v48 = vpop.f32.mrb[2].mxu1 }
  0xe2   :  { %222 = vst.msk [vmem:[#allocation2 + $0x10] sm:$0xff] %vm19_vm0, %v206_v39  ;;  %230 = vst.msk [vmem:[#allocation2 + $0x50] sm:$0xff] %vm19_vm0, %v214_v40  ;;  %v207_v49 = vadd.f32 %v324_v47, %v39_v37  ;;  %v215_v50 = vadd.f32 %v332_v48, %v47_v38  ;;  %v144_v51 = vpop.f32.mrb[3].mxu0  ;;  %v176_v52 = vpop.f32.mrb[3].mxu1 }
  0xe3   :  { %220 = vst.msk [vmem:[#allocation2] sm:$0xff] %vm19_vm0, %v204_v45  ;;  %228 = vst.msk [vmem:[#allocation2 + $0x40] sm:$0xff] %vm19_vm0, %v212_v46  ;;  %v205_v53 = vadd.f32 %v144_v51, %v37_v43  ;;  %v213_v54 = vadd.f32 %v176_v52, %v45_v44 }
  0xe4   :  { %223 = vst.msk [vmem:[#allocation2 + $0x18] sm:$0xff] %vm19_vm0, %v207_v49  ;;  %231 = vst.msk [vmem:[#allocation2 + $0x58] sm:$0xff] %vm19_vm0, %v215_v50 }
  0xe5   :  { %221 = vst.msk [vmem:[#allocation2 + $0x8] sm:$0xff] %vm19_vm0, %v205_v53  ;;  %229 = vst.msk [vmem:[#allocation2 + $0x48] sm:$0xff] %vm19_vm0, %v213_v54 }
  0xe7   :  { %v327_v60 = vpop.f32.mrb[4].mxu0  ;;  %v335_v61 = vpop.f32.mrb[4].mxu1 }
  0xe8   :  { %v210_v0 = vadd.f32 %v327_v60, %v42_v55  ;;  %v218_v1 = vadd.f32 %v335_v61, %v50_v56  ;;  %v157_v2 = vpop.f32.mrb[5].mxu0  ;;  %v189_v3 = vpop.f32.mrb[5].mxu1 }
  0xe9   :  { %v241_v6 = vld [vmem:[#allocation2 + $0x10] sm:$0xff]  ;;  %v208_v8 = vadd.f32 %v157_v2, %v40_v57  ;;  %v216_v9 = vadd.f32 %v189_v3, %v48_v58  ;;  %v328_v10 = vpop.f32.mrb[6].mxu0  ;;  %v336_v11 = vpop.f32.mrb[6].mxu1 }
  0xea   :  { %v249_v7 = vld [vmem:[#allocation2 + $0x50] sm:$0xff]  ;;  %v264_v12 = vadd.f32 %v458_v59, %v241_v6  ;;  %v239_v14 = vld [vmem:[#allocation2] sm:$0xff]  ;;  %226 = vst.msk [vmem:[#allocation2 + $0x30] sm:$0xff] %vm19_vm0, %v210_v0  ;;  %234 = vst.msk [vmem:[#allocation2 + $0x70] sm:$0xff] %vm19_vm0, %v218_v1  ;;  %v211_v16 = vadd.f32 %v328_v10, %v43_v62  ;;  %v219_v17 = vadd.f32 %v336_v11, %v51_v63  ;;  %v160_v18 = vpop.f32.mrb[7].mxu0  ;;  %v192_v19 = vpop.f32.mrb[7].mxu1 }
  0xeb   :  { %v272_v13 = vadd.f32 %v458_v59, %v249_v7  ;;  %v247_v15 = vld [vmem:[#allocation2 + $0x40] sm:$0xff]  ;;  %v262_v20 = vadd.f32 %v458_v59, %v239_v14  ;;  %v242_v22 = vld [vmem:[#allocation2 + $0x18] sm:$0xff]  ;;  %224 = vst.msk [vmem:[#allocation2 + $0x20] sm:$0xff] %vm19_vm0, %v208_v8  ;;  %232 = vst.msk [vmem:[#allocation2 + $0x60] sm:$0xff] %vm19_vm0, %v216_v9  ;;  %v209_v24 = vadd.f32 %v160_v18, %v41_v4 }
  0xec   :  { %v270_v21 = vadd.f32 %v458_v59, %v247_v15  ;;  %v250_v23 = vld [vmem:[#allocation2 + $0x58] sm:$0xff]  ;;  %v217_v25 = vadd.f32 %v192_v19, %v49_v5  ;;  %280 = vst.msk [vmem:[%s551_s3 + $0x10] sm:$0xff] %vm19_vm0, %v264_v12  ;;  %v265_v26 = vadd.f32 %v458_v59, %v242_v22  ;;  %v240_v28 = vld [vmem:[#allocation2 + $0x8] sm:$0xff]  ;;  %227 = vst.msk [vmem:[#allocation2 + $0x38] sm:$0xff] %vm19_vm0, %v211_v16 }
  0xed   :  { %288 = vst.msk [vmem:[%s551_s3 + $0x50] sm:$0xff] %vm19_vm0, %v272_v13  ;;  %v273_v27 = vadd.f32 %v458_v59, %v250_v23  ;;  %v248_v29 = vld [vmem:[#allocation2 + $0x48] sm:$0xff]  ;;  %235 = vst.msk [vmem:[#allocation2 + $0x78] sm:$0xff] %vm19_vm0, %v219_v17  ;;  %v263_v30 = vadd.f32 %v458_v59, %v240_v28 }
  0xee   :  { %278 = vst.msk [vmem:[%s551_s3] sm:$0xff] %vm19_vm0, %v262_v20  ;;  %286 = vst.msk [vmem:[%s551_s3 + $0x40] sm:$0xff] %vm19_vm0, %v270_v21  ;;  %v271_v31 = vadd.f32 %v458_v59, %v248_v29 }
  0xef   :  { %225 = vst.msk [vmem:[#allocation2 + $0x28] sm:$0xff] %vm19_vm0, %v209_v24  ;;  %233 = vst.msk [vmem:[#allocation2 + $0x68] sm:$0xff] %vm19_vm0, %v217_v25 }
  0xf0   :  { %281 = vst.msk [vmem:[%s551_s3 + $0x18] sm:$0xff] %vm19_vm0, %v265_v26  ;;  %289 = vst.msk [vmem:[%s551_s3 + $0x58] sm:$0xff] %vm19_vm0, %v273_v27 }
  0xf1   :  { %279 = vst.msk [vmem:[%s551_s3 + $0x8] sm:$0xff] %vm19_vm0, %v263_v30  ;;  %287 = vst.msk [vmem:[%s551_s3 + $0x48] sm:$0xff] %vm19_vm0, %v271_v31  ;;  %v245_v32 = vld [vmem:[#allocation2 + $0x30] sm:$0xff] }
  0xf2   :  { %v253_v33 = vld [vmem:[#allocation2 + $0x70] sm:$0xff]  ;;  %v268_v34 = vadd.f32 %v458_v59, %v245_v32  ;;  %v243_v36 = vld [vmem:[#allocation2 + $0x20] sm:$0xff] }
  0xf3   :  { %v276_v35 = vadd.f32 %v458_v59, %v253_v33  ;;  %v251_v37 = vld [vmem:[#allocation2 + $0x60] sm:$0xff]  ;;  %v266_v38 = vadd.f32 %v458_v59, %v243_v36  ;;  %v246_v40 = vld [vmem:[#allocation2 + $0x38] sm:$0xff] }
  0xf4   :  { %v274_v39 = vadd.f32 %v458_v59, %v251_v37  ;;  %v254_v41 = vld [vmem:[#allocation2 + $0x78] sm:$0xff]  ;;  %284 = vst.msk [vmem:[%s551_s3 + $0x30] sm:$0xff] %vm19_vm0, %v268_v34  ;;  %v269_v42 = vadd.f32 %v458_v59, %v246_v40 }
  0xf5   :  { %292 = vst.msk [vmem:[%s551_s3 + $0x70] sm:$0xff] %vm19_vm0, %v276_v35  ;;  %v277_v43 = vadd.f32 %v458_v59, %v254_v41  ;;  %282 = vst.msk [vmem:[%s551_s3 + $0x20] sm:$0xff] %vm19_vm0, %v266_v38 }
  0xf6   :  { %v244_v44 = vld [vmem:[#allocation2 + $0x28] sm:$0xff]  ;;  %290 = vst.msk [vmem:[%s551_s3 + $0x60] sm:$0xff] %vm19_vm0, %v274_v39  ;;  %285 = vst.msk [vmem:[%s551_s3 + $0x38] sm:$0xff] %vm19_vm0, %v269_v42 }
  0xf7   :  { %v252_v45 = vld [vmem:[#allocation2 + $0x68] sm:$0xff]  ;;  %v267_v46 = vadd.f32 %v458_v59, %v244_v44  ;;  %293 = vst.msk [vmem:[%s551_s3 + $0x78] sm:$0xff] %vm19_vm0, %v277_v43 }
  0xf8   :  { %v275_v47 = vadd.f32 %v458_v59, %v252_v45 }
  0xf9   :  { %283 = vst.msk [vmem:[%s551_s3 + $0x28] sm:$0xff] %vm19_vm0, %v267_v46 }
  0xfa   :  { %291 = vst.msk [vmem:[%s551_s3 + $0x68] sm:$0xff] %vm19_vm0, %v275_v47 }

// kernel: image_compression_transformer.6
= control target key start
LH: loop header
LB: loop body
LE: loop exit
PB: predicated region body
PF: predicated region fallthrough
CT: control target
= control target key end

     0   :  { %s3888_s27 = smov 0   ;;  %s4544_s0 = inlined_call_operand.vmem [shape: f32[2,64,32], index: 0, kind: input, shape index: {}, may-alias: {0,1}]   ;;  %s4545_s1 = inlined_call_operand.vmem [shape: f32[2,64,32], index: 1, kind: input, shape index: {}, may-alias: {0,1}]   ;;  %s4546_s2 = inlined_call_operand.vmem [shape: f32[3,4,32,8], index: 2, kind: input, shape index: {}]   ;;  %s4547_s3 = inlined_call_operand.vmem [shape: f32[3,4,1,8], index: 3, kind: input, shape index: {}]   ;;  %s4548_s4 = inlined_call_operand.vmem [shape: f32[4,8,32], index: 4, kind: input, shape index: {}]   ;;  %s4549_s5 = inlined_call_operand.vmem [shape: f32[1,32], index: 5, kind: input, shape index: {}]   ;;  %s4550_s6 = inlined_call_operand.vmem [shape: f32[1,32], index: 6, kind: input, shape index: {}]   ;;  %s4551_s7 = inlined_call_operand.vmem [shape: f32[1,32], index: 7, kind: input, shape index: {}]   ;;  %s4552_s8 = inlined_call_operand.vmem [shape: f32[2,64,32], index: 8, kind: output, shape index: {}]  }
   0x1 LB: > { %s3028_s28 = sadd.s32 4294967295, %s3841_s27   ;;  %p3032_p0 = scmp.ge.s32.totalorder %s3841_s27, 1  ;;  %s3841_s27 = sphi %s3888_s27, %s18_s27  }
   0x2   : > { %p272_p1 = scmp.lt.s32.totalorder %s3841_s27, 3 }
   0x4   : > { %p273_p2 = pnand %p3032_p0, %p272_p1 }
   0x5   : > { %v351_v0 = vld [vmem:[%s4546_s2] sm:$0xff] (!%p273_p2)  ;;  %v352_v1 = vld [vmem:[%s4546_s2 + $0x8] sm:$0xff] (!%p273_p2)  ;;  %v353_v2 = vld [vmem:[%s4546_s2 + $0x10] sm:$0xff] (!%p273_p2)  ;;  %p311_p3 = scmp.lt.s32.totalorder (!%p273_p2), %s3028_s28, 1  ;;  %vm464_vm0 = vcmask (!%p273_p2), 261120   ;;  %vm704_vm1 = vcmask (!%p273_p2), 64512  }
   0x6   : > { %276 = sbr.rel (%p273_p2) target bundleno = 4451 (0x1163), region = 52  ;;  %v399_v3 = vpack.c.bf16 (!%p273_p2), %v352_v1, %v351_v0  ;;  %v354_v4 = vld [vmem:[%s4546_s2 + $0x18] sm:$0xff] (!%p273_p2)  ;;  %v367_v6 = vld [vmem:[%s4546_s2 + $0x80] sm:$0xff] (!%p273_p2)  ;;  %v368_v7 = vld [vmem:[%s4546_s2 + $0x88] sm:$0xff] (!%p273_p2)  ;;  %vm802_vm2 = vcmask (!%p273_p2), 523264   ;;  %vm992_vm3 = vcmask (!%p273_p2), 1043456  }
   0x7   : > { %v400_v5 = vpack.c.bf16 (!%p273_p2), %v354_v4, %v353_v2  ;;  %v407_v8 = vpack.c.bf16 (!%p273_p2), %v368_v7, %v367_v6  ;;  %v369_v9 = vld [vmem:[%s4546_s2 + $0x90] sm:$0xff] (!%p273_p2)  ;;  %v370_v10 = vld [vmem:[%s4546_s2 + $0x98] sm:$0xff] (!%p273_p2)  ;;  %v3040_v37 = vld [vmem:[%s4547_s3] ss:$0 sm:$0xff] (!%p273_p2) }
   0x8   : > { %3311 = vmatprep.subr.bf16.mxu1 (!%p273_p2), %v399_v3  ;;  %v408_v21 = vpack.c.bf16 (!%p273_p2), %v370_v10, %v369_v9  ;;  %v3045_v58 = vld [vmem:[%s4547_s3 + $0x4] ss:$0 sm:$0xff] (!%p273_p2) }
   0x9   : > { %3312 = vmatpush3.bf16.msra.mxu1 (!%p273_p2), %v399_v3 }
   0xa   : > { %3313 = vmatprep.subr.bf16.mxu1 (!%p273_p2), %v400_v5 }
   0xd   : > { %s4554_s28 = smov (!%p311_p3, %s3028_s28), 1  ;;  %3314 = vmatpush3.bf16.msra.mxu1 %v400_v5 }
   0xe   : > { %s3914_s19 = sshll.u32 %s4554_s28, 6  ;;  %3323 = vmatprep.subr.bf16.mxu1 %v407_v8 }
   0xf   : > { %s3920_s22 = scalar_lea.vmem %s4544_s0, %s3914_s19  ;;  %s3926_s25 = scalar_lea.vmem %s4545_s1, %s3914_s19 }
  0x10   : > { %v327_v11 = vld [vmem:[%s3920_s22] sm:$0xff]  ;;  %v328_v12 = vld [vmem:[%s3920_s22 + $0x8] sm:$0xff]  ;;  %v329_v13 = vld [vmem:[%s3920_s22 + $0x10] sm:$0xff]  ;;  %s4517_s14 = scalar_lea.vmem %s4552_s8, %s3914_s19 }
  0x11   : > { %v3937_v14 = vpack.c.bf16 %v328_v12, %v327_v11  ;;  %v330_v15 = vld [vmem:[%s3920_s22 + $0x18] sm:$0xff]  ;;  %v331_v16 = vld [vmem:[%s3920_s22 + $0x20] sm:$0xff]  ;;  %v332_v17 = vld [vmem:[%s3920_s22 + $0x28] sm:$0xff] }
  0x12   : > { %v3942_v18 = vpack.c.bf16 %v330_v15, %v329_v13  ;;  %v3944_v19 = vpack.c.bf16 %v332_v17, %v331_v16  ;;  %v335_v20 = vld [vmem:[%s3926_s25] sm:$0xff]  ;;  %v336_v22 = vld [vmem:[%s3926_s25 + $0x8] sm:$0xff]  ;;  %v333_v24 = vld [vmem:[%s3920_s22 + $0x30] sm:$0xff] }
  0x13   : > { %3315 = vmatprep.mubr.msk.bf16.mxu1 %vm464_vm0, %v3937_v14  ;;  %v3952_v23 = vpack.c.bf16 %v336_v22, %v335_v20  ;;  %v334_v25 = vld [vmem:[%s3920_s22 + $0x38] sm:$0xff]  ;;  %v337_v27 = vld [vmem:[%s3926_s25 + $0x10] sm:$0xff]  ;;  %v339_v29 = vld [vmem:[%s3926_s25 + $0x20] sm:$0xff] }
  0x14   : > { %3316 = vmatmul.mubr.msk.bf16.vlgmr.msra.gmra.mrb[0].mxu1 %vm464_vm0, %v3942_v18  ;;  %v3960_v26 = vpack.c.bf16 %v334_v25, %v333_v24  ;;  %v338_v28 = vld [vmem:[%s3926_s25 + $0x18] sm:$0xff]  ;;  %v340_v30 = vld [vmem:[%s3926_s25 + $0x28] sm:$0xff]  ;;  %v341_v33 = vld [vmem:[%s3926_s25 + $0x30] sm:$0xff] }
  0x15   : > { %3324 = vmatpush3.bf16.msra.mxu1 %v407_v8  ;;  %3319 = vmatprep.mubr.msk.bf16.mxu1 %vm464_vm0, %v3944_v19  ;;  %v3970_v31 = vpack.c.bf16 %v338_v28, %v337_v27  ;;  %v3972_v32 = vpack.c.bf16 %v340_v30, %v339_v29  ;;  %v342_v34 = vld [vmem:[%s3926_s25 + $0x38] sm:$0xff]  ;;  %v384_v22 = vld [vmem:[%s4546_s2 + $0x108] sm:$0xff]  ;;  %v385_v24 = vld [vmem:[%s4546_s2 + $0x110] sm:$0xff] }
  0x16   : > { %3325 = vmatprep.subr.bf16.mxu1 %v408_v21  ;;  %3339 = vmatprep.mubr.msk.bf16.mxu0 %vm464_vm0, %v3952_v23  ;;  %v3980_v35 = vpack.c.bf16 %v342_v34, %v341_v33  ;;  %v386_v27 = vld [vmem:[%s4546_s2 + $0x118] sm:$0xff] }
  0x17   : > { %v416_v28 = vpack.c.bf16 %v386_v27, %v385_v24 }
  0x19   : > { %3326 = vmatpush3.bf16.msra.mxu1 %v408_v21  ;;  %v383_v21 = vld [vmem:[%s4546_s2 + $0x100] sm:$0xff] }
  0x1a   : > { %v415_v25 = vpack.c.bf16 %v384_v22, %v383_v21 }
  0x1c   : > { %3320 = vmatmul.mubr.msk.bf16.gmra.mrb[4].mxu1 %vm464_vm0, %v3960_v26  ;;  %3335 = vmatprep.subr.bf16.mxu0 %v415_v25 }
  0x1d   : > { %3327 = vmatprep.mubr.msk.bf16.mxu1 %vm464_vm0, %v3952_v23  ;;  %3336 = vmatpush3.bf16.msra.mxu0 %v415_v25 }
  0x1e   : > { %3337 = vmatprep.subr.bf16.mxu0 %v416_v28 }
  0x21   : > { %3338 = vmatpush3.bf16.msra.mxu0 %v416_v28 }
  0x24   : > { %3328 = vmatmul.mubr.msk.bf16.vlgmr.msra.gmra.mrb[8].mxu1 %vm464_vm0, %v3970_v31  ;;  %3340 = vmatmul.mubr.msk.bf16.vlgmr.msra.gmra.mrb[0].mxu0 %vm464_vm0, %v3970_v31 }
  0x25   : > { %3331 = vmatprep.mubr.msk.bf16.mxu1 %vm464_vm0, %v3972_v32  ;;  %3343 = vmatprep.mubr.msk.bf16.mxu0 %vm464_vm0, %v3972_v32 }
  0x2c   : > { %3332 = vmatmul.mubr.msk.bf16.gmra.mrb[12].mxu1 %vm464_vm0, %v3980_v35  ;;  %3344 = vmatmul.mubr.msk.bf16.gmra.mrb[4].mxu0 %vm464_vm0, %v3980_v35 }
  0xe7   : > { %v3317_v36 = vpop.f32.mrb[0].mxu1 }
  0xe8   : > { %v511_v38 = vpop.f32.mrb[1].mxu1  ;;  %v520_v40 = vadd.f32 %v3317_v36, %v3040_v37 }
  0xe9   : > { %v3318_v39 = vpop.f32.mrb[2].mxu1  ;;  %v512_v43 = vadd.f32 %v3040_v37, %v511_v38 }
  0xea   : > { %v523_v41 = vadd.f32 %v3318_v39, %v3040_v37  ;;  %v514_v42 = vpop.f32.mrb[3].mxu1 }
  0xeb   : > { %v515_v44 = vadd.f32 %v3040_v37, %v514_v42 }
  0xec   : > { %v697_v45 = vpack.c.bf16 %v523_v41, %v520_v40 }
  0xed   : > { %v696_v46 = vpack.c.bf16 %v515_v44, %v512_v43 }
  0xef   : > { %v3321_v47 = vpop.f32.mrb[4].mxu1  ;;  %3355 = vmatprep.mubr.msk.bf16.mxu1 %vm704_vm1, %v696_v46 }
  0xf0   : > { %v527_v48 = vpop.f32.mrb[5].mxu1  ;;  %v536_v50 = vadd.f32 %v3321_v47, %v3040_v37 }
  0xf1   : > { %v3322_v49 = vpop.f32.mrb[6].mxu1  ;;  %v528_v53 = vadd.f32 %v3040_v37, %v527_v48 }
  0xf2   : > { %v539_v51 = vadd.f32 %v3322_v49, %v3040_v37  ;;  %v530_v52 = vpop.f32.mrb[7].mxu1 }
  0xf3   : > { %v531_v54 = vadd.f32 %v3040_v37, %v530_v52 }
  0xf4   : > { %v699_v55 = vpack.c.bf16 %v539_v51, %v536_v50 }
  0xf5   : > { %v698_v56 = vpack.c.bf16 %v531_v54, %v528_v53 }
  0xf7   : > { %v3329_v57 = vpop.f32.mrb[8].mxu1 }
  0xf8   : > { %v594_v59 = vpop.f32.mrb[9].mxu1  ;;  %v603_v61 = vadd.f32 %v3329_v57, %v3045_v58  ;;  %v3341_v57 = vpop.f32.mrb[0].mxu0 }
  0xf9   : > { %v3330_v60 = vpop.f32.mrb[10].mxu1  ;;  %v595_v0 = vadd.f32 %v3045_v58, %v594_v59  ;;  %v665_v59 = vpop.f32.mrb[1].mxu0 }
  0xfa   : > { %v606_v62 = vadd.f32 %v3330_v60, %v3045_v58  ;;  %v597_v63 = vpop.f32.mrb[11].mxu1 }
  0xfb   : > { %v598_v1 = vadd.f32 %v3045_v58, %v597_v63 }
  0xfc   : > { %v701_v2 = vpack.c.bf16 %v606_v62, %v603_v61  ;;  %v3342_v61 = vpop.f32.mrb[2].mxu0 }
  0xfd   : > { %v700_v3 = vpack.c.bf16 %v598_v1, %v595_v0  ;;  %v668_v63 = vpop.f32.mrb[3].mxu0 }
  0xfe   : > { %v721_v16 = vsel %vm704_vm1, %v701_v2, 0 }
  0xff   : > { %3655 = vmatprep.subr.msk.bf16.mxu1 %vm704_vm1, %v700_v3  ;;  %v718_v4 = vsel %vm704_vm1, %v700_v3, 0  ;;  %v3333_v5 = vpop.f32.mrb[12].mxu1  ;;  %v3345_v3 = vpop.f32.mrb[4].mxu0 }
 0x100   : > { %3348 = vmatpush3.bf16.xpose.msra.mxu1 %v718_v4  ;;  %v619_v6 = vadd.f32 %v3333_v5, %v3045_v58  ;;  %v610_v7 = vpop.f32.mrb[13].mxu1 }
 0x101   : > { %3656 = vmatprep.subr.msk.bf16.mxu1 %vm704_vm1, %v701_v2  ;;  %v611_v8 = vadd.f32 %v3045_v58, %v610_v7  ;;  %v3334_v9 = vpop.f32.mrb[14].mxu1 }
 0x102   : > { %v622_v10 = vadd.f32 %v3334_v9, %v3045_v58  ;;  %v613_v11 = vpop.f32.mrb[15].mxu1 }
 0x103   : > { %v614_v12 = vadd.f32 %v3045_v58, %v613_v11 }
 0x104   : > { %v703_v13 = vpack.c.bf16 %v622_v10, %v619_v6 }
 0x105   : > { %v702_v15 = vpack.c.bf16 %v614_v12, %v611_v8 }
 0x106   : > { %v727_v20 = vsel %vm704_vm1, %v703_v13, 0 }
 0x107   : > { %v724_v17 = vsel %vm704_vm1, %v702_v15, 0 }
 0x108   : > { %3350 = vmatpush3.bf16.xpose.msra.mxu1 %v721_v16 }
 0x109   : > { %3657 = vmatprep.subr.msk.bf16.mxu1 %vm704_vm1, %v702_v15 }
 0x110   : > { %3352 = vmatpush3.bf16.xpose.msra.mxu1 %v724_v17 }
 0x111   : > { %3658 = vmatprep.subr.msk.bf16.mxu1 %vm704_vm1, %v703_v13 }
 0x118   : > { %3354 = vmatpush3.bf16.xpose.msra.mxu1 %v727_v20 }
 0x11f   : > { %3356 = vmatmul.mubr.msk.bf16.vlgmr.msra.gmra.mrb[16].mxu1 %vm704_vm1, %v697_v45 }
 0x120   : > { %3359 = vmatprep.mubr.msk.bf16.mxu1 %vm704_vm1, %v698_v56  ;;  %v4033_v56 = vld [vmem:[%s4547_s3 + $0x8] ss:$0 sm:$0xff] }
 0x121   : > { %v674_v58 = vadd.f32 %v3341_v57, %v4033_v56  ;;  %v666_v60 = vadd.f32 %v4033_v56, %v665_v59  ;;  %v677_v62 = vadd.f32 %v3342_v61, %v4033_v56  ;;  %v669_v0 = vadd.f32 %v4033_v56, %v668_v63 }
 0x123   : > { %v896_v1 = vpack.c.bf16 %v677_v62, %v674_v58  ;;  %v895_v2 = vpack.c.bf16 %v669_v0, %v666_v60  ;;  %v435_v62 = vld [vmem:[%s4548_s4] sm:$0xff] }
 0x124   : > { %v439_v63 = vpack.c.bf16 %v435_v62, %v435_v62  ;;  %v3067_v62 = vld [vmem:[%s4547_s3 + $0x1] ss:$0 sm:$0xff] }
 0x125   : > { %3363 = vmatprep.subr.bf16.mxu0 %v895_v2 }
 0x126   : > { %3364 = vmatpush3.bf16.msra.mxu0 %v895_v2 }
 0x127   : > { %3360 = vmatmul.mubr.msk.bf16.gmra.mrb[20].mxu1 %vm704_vm1, %v699_v55  ;;  %3365 = vmatprep.subr.bf16.mxu0 %v896_v1 }
 0x128   : > { %3393 = vmatprep.mubr.msk.bf16.mxu1 %vm464_vm0, %v3937_v14 }
 0x12a   : > { %3366 = vmatpush3.bf16.msra.mxu0 %v896_v1 }
 0x1f2   : > { %v3357_v29 = vpop.f32.mrb[16].mxu1 }
 0x1f3   : > { %v796_v30 = vmul.f32 0.35355338, %v3357_v29  ;;  %v763_v33 = vpop.f32.mrb[17].mxu1 }
 0x1f4   : > { %v794_v34 = vmul.f32 0.35355338, %v763_v33  ;;  %v3358_v36 = vpop.f32.mrb[18].mxu1 }
 0x1f5   : > { %v797_v37 = vmul.f32 0.35355338, %v3358_v36  ;;  %v766_v38 = vpop.f32.mrb[19].mxu1  ;;  %v809_v39 = vsel %vm802_vm2, %v796_v30, -inf }
 0x1f6   : > { %v795_v40 = vmul.f32 0.35355338, %v766_v38  ;;  %810 = vmax.xlane.f32.xlu1 %v809_v39  ;;  %v803_v41 = vsel %vm802_vm2, %v794_v34, -inf }
 0x1f7   : > { %804 = vmax.xlane.f32.xlu0 %v803_v41  ;;  %v812_v42 = vsel %vm802_vm2, %v797_v37, -inf }
 0x1f8   : > { %v806_v44 = vsel %vm802_vm2, %v795_v40, -inf }
 0x1fa   : > { %813 = vmax.xlane.f32.xlu1 %v812_v42  ;;  %v3361_v43 = vpop.f32.mrb[20].mxu1 }
 0x1fb   : > { %807 = vmax.xlane.f32.xlu0 %v806_v44  ;;  %v779_v45 = vpop.f32.mrb[21].mxu1  ;;  %v800_v49 = vmul.f32 0.35355338, %v3361_v43 }
 0x1fc   : > { %v798_v46 = vmul.f32 0.35355338, %v779_v45  ;;  %v3362_v47 = vpop.f32.mrb[22].mxu1 }
 0x1fd   : > { %v782_v48 = vpop.f32.mrb[23].mxu1  ;;  %v801_v52 = vmul.f32 0.35355338, %v3362_v47  ;;  %v821_v54 = vsel %vm802_vm2, %v800_v49, -inf }
 0x1fe   : > { %v799_v50 = vmul.f32 0.35355338, %v782_v48  ;;  %v815_v51 = vsel %vm802_vm2, %v798_v46, -inf }
 0x1ff   : > { %816 = vmax.xlane.f32.xlu0 %v815_v51  ;;  %v824_v55 = vsel %vm802_vm2, %v801_v52, -inf  ;;  %v690_v51 = vadd.f32 %v3345_v3, %v4033_v56 }
 0x200   : > { %v818_v53 = vsel %vm802_vm2, %v799_v50, -inf }
 0x201   : > { %819 = vmax.xlane.f32.xlu1 %v818_v53 }
 0x203   : > { %822 = vmax.xlane.f32.xlu0 %v821_v54 }
 0x205   : > { %825 = vmax.xlane.f32.xlu1 %v824_v55 }
 0x283   : > { %v811_v4 = vpop.xlane.xlu1 %810 }
 0x284   : > { %v829_v5 = vsub.f32 %v796_v30, %v811_v4  ;;  %v805_v6 = vpop.xlane.xlu0 %804 }
 0x285   : > { %v827_v7 = vsub.f32 %v794_v34, %v805_v6 }
 0x286   : > { %v839_v8 = vmul.f32 1.442695, %v829_v5 }
 0x287   : > { %v835_v9 = vmul.f32 1.442695, %v827_v7  ;;  %v814_v10 = vpop.xlane.xlu1 %813 }
 0x288   : > { %v830_v11 = vsub.f32 %v797_v37, %v814_v10  ;;  %v808_v12 = vpop.xlane.xlu0 %807 }
 0x289   : > { %3683 = vpow2.f32 %v835_v9  ;;  %v828_v13 = vsub.f32 %v795_v40, %v808_v12 }
 0x28a   : > { %3685 = vpow2.f32 %v839_v8  ;;  %v841_v15 = vmul.f32 1.442695, %v830_v11 }
 0x28b   : > { %v837_v16 = vmul.f32 1.442695, %v828_v13 }
 0x28c   : > { %v817_v17 = vpop.xlane.xlu0 %816 }
 0x28d   : > { %3687 = vpow2.f32 %v837_v16  ;;  %v831_v20 = vsub.f32 %v798_v46, %v817_v17 }
 0x28e   : > { %v820_v21 = vpop.xlane.xlu1 %819  ;;  %3689 = vpow2.f32 %v841_v15 }
 0x28f   : > { %v843_v22 = vmul.f32 1.442695, %v831_v20  ;;  %v832_v24 = vsub.f32 %v799_v50, %v820_v21  ;;  %v994_v21 = vsel %vm992_vm3, %v439_v63, 0 }
 0x290   : > { %v823_v25 = vpop.xlane.xlu0 %822 }
 0x291   : > { %3691 = vpow2.f32 %v843_v22  ;;  %v845_v27 = vmul.f32 1.442695, %v832_v24  ;;  %v833_v28 = vsub.f32 %v800_v49, %v823_v25 }
 0x292   : > { %v826_v29 = vpop.xlane.xlu1 %825 }
 0x293   : > { %v4039_v30 = vpop.eup %3683  ;;  %3693 = vpow2.f32 %v845_v27  ;;  %v847_v33 = vmul.f32 1.442695, %v833_v28  ;;  %v834_v34 = vsub.f32 %v801_v52, %v826_v29  ;;  %v681_v52 = vpop.f32.mrb[5].mxu0 }
 0x294   : > { %v851_v36 = vsel %vm802_vm2, %v4039_v30, 0.0  ;;  %v4043_v37 = vpop.eup %3685  ;;  %v682_v54 = vadd.f32 %v4033_v56, %v681_v52  ;;  %v3346_v55 = vpop.f32.mrb[6].mxu0 }
 0x295   : > { %3695 = vpow2.f32 %v847_v33  ;;  %v849_v38 = vmul.f32 1.442695, %v834_v34  ;;  %852 = vadd.xlane.f32.xlu0 %v851_v36  ;;  %v857_v40 = vsel %vm802_vm2, %v4043_v37, 0.0  ;;  %v693_v57 = vadd.f32 %v3346_v55, %v4033_v56  ;;  %v684_v58 = vpop.f32.mrb[7].mxu0  ;;  %v371_v36 = vld [vmem:[%s4546_s2 + $0xa0] sm:$0xff] }
 0x296   : > { %v685_v59 = vadd.f32 %v4033_v56, %v684_v58 }
 0x297   : > { %v3688_v39 = vpop.eup %3687  ;;  %3697 = vpow2.f32 %v849_v38  ;;  %v898_v60 = vpack.c.bf16 %v693_v57, %v690_v51 }
 0x298   : > { %v854_v41 = vsel %vm802_vm2, %v3688_v39, 0.0  ;;  %v3690_v42 = vpop.eup %3689  ;;  %v897_v61 = vpack.c.bf16 %v685_v59, %v682_v54 }
 0x299   : > { %858 = vadd.xlane.f32.xlu0 %v857_v40  ;;  %855 = vadd.xlane.f32.xlu1 %v854_v41  ;;  %v860_v45 = vsel %vm802_vm2, %v3690_v42, 0.0  ;;  %v356_v40 = vld [vmem:[%s4546_s2 + $0x28] sm:$0xff]  ;;  %v357_v41 = vld [vmem:[%s4546_s2 + $0x30] sm:$0xff] }
 0x29a   : > { %3367 = vmatprep.subr.bf16.mxu0 %v897_v61 }
 0x29b   : > { %v4048_v43 = vpop.eup %3691  ;;  %3368 = vmatpush3.bf16.msra.mxu0 %v897_v61 }
 0x29c   : > { %v863_v44 = vsel %vm802_vm2, %v4048_v43, 0.0  ;;  %3369 = vmatprep.subr.bf16.mxu0 %v898_v60 }
 0x29d   : > { %v3694_v46 = vpop.eup %3693  ;;  %864 = vadd.xlane.f32.xlu0 %v863_v44  ;;  %861 = vadd.xlane.f32.xlu1 %v860_v45 }
 0x29e   : > { %v866_v49 = vsel %vm802_vm2, %v3694_v46, 0.0 }
 0x29f   : > { %v3696_v47 = vpop.eup %3695  ;;  %3370 = vmatpush3.bf16.msra.mxu0 %v898_v60 }
 0x2a0   : > { %v869_v48 = vsel %vm802_vm2, %v3696_v47, 0.0  ;;  %3659 = vmatprep.subr.msk.bf16.mxu0 %vm992_vm3, %v439_v63 }
 0x2a1   : > { %v3698_v50 = vpop.eup %3697  ;;  %870 = vadd.xlane.f32.xlu0 %v869_v48  ;;  %867 = vadd.xlane.f32.xlu1 %v866_v49  ;;  %v373_v48 = vld [vmem:[%s4546_s2 + $0xb0] sm:$0xff]  ;;  %v374_v49 = vld [vmem:[%s4546_s2 + $0xb8] sm:$0xff] }
 0x2a2   : > { %v872_v53 = vsel %vm802_vm2, %v3698_v50, 0.0 }
 0x2a5   : > { %873 = vadd.xlane.f32.xlu1 %v872_v53  ;;  %v410_v53 = vpack.c.bf16 %v374_v49, %v373_v48 }
 0x322   : > { %v853_v0 = vpop.xlane.xlu0 %852 }
 0x323   : > { %3699 = vrcp.f32 %v853_v0 }
 0x326   : > { %v859_v1 = vpop.xlane.xlu0 %858  ;;  %v856_v2 = vpop.xlane.xlu1 %855 }
 0x327   : > { %3701 = vrcp.f32 %v856_v2 }
 0x328   : > { %3703 = vrcp.f32 %v859_v1 }
 0x32a   : > { %v865_v56 = vpop.xlane.xlu0 %864  ;;  %v862_v3 = vpop.xlane.xlu1 %861 }
 0x32b   : > { %3705 = vrcp.f32 %v862_v3 }
 0x32c   : > { %3707 = vrcp.f32 %v865_v56 }
 0x32d   : > { %v3700_v6 = vpop.eup %3699 }
 0x32e   : > { %v871_v4 = vpop.xlane.xlu0 %870  ;;  %v868_v5 = vpop.xlane.xlu1 %867  ;;  %v883_v9 = vmul.f32 %v3700_v6, %v4039_v30 }
 0x32f   : > { %3709 = vrcp.f32 %v868_v5 }
 0x330   : > { %3711 = vrcp.f32 %v871_v4 }
 0x331   : > { %v3702_v7 = vpop.eup %3701 }
 0x332   : > { %v874_v8 = vpop.xlane.xlu1 %873  ;;  %v884_v10 = vmul.f32 %v3702_v7, %v3688_v39  ;;  %v3704_v11 = vpop.eup %3703  ;;  %v355_v39 = vld [vmem:[%s4546_s2 + $0x20] sm:$0xff] }
 0x333   : > { %3713 = vrcp.f32 %v874_v8  ;;  %v885_v15 = vmul.f32 %v3704_v11, %v4043_v37  ;;  %v372_v37 = vld [vmem:[%s4546_s2 + $0xa8] sm:$0xff] }
 0x334   : > { %v891_v12 = vpack.c.bf16 %v884_v10, %v883_v9  ;;  %v409_v38 = vpack.c.bf16 %v372_v37, %v371_v36 }
 0x335   : > { %v3706_v13 = vpop.eup %3705 }
 0x336   : > { %v886_v16 = vmul.f32 %v3706_v13, %v3690_v42  ;;  %3371 = vmatprep.mubr.msk.bf16.mxu0 %vm802_vm2, %v891_v12  ;;  %v3708_v17 = vpop.eup %3707  ;;  %v401_v42 = vpack.c.bf16 %v356_v40, %v355_v39 }
 0x337   : > { %v887_v25 = vmul.f32 %v3708_v17, %v4048_v43  ;;  %v358_v43 = vld [vmem:[%s4546_s2 + $0x38] sm:$0xff] }
 0x338   : > { %v892_v20 = vpack.c.bf16 %v886_v16, %v885_v15  ;;  %v402_v44 = vpack.c.bf16 %v358_v43, %v357_v41  ;;  %3389 = vmatprep.subr.bf16.mxu1 %v401_v42 }
 0x339   : > { %v3710_v22 = vpop.eup %3709  ;;  %3390 = vmatpush3.bf16.msra.mxu1 %v401_v42 }
 0x33a   : > { %v3712_v24 = vpop.eup %3711  ;;  %3372 = vmatmul.mubr.msk.bf16.vlgmr.msra.gmra.mrb[8].mxu0 %vm802_vm2, %v892_v20  ;;  %v888_v27 = vmul.f32 %v3710_v22, %v3694_v46  ;;  %3391 = vmatprep.subr.bf16.mxu1 %v402_v44 }
 0x33b   : > { %3380 = vmatpush3.bf16.msra.mxu0 %v994_v21  ;;  %v889_v30 = vmul.f32 %v3712_v24, %v3696_v47  ;;  %v3072_v21 = vld [vmem:[%s4547_s3 + $0x5] ss:$0 sm:$0xff] }
 0x33c   : > { %v893_v29 = vpack.c.bf16 %v888_v27, %v887_v25  ;;  %3401 = vmatprep.subr.bf16.mxu0 %v409_v38 }
 0x33d   : > { %v3714_v28 = vpop.eup %3713  ;;  %3392 = vmatpush3.bf16.msra.mxu1 %v402_v44 }
 0x33e   : > { %v890_v33 = vmul.f32 %v3714_v28, %v3698_v50  ;;  %3375 = vmatprep.mubr.msk.bf16.mxu0 %vm802_vm2, %v893_v29 }
 0x340   : > { %v894_v34 = vpack.c.bf16 %v890_v33, %v889_v30  ;;  %3394 = vmatmul.mubr.msk.bf16.vlgmr.msra.gmra.mrb[24].mxu1 %vm464_vm0, %v3942_v18 }
 0x341   : > { %3397 = vmatprep.mubr.msk.bf16.mxu1 %vm464_vm0, %v3944_v19 }
 0x342   : > { %3376 = vmatmul.mubr.msk.bf16.gmra.mrb[12].mxu0 %vm802_vm2, %v894_v34 }
 0x348   : > { %3398 = vmatmul.mubr.msk.bf16.gmra.mrb[28].mxu1 %vm464_vm0, %v3960_v26 }
 0x349   : > { %3417 = vmatprep.mubr.msk.bf16.mxu1 %vm464_vm0, %v3952_v23 }
 0x40d   : > { %v3373_v45 = vpop.f32.mrb[8].mxu0 }
 0x40e   : > { %v945_v46 = vpop.f32.mrb[9].mxu0 }
 0x40f   : > { %v3374_v47 = vpop.f32.mrb[10].mxu0 }
 0x410   : > { %v977_v50 = vpack.c.bf16 %v3374_v47, %v3373_v45  ;;  %v948_v51 = vpop.f32.mrb[11].mxu0 }
 0x411   : > { %v976_v52 = vpack.c.bf16 %v948_v51, %v945_v46  ;;  %v388_v51 = vld [vmem:[%s4546_s2 + $0x128] sm:$0xff] }
 0x413   : > { %3381 = vmatprep.mubr.msk.bf16.mxu0 %vm704_vm1, %v976_v52  ;;  %v3395_v61 = vpop.f32.mrb[24].mxu1  ;;  %v389_v52 = vld [vmem:[%s4546_s2 + $0x130] sm:$0xff] }
 0x414   : > { %3382 = vmatmul.mubr.msk.bf16.vlgmr.msra.gmra.mrb[16].mxu0 %vm704_vm1, %v977_v50  ;;  %v1118_v63 = vadd.f32 %v3395_v61, %v3067_v62  ;;  %v1109_v0 = vpop.f32.mrb[25].mxu1  ;;  %v387_v50 = vld [vmem:[%s4546_s2 + $0x120] sm:$0xff] }
 0x415   : > { %v3377_v54 = vpop.f32.mrb[12].mxu0  ;;  %3402 = vmatpush3.bf16.msra.mxu0 %v409_v38  ;;  %v1110_v1 = vadd.f32 %v3067_v62, %v1109_v0  ;;  %v3396_v2 = vpop.f32.mrb[26].mxu1 }
 0x416   : > { %v961_v55 = vpop.f32.mrb[13].mxu0  ;;  %3403 = vmatprep.subr.bf16.mxu0 %v410_v53  ;;  %v1121_v56 = vadd.f32 %v3396_v2, %v3067_v62  ;;  %v1112_v3 = vpop.f32.mrb[27].mxu1 }
 0x417   : > { %v3378_v57 = vpop.f32.mrb[14].mxu0  ;;  %v1113_v4 = vadd.f32 %v3067_v62, %v1112_v3 }
 0x418   : > { %v979_v58 = vpack.c.bf16 %v3378_v57, %v3377_v54  ;;  %v964_v59 = vpop.f32.mrb[15].mxu0  ;;  %v1283_v5 = vpack.c.bf16 %v1121_v56, %v1118_v63  ;;  %v390_v54 = vld [vmem:[%s4546_s2 + $0x138] sm:$0xff] }
 0x419   : > { %v978_v60 = vpack.c.bf16 %v964_v59, %v961_v55  ;;  %3404 = vmatpush3.bf16.msra.mxu0 %v410_v53  ;;  %v1282_v6 = vpack.c.bf16 %v1113_v4, %v1110_v1  ;;  %v417_v53 = vpack.c.bf16 %v388_v51, %v387_v50  ;;  %v418_v55 = vpack.c.bf16 %v390_v54, %v389_v52 }
 0x41b   : > { %3385 = vmatprep.mubr.msk.bf16.mxu0 %vm704_vm1, %v978_v60  ;;  %v3399_v7 = vpop.f32.mrb[28].mxu1  ;;  %3413 = vmatprep.subr.bf16.mxu1 %v417_v53 }
 0x41c   : > { %3386 = vmatmul.mubr.msk.bf16.gmra.mrb[20].mxu0 %vm704_vm1, %v979_v58  ;;  %v1134_v8 = vadd.f32 %v3399_v7, %v3067_v62  ;;  %v1125_v9 = vpop.f32.mrb[29].mxu1  ;;  %3414 = vmatpush3.bf16.msra.mxu1 %v417_v53 }
 0x41d   : > { %3405 = vmatprep.mubr.msk.bf16.mxu0 %vm464_vm0, %v3952_v23  ;;  %v1126_v10 = vadd.f32 %v3067_v62, %v1125_v9  ;;  %v3400_v11 = vpop.f32.mrb[30].mxu1  ;;  %3415 = vmatprep.subr.bf16.mxu1 %v418_v55 }
 0x41e   : > { %v1137_v12 = vadd.f32 %v3400_v11, %v3067_v62  ;;  %v1128_v13 = vpop.f32.mrb[31].mxu1 }
 0x41f   : > { %v1129_v15 = vadd.f32 %v3067_v62, %v1128_v13 }
 0x420   : > { %v1285_v16 = vpack.c.bf16 %v1137_v12, %v1134_v8  ;;  %3416 = vmatpush3.bf16.msra.mxu1 %v418_v55 }
 0x421   : > { %v1284_v17 = vpack.c.bf16 %v1129_v15, %v1126_v10 }
 0x423   : > { %3418 = vmatmul.mubr.msk.bf16.vlgmr.msra.gmra.mrb[32].mxu1 %vm464_vm0, %v3970_v31 }
 0x424   : > { %3406 = vmatmul.mubr.msk.bf16.vlgmr.msra.gmra.mrb[24].mxu0 %vm464_vm0, %v3970_v31  ;;  %3421 = vmatprep.mubr.msk.bf16.mxu1 %vm464_vm0, %v3972_v32 }
 0x425   : > { %3409 = vmatprep.mubr.msk.bf16.mxu0 %vm464_vm0, %v3972_v32 }
 0x42b   : > { %3422 = vmatmul.mubr.msk.bf16.gmra.mrb[36].mxu1 %vm464_vm0, %v3980_v35 }
 0x42c   : > { %3410 = vmatmul.mubr.msk.bf16.gmra.mrb[28].mxu0 %vm464_vm0, %v3980_v35 }
 0x42d   : > { %3433 = vmatprep.mubr.msk.bf16.mxu0 %vm704_vm1, %v1282_v6 }
 0x4f7   : > { %v3407_v20 = vpop.f32.mrb[24].mxu0 }
 0x4f8   : > { %v1180_v22 = vpop.f32.mrb[25].mxu0  ;;  %v1189_v25 = vadd.f32 %v3407_v20, %v3072_v21  ;;  %v3419_v20 = vpop.f32.mrb[32].mxu1 }
 0x4f9   : > { %v3408_v24 = vpop.f32.mrb[26].mxu0  ;;  %v1181_v29 = vadd.f32 %v3072_v21, %v1180_v22  ;;  %v1251_v22 = vpop.f32.mrb[33].mxu1 }
 0x4fa   : > { %v1192_v27 = vadd.f32 %v3408_v24, %v3072_v21  ;;  %v1183_v28 = vpop.f32.mrb[27].mxu0 }
 0x4fb   : > { %v1184_v30 = vadd.f32 %v3072_v21, %v1183_v28 }
 0x4fc   : > { %v1287_v33 = vpack.c.bf16 %v1192_v27, %v1189_v25  ;;  %v3420_v25 = vpop.f32.mrb[34].mxu1 }
 0x4fd   : > { %v1286_v34 = vpack.c.bf16 %v1184_v30, %v1181_v29  ;;  %v1254_v28 = vpop.f32.mrb[35].mxu1 }
 0x4fe   : > { %v1306_v47 = vsel %vm704_vm1, %v1287_v33, 0 }
 0x4ff   : > { %3660 = vmatprep.subr.msk.bf16.mxu0 %vm704_vm1, %v1286_v34  ;;  %v1303_v36 = vsel %vm704_vm1, %v1286_v34, 0  ;;  %v3411_v37 = vpop.f32.mrb[28].mxu0  ;;  %v3423_v34 = vpop.f32.mrb[36].mxu1 }
 0x500   : > { %3426 = vmatpush3.bf16.xpose.msra.mxu0 %v1303_v36  ;;  %v1205_v38 = vadd.f32 %v3411_v37, %v3072_v21  ;;  %v1196_v39 = vpop.f32.mrb[29].mxu0  ;;  %v1267_v37 = vpop.f32.mrb[37].mxu1 }
 0x501   : > { %3661 = vmatprep.subr.msk.bf16.mxu0 %vm704_vm1, %v1287_v33  ;;  %v1197_v40 = vadd.f32 %v3072_v21, %v1196_v39  ;;  %v3412_v41 = vpop.f32.mrb[30].mxu0 }
 0x502   : > { %v1208_v42 = vadd.f32 %v3412_v41, %v3072_v21  ;;  %v1199_v43 = vpop.f32.mrb[31].mxu0 }
 0x503   : > { %v1200_v44 = vadd.f32 %v3072_v21, %v1199_v43 }
 0x504   : > { %v1289_v45 = vpack.c.bf16 %v1208_v42, %v1205_v38  ;;  %v3424_v38 = vpop.f32.mrb[38].mxu1 }
 0x505   : > { %v1288_v46 = vpack.c.bf16 %v1200_v44, %v1197_v40 }
 0x506   : > { %v1312_v49 = vsel %vm704_vm1, %v1289_v45, 0 }
 0x507   : > { %v1309_v48 = vsel %vm704_vm1, %v1288_v46, 0 }
 0x508   : > { %3428 = vmatpush3.bf16.xpose.msra.mxu0 %v1306_v47 }
 0x509   : > { %3662 = vmatprep.subr.msk.bf16.mxu0 %vm704_vm1, %v1288_v46 }
 0x510   : > { %3430 = vmatpush3.bf16.xpose.msra.mxu0 %v1309_v48 }
 0x511   : > { %3663 = vmatprep.subr.msk.bf16.mxu0 %vm704_vm1, %v1289_v45 }
 0x518   : > { %3432 = vmatpush3.bf16.xpose.msra.mxu0 %v1312_v49 }
 0x51f   : > { %3434 = vmatmul.mubr.msk.bf16.vlgmr.msra.gmra.mrb[32].mxu0 %vm704_vm1, %v1283_v5 }
 0x520   : > { %3437 = vmatprep.mubr.msk.bf16.mxu0 %vm704_vm1, %v1284_v17  ;;  %v4163_v17 = vld [vmem:[%s4547_s3 + $0x9] ss:$0 sm:$0xff] }
 0x521   : > { %v1260_v21 = vadd.f32 %v3419_v20, %v4163_v17  ;;  %v1252_v24 = vadd.f32 %v4163_v17, %v1251_v22  ;;  %v1263_v27 = vadd.f32 %v3420_v25, %v4163_v17  ;;  %v1255_v29 = vadd.f32 %v4163_v17, %v1254_v28  ;;  %v1270_v22 = vpop.f32.mrb[39].mxu1  ;;  %v360_v28 = vld [vmem:[%s4546_s2 + $0x48] sm:$0xff] }
 0x522   : > { %v1276_v36 = vadd.f32 %v3423_v34, %v4163_v17  ;;  %v1279_v39 = vadd.f32 %v3424_v38, %v4163_v17 }
 0x523   : > { %v1480_v30 = vpack.c.bf16 %v1263_v27, %v1260_v21  ;;  %v1479_v33 = vpack.c.bf16 %v1255_v29, %v1252_v24  ;;  %v1268_v21 = vadd.f32 %v4163_v17, %v1267_v37  ;;  %v1271_v24 = vadd.f32 %v4163_v17, %v1270_v22  ;;  %v359_v27 = vld [vmem:[%s4546_s2 + $0x40] sm:$0xff] }
 0x524   : > { %v4171_v40 = vpack.c.bf16 %v1279_v39, %v1276_v36  ;;  %v403_v29 = vpack.c.bf16 %v360_v28, %v359_v27  ;;  %v3094_v27 = vld [vmem:[%s4547_s3 + $0x2] ss:$0 sm:$0xff] }
 0x525   : > { %3441 = vmatprep.subr.bf16.mxu1 %v1479_v33  ;;  %v1481_v25 = vpack.c.bf16 %v1271_v24, %v1268_v21 }
 0x526   : > { %3442 = vmatpush3.bf16.msra.mxu1 %v1479_v33 }
 0x527   : > { %3438 = vmatmul.mubr.msk.bf16.gmra.mrb[36].mxu0 %vm704_vm1, %v1285_v16  ;;  %3443 = vmatprep.subr.bf16.mxu1 %v1480_v30 }
 0x52a   : > { %3444 = vmatpush3.bf16.msra.mxu1 %v1480_v30 }
 0x52b   : > { %3445 = vmatprep.subr.bf16.mxu1 %v1481_v25 }
 0x52e   : > { %3446 = vmatpush3.bf16.msra.mxu1 %v1481_v25 }
 0x52f   : > { %3447 = vmatprep.subr.bf16.mxu1 %v4171_v40 }
 0x532   : > { %3448 = vmatpush3.bf16.msra.mxu1 %v4171_v40 }
 0x533   : > { %3467 = vmatprep.subr.bf16.mxu1 %v403_v29 }
 0x5f2   : > { %v3435_v57 = vpop.f32.mrb[32].mxu0 }
 0x5f3   : > { %v1348_v58 = vpop.f32.mrb[33].mxu0  ;;  %v1381_v62 = vmul.f32 0.35355338, %v3435_v57 }
 0x5f4   : > { %v1379_v59 = vmul.f32 0.35355338, %v1348_v58  ;;  %v3436_v60 = vpop.f32.mrb[34].mxu0 }
 0x5f5   : > { %v1351_v61 = vpop.f32.mrb[35].mxu0  ;;  %v1382_v1 = vmul.f32 0.35355338, %v3436_v60  ;;  %v1393_v3 = vsel %vm802_vm2, %v1381_v62, -inf }
 0x5f6   : > { %v1380_v63 = vmul.f32 0.35355338, %v1351_v61  ;;  %v1387_v0 = vsel %vm802_vm2, %v1379_v59, -inf }
 0x5f7   : > { %1388 = vmax.xlane.f32.xlu0 %v1387_v0  ;;  %v1396_v7 = vsel %vm802_vm2, %v1382_v1, -inf }
 0x5f8   : > { %v1390_v2 = vsel %vm802_vm2, %v1380_v63, -inf }
 0x5f9   : > { %1391 = vmax.xlane.f32.xlu1 %v1390_v2 }
 0x5fa   : > { %v3439_v56 = vpop.f32.mrb[36].mxu0 }
 0x5fb   : > { %1394 = vmax.xlane.f32.xlu0 %v1393_v3  ;;  %v1364_v4 = vpop.f32.mrb[37].mxu0  ;;  %v1385_v9 = vmul.f32 0.35355338, %v3439_v56 }
 0x5fc   : > { %v1383_v5 = vmul.f32 0.35355338, %v1364_v4  ;;  %v3440_v6 = vpop.f32.mrb[38].mxu0 }
 0x5fd   : > { %1397 = vmax.xlane.f32.xlu1 %v1396_v7  ;;  %v1367_v8 = vpop.f32.mrb[39].mxu0  ;;  %v1386_v12 = vmul.f32 0.35355338, %v3440_v6  ;;  %v1405_v15 = vsel %vm802_vm2, %v1385_v9, -inf }
 0x5fe   : > { %v1384_v10 = vmul.f32 0.35355338, %v1367_v8  ;;  %v1399_v11 = vsel %vm802_vm2, %v1383_v5, -inf }
 0x5ff   : > { %1400 = vmax.xlane.f32.xlu0 %v1399_v11  ;;  %v1408_v16 = vsel %vm802_vm2, %v1386_v12, -inf }
 0x600   : > { %v1402_v13 = vsel %vm802_vm2, %v1384_v10, -inf }
 0x601   : > { %1403 = vmax.xlane.f32.xlu1 %v1402_v13 }
 0x603   : > { %1406 = vmax.xlane.f32.xlu0 %v1405_v15 }
 0x605   : > { %1409 = vmax.xlane.f32.xlu1 %v1408_v16 }
 0x684   : > { %v1389_v41 = vpop.xlane.xlu0 %1388 }
 0x685   : > { %v1411_v42 = vsub.f32 %v1379_v59, %v1389_v41 }
 0x686   : > { %v1392_v43 = vpop.xlane.xlu1 %1391 }
 0x687   : > { %v1419_v44 = vmul.f32 1.442695, %v1411_v42  ;;  %v1412_v45 = vsub.f32 %v1380_v63, %v1392_v43 }
 0x688   : > { %v1395_v46 = vpop.xlane.xlu0 %1394 }
 0x689   : > { %3715 = vpow2.f32 %v1419_v44  ;;  %v1421_v47 = vmul.f32 1.442695, %v1412_v45  ;;  %v1413_v48 = vsub.f32 %v1381_v62, %v1395_v46 }
 0x68a   : > { %v1398_v49 = vpop.xlane.xlu1 %1397 }
 0x68b   : > { %3717 = vpow2.f32 %v1421_v47  ;;  %v1423_v50 = vmul.f32 1.442695, %v1413_v48  ;;  %v1414_v51 = vsub.f32 %v1382_v1, %v1398_v49  ;;  %v361_v47 = vld [vmem:[%s4546_s2 + $0x50] sm:$0xff]  ;;  %v362_v48 = vld [vmem:[%s4546_s2 + $0x58] sm:$0xff] }
 0x68c   : > { %v1401_v52 = vpop.xlane.xlu0 %1400 }
 0x68d   : > { %3719 = vpow2.f32 %v1423_v50  ;;  %v1425_v53 = vmul.f32 1.442695, %v1414_v51  ;;  %v1415_v54 = vsub.f32 %v1383_v5, %v1401_v52 }
 0x68e   : > { %v1404_v55 = vpop.xlane.xlu1 %1403 }
 0x68f   : > { %3721 = vpow2.f32 %v1425_v53  ;;  %v1427_v57 = vmul.f32 1.442695, %v1415_v54  ;;  %v1416_v58 = vsub.f32 %v1384_v10, %v1404_v55  ;;  %v404_v53 = vpack.c.bf16 %v362_v48, %v361_v47  ;;  %v375_v55 = vld [vmem:[%s4546_s2 + $0xc0] sm:$0xff] }
 0x690   : > { %v1407_v59 = vpop.xlane.xlu0 %1406 }
 0x691   : > { %3723 = vpow2.f32 %v1427_v57  ;;  %v1429_v60 = vmul.f32 1.442695, %v1416_v58  ;;  %v1417_v61 = vsub.f32 %v1385_v9, %v1407_v59  ;;  %v376_v57 = vld [vmem:[%s4546_s2 + $0xc8] sm:$0xff] }
 0x692   : > { %v1410_v63 = vpop.xlane.xlu1 %1409 }
 0x693   : > { %v3716_v0 = vpop.eup %3715  ;;  %3725 = vpow2.f32 %v1429_v60  ;;  %v1431_v62 = vmul.f32 1.442695, %v1417_v61  ;;  %v1418_v2 = vsub.f32 %v1386_v12, %v1410_v63  ;;  %v411_v63 = vpack.c.bf16 %v376_v57, %v375_v55 }
 0x694   : > { %v1435_v56 = vsel %vm802_vm2, %v3716_v0, 0.0 }
 0x695   : > { %v3718_v1 = vpop.eup %3717  ;;  %3727 = vpow2.f32 %v1431_v62  ;;  %v1433_v3 = vmul.f32 1.442695, %v1418_v2  ;;  %1436 = vadd.xlane.f32.xlu0 %v1435_v56 }
 0x696   : > { %v1438_v4 = vsel %vm802_vm2, %v3718_v1, 0.0 }
 0x697   : > { %v3720_v5 = vpop.eup %3719  ;;  %3729 = vpow2.f32 %v1433_v3  ;;  %1439 = vadd.xlane.f32.xlu1 %v1438_v4  ;;  %v378_v3 = vld [vmem:[%s4546_s2 + $0xd8] sm:$0xff] }
 0x698   : > { %v1441_v6 = vsel %vm802_vm2, %v3720_v5, 0.0 }
 0x699   : > { %v3722_v7 = vpop.eup %3721  ;;  %1442 = vadd.xlane.f32.xlu0 %v1441_v6 }
 0x69a   : > { %v1444_v8 = vsel %vm802_vm2, %v3722_v7, 0.0 }
 0x69b   : > { %v3724_v9 = vpop.eup %3723  ;;  %1445 = vadd.xlane.f32.xlu1 %v1444_v8 }
 0x69c   : > { %v1447_v10 = vsel %vm802_vm2, %v3724_v9, 0.0 }
 0x69d   : > { %v3726_v11 = vpop.eup %3725  ;;  %1448 = vadd.xlane.f32.xlu0 %v1447_v10 }
 0x69e   : > { %v1450_v12 = vsel %vm802_vm2, %v3726_v11, 0.0 }
 0x69f   : > { %v4179_v13 = vpop.eup %3727  ;;  %1451 = vadd.xlane.f32.xlu1 %v1450_v12 }
 0x6a0   : > { %v1453_v15 = vsel %vm802_vm2, %v4179_v13, 0.0 }
 0x6a1   : > { %v3730_v16 = vpop.eup %3729  ;;  %1454 = vadd.xlane.f32.xlu0 %v1453_v15 }
 0x6a2   : > { %v1456_v20 = vsel %vm802_vm2, %v3730_v16, 0.0 }
 0x6a3   : > { %1457 = vadd.xlane.f32.xlu1 %v1456_v20 }
 0x722   : > { %v1437_v30 = vpop.xlane.xlu0 %1436 }
 0x723   : > { %3731 = vrcp.f32 %v1437_v30 }
 0x724   : > { %v1440_v17 = vpop.xlane.xlu1 %1439 }
 0x725   : > { %3733 = vrcp.f32 %v1440_v17 }
 0x726   : > { %v1443_v33 = vpop.xlane.xlu0 %1442 }
 0x727   : > { %3735 = vrcp.f32 %v1443_v33 }
 0x728   : > { %v1446_v34 = vpop.xlane.xlu1 %1445 }
 0x729   : > { %3737 = vrcp.f32 %v1446_v34 }
 0x72a   : > { %v1449_v36 = vpop.xlane.xlu0 %1448 }
 0x72b   : > { %3739 = vrcp.f32 %v1449_v36 }
 0x72c   : > { %v1452_v37 = vpop.xlane.xlu1 %1451 }
 0x72d   : > { %v3732_v38 = vpop.eup %3731  ;;  %3741 = vrcp.f32 %v1452_v37 }
 0x72e   : > { %v1455_v39 = vpop.xlane.xlu0 %1454  ;;  %v1467_v42 = vmul.f32 %v3732_v38, %v3716_v0 }
 0x72f   : > { %v3734_v40 = vpop.eup %3733  ;;  %3743 = vrcp.f32 %v1455_v39 }
 0x730   : > { %v1458_v41 = vpop.xlane.xlu1 %1457  ;;  %v1468_v43 = vmul.f32 %v3734_v40, %v3718_v1  ;;  %v377_v1 = vld [vmem:[%s4546_s2 + $0xd0] sm:$0xff] }
 0x731   : > { %v3736_v44 = vpop.eup %3735  ;;  %3745 = vrcp.f32 %v1458_v41  ;;  %v412_v4 = vpack.c.bf16 %v378_v3, %v377_v1 }
 0x732   : > { %v1475_v45 = vpack.c.bf16 %v1468_v43, %v1467_v42  ;;  %v1469_v49 = vmul.f32 %v3736_v44, %v3720_v5  ;;  %v436_v5 = vld [vmem:[%s4548_s4 + $0x8] sm:$0xff] }
 0x733   : > { %v3738_v46 = vpop.eup %3737  ;;  %v440_v6 = vpack.c.bf16 %v436_v5, %v436_v5 }
 0x734   : > { %v1470_v50 = vmul.f32 %v3738_v46, %v3722_v7  ;;  %3449 = vmatprep.mubr.msk.bf16.mxu1 %vm802_vm2, %v1475_v45 }
 0x735   : > { %v3740_v51 = vpop.eup %3739  ;;  %3664 = vmatprep.subr.msk.bf16.mxu0 %vm992_vm3, %v440_v6  ;;  %v1577_v7 = vsel %vm992_vm3, %v440_v6, 0 }
 0x736   : > { %v1476_v52 = vpack.c.bf16 %v1470_v50, %v1469_v49  ;;  %v1471_v58 = vmul.f32 %v3740_v51, %v3724_v9  ;;  %3458 = vmatpush3.bf16.msra.mxu0 %v1577_v7  ;;  %v3099_v50 = vld [vmem:[%s4547_s3 + $0x6] ss:$0 sm:$0xff] }
 0x737   : > { %v3742_v54 = vpop.eup %3741 }
 0x738   : > { %3450 = vmatmul.mubr.msk.bf16.vlgmr.msra.gmra.mrb[40].mxu1 %vm802_vm2, %v1476_v52  ;;  %v1472_v59 = vmul.f32 %v3742_v54, %v3726_v11 }
 0x739   : > { %v3744_v60 = vpop.eup %3743  ;;  %3468 = vmatpush3.bf16.msra.mxu1 %v403_v29 }
 0x73a   : > { %v1477_v61 = vpack.c.bf16 %v1472_v59, %v1471_v58  ;;  %3469 = vmatprep.subr.bf16.mxu1 %v404_v53  ;;  %v1473_v62 = vmul.f32 %v3744_v60, %v4179_v13 }
 0x73b   : > { %v3746_v0 = vpop.eup %3745 }
 0x73c   : > { %3453 = vmatprep.mubr.msk.bf16.mxu1 %vm802_vm2, %v1477_v61  ;;  %v1474_v2 = vmul.f32 %v3746_v0, %v3730_v16 }
 0x73d   : > { %3470 = vmatpush3.bf16.msra.mxu1 %v404_v53 }
 0x73e   : > { %v1478_v56 = vpack.c.bf16 %v1474_v2, %v1473_v62  ;;  %3479 = vmatprep.subr.bf16.mxu1 %v411_v63 }
 0x740   : > { %3454 = vmatmul.mubr.msk.bf16.gmra.mrb[44].mxu1 %vm802_vm2, %v1478_v56 }
 0x741   : > { %3471 = vmatprep.mubr.msk.bf16.mxu1 %vm464_vm0, %v3937_v14 }
 0x748   : > { %3472 = vmatmul.mubr.msk.bf16.vlgmr.msra.gmra.mrb[48].mxu1 %vm464_vm0, %v3942_v18 }
 0x749   : > { %3480 = vmatpush3.bf16.msra.mxu1 %v411_v63  ;;  %3475 = vmatprep.mubr.msk.bf16.mxu1 %vm464_vm0, %v3944_v19 }
 0x74a   : > { %3481 = vmatprep.subr.bf16.mxu1 %v412_v4 }
 0x74d   : > { %3482 = vmatpush3.bf16.msra.mxu1 %v412_v4 }
 0x750   : > { %3476 = vmatmul.mubr.msk.bf16.gmra.mrb[52].mxu1 %vm464_vm0, %v3960_v26 }
 0x751   : > { %3483 = vmatprep.mubr.msk.bf16.mxu1 %vm464_vm0, %v3952_v23 }
 0x758   : > { %3484 = vmatmul.mubr.msk.bf16.vlgmr.msra.gmra.mrb[56].mxu1 %vm464_vm0, %v3970_v31 }
 0x759   : > { %3487 = vmatprep.mubr.msk.bf16.mxu1 %vm464_vm0, %v3972_v32 }
 0x760   : > { %3488 = vmatmul.mubr.msk.bf16.gmra.mrb[60].mxu1 %vm464_vm0, %v3980_v35 }
 0x80b   : > { %v3451_v8 = vpop.f32.mrb[40].mxu1 }
 0x80c   : > { %v1529_v9 = vpop.f32.mrb[41].mxu1 }
 0x80d   : > { %v3452_v10 = vpop.f32.mrb[42].mxu1 }
 0x80e   : > { %v1561_v11 = vpack.c.bf16 %v3452_v10, %v3451_v8  ;;  %v1532_v12 = vpop.f32.mrb[43].mxu1  ;;  %v391_v10 = vld [vmem:[%s4546_s2 + $0x140] sm:$0xff] }
 0x80f   : > { %v1560_v13 = vpack.c.bf16 %v1532_v12, %v1529_v9  ;;  %v393_v12 = vld [vmem:[%s4546_s2 + $0x150] sm:$0xff] }
 0x811   : > { %3459 = vmatprep.mubr.msk.bf16.mxu0 %vm704_vm1, %v1560_v13 }
 0x812   : > { %3460 = vmatmul.mubr.msk.bf16.vlgmr.msra.gmra.mrb[16].mxu0 %vm704_vm1, %v1561_v11  ;;  %v392_v11 = vld [vmem:[%s4546_s2 + $0x148] sm:$0xff] }
 0x813   : > { %v3455_v15 = vpop.f32.mrb[44].mxu1  ;;  %v419_v13 = vpack.c.bf16 %v392_v11, %v391_v10 }
 0x814   : > { %v1545_v16 = vpop.f32.mrb[45].mxu1 }
 0x815   : > { %v3456_v20 = vpop.f32.mrb[46].mxu1  ;;  %3491 = vmatprep.subr.bf16.mxu0 %v419_v13 }
 0x816   : > { %v1563_v21 = vpack.c.bf16 %v3456_v20, %v3455_v15  ;;  %v1548_v22 = vpop.f32.mrb[47].mxu1  ;;  %v394_v15 = vld [vmem:[%s4546_s2 + $0x158] sm:$0xff]  ;;  %3492 = vmatpush3.bf16.msra.mxu0 %v419_v13 }
 0x817   : > { %v1562_v24 = vpack.c.bf16 %v1548_v22, %v1545_v16  ;;  %v420_v16 = vpack.c.bf16 %v394_v15, %v393_v12 }
 0x819   : > { %3463 = vmatprep.mubr.msk.bf16.mxu0 %vm704_vm1, %v1562_v24  ;;  %3493 = vmatprep.subr.bf16.mxu0 %v420_v16 }
 0x81a   : > { %3464 = vmatmul.mubr.msk.bf16.gmra.mrb[20].mxu0 %vm704_vm1, %v1563_v21 }
 0x81b   : > { %v3473_v25 = vpop.f32.mrb[48].mxu1  ;;  %3495 = vmatprep.mubr.msk.bf16.mxu0 %vm464_vm0, %v3952_v23  ;;  %3494 = vmatpush3.bf16.msra.mxu0 %v420_v16 }
 0x81c   : > { %v1692_v28 = vpop.f32.mrb[49].mxu1  ;;  %v1701_v30 = vadd.f32 %v3473_v25, %v3094_v27 }
 0x81d   : > { %v3474_v29 = vpop.f32.mrb[50].mxu1  ;;  %v1693_v34 = vadd.f32 %v3094_v27, %v1692_v28 }
 0x81e   : > { %v1704_v17 = vadd.f32 %v3474_v29, %v3094_v27  ;;  %v1695_v33 = vpop.f32.mrb[51].mxu1 }
 0x81f   : > { %v1696_v36 = vadd.f32 %v3094_v27, %v1695_v33 }
 0x820   : > { %v1866_v37 = vpack.c.bf16 %v1704_v17, %v1701_v30 }
 0x821   : > { %v1865_v38 = vpack.c.bf16 %v1696_v36, %v1693_v34 }
 0x822   : > { %3496 = vmatmul.mubr.msk.bf16.vlgmr.msra.gmra.mrb[40].mxu0 %vm464_vm0, %v3970_v31 }
 0x823   : > { %v3477_v39 = vpop.f32.mrb[52].mxu1  ;;  %3511 = vmatprep.mubr.msk.bf16.mxu1 %vm704_vm1, %v1865_v38  ;;  %3499 = vmatprep.mubr.msk.bf16.mxu0 %vm464_vm0, %v3972_v32 }
 0x824   : > { %v1708_v40 = vpop.f32.mrb[53].mxu1  ;;  %v1717_v42 = vadd.f32 %v3477_v39, %v3094_v27 }
 0x825   : > { %v3478_v41 = vpop.f32.mrb[54].mxu1  ;;  %v1709_v45 = vadd.f32 %v3094_v27, %v1708_v40 }
 0x826   : > { %v1720_v43 = vadd.f32 %v3478_v41, %v3094_v27  ;;  %v1711_v44 = vpop.f32.mrb[55].mxu1 }
 0x827   : > { %v1712_v46 = vadd.f32 %v3094_v27, %v1711_v44 }
 0x828   : > { %v1868_v47 = vpack.c.bf16 %v1720_v43, %v1717_v42 }
 0x829   : > { %v1867_v48 = vpack.c.bf16 %v1712_v46, %v1709_v45 }
 0x82a   : > { %3500 = vmatmul.mubr.msk.bf16.gmra.mrb[44].mxu0 %vm464_vm0, %v3980_v35 }
 0x82b   : > { %v3485_v49 = vpop.f32.mrb[56].mxu1 }
 0x82c   : > { %v1763_v51 = vpop.f32.mrb[57].mxu1  ;;  %v1772_v53 = vadd.f32 %v3485_v49, %v3099_v50 }
 0x82d   : > { %v3486_v52 = vpop.f32.mrb[58].mxu1  ;;  %v1764_v57 = vadd.f32 %v3099_v50, %v1763_v51 }
 0x82e   : > { %v1775_v54 = vadd.f32 %v3486_v52, %v3099_v50  ;;  %v1766_v55 = vpop.f32.mrb[59].mxu1 }
 0x82f   : > { %v1767_v58 = vadd.f32 %v3099_v50, %v1766_v55 }
 0x830   : > { %v1870_v59 = vpack.c.bf16 %v1775_v54, %v1772_v53 }
 0x831   : > { %v1869_v60 = vpack.c.bf16 %v1767_v58, %v1764_v57 }
 0x832   : > { %v1889_v7 = vsel %vm704_vm1, %v1870_v59, 0 }
 0x833   : > { %3665 = vmatprep.subr.msk.bf16.mxu1 %vm704_vm1, %v1869_v60  ;;  %v1886_v61 = vsel %vm704_vm1, %v1869_v60, 0  ;;  %v3489_v63 = vpop.f32.mrb[60].mxu1 }
 0x834   : > { %3504 = vmatpush3.bf16.xpose.msra.mxu1 %v1886_v61  ;;  %v1788_v0 = vadd.f32 %v3489_v63, %v3099_v50  ;;  %v1779_v62 = vpop.f32.mrb[61].mxu1 }
 0x835   : > { %3666 = vmatprep.subr.msk.bf16.mxu1 %vm704_vm1, %v1870_v59  ;;  %v1780_v2 = vadd.f32 %v3099_v50, %v1779_v62  ;;  %v3490_v56 = vpop.f32.mrb[62].mxu1 }
 0x836   : > { %v1791_v1 = vadd.f32 %v3490_v56, %v3099_v50  ;;  %v1782_v3 = vpop.f32.mrb[63].mxu1 }
 0x837   : > { %v1783_v4 = vadd.f32 %v3099_v50, %v1782_v3 }
 0x838   : > { %v1872_v5 = vpack.c.bf16 %v1791_v1, %v1788_v0 }
 0x839   : > { %v1871_v6 = vpack.c.bf16 %v1783_v4, %v1780_v2 }
 0x83a   : > { %v1895_v9 = vsel %vm704_vm1, %v1872_v5, 0 }
 0x83b   : > { %v1892_v8 = vsel %vm704_vm1, %v1871_v6, 0 }
 0x83c   : > { %3506 = vmatpush3.bf16.xpose.msra.mxu1 %v1889_v7 }
 0x83d   : > { %3667 = vmatprep.subr.msk.bf16.mxu1 %vm704_vm1, %v1871_v6 }
 0x844   : > { %3508 = vmatpush3.bf16.xpose.msra.mxu1 %v1892_v8 }
 0x845   : > { %3668 = vmatprep.subr.msk.bf16.mxu1 %vm704_vm1, %v1872_v5 }
 0x84c   : > { %3510 = vmatpush3.bf16.xpose.msra.mxu1 %v1895_v9 }
 0x853   : > { %3512 = vmatmul.mubr.msk.bf16.vlgmr.msra.gmra.mrb[64].mxu1 %vm704_vm1, %v1866_v37 }
 0x854   : > { %3515 = vmatprep.mubr.msk.bf16.mxu1 %vm704_vm1, %v1867_v48 }
 0x85b   : > { %3516 = vmatmul.mubr.msk.bf16.gmra.mrb[68].mxu1 %vm704_vm1, %v1868_v47  ;;  %v4293_v47 = vld [vmem:[%s4547_s3 + $0xa] ss:$0 sm:$0xff] }
 0x85c   : > { %3549 = vmatprep.mubr.msk.bf16.mxu1 %vm464_vm0, %v3937_v14 }
 0x8f5   : > { %v3497_v48 = vpop.f32.mrb[40].mxu0 }
 0x8f6   : > { %v1843_v49 = vadd.f32 %v3497_v48, %v4293_v47  ;;  %v1834_v50 = vpop.f32.mrb[41].mxu0 }
 0x8f7   : > { %v1835_v51 = vadd.f32 %v4293_v47, %v1834_v50  ;;  %v3498_v52 = vpop.f32.mrb[42].mxu0 }
 0x8f8   : > { %v1846_v53 = vadd.f32 %v3498_v52, %v4293_v47  ;;  %v1837_v54 = vpop.f32.mrb[43].mxu0  ;;  %v437_v52 = vld [vmem:[%s4548_s4 + $0x10] sm:$0xff] }
 0x8f9   : > { %v1838_v55 = vadd.f32 %v4293_v47, %v1837_v54 }
 0x8fa   : > { %v2063_v57 = vpack.c.bf16 %v1846_v53, %v1843_v49  ;;  %v441_v53 = vpack.c.bf16 %v437_v52, %v437_v52 }
 0x8fb   : > { %v2062_v58 = vpack.c.bf16 %v1838_v55, %v1835_v51 }
 0x8fd   : > { %v3501_v59 = vpop.f32.mrb[44].mxu0  ;;  %3519 = vmatprep.subr.bf16.mxu0 %v2062_v58 }
 0x8fe   : > { %v1850_v60 = vpop.f32.mrb[45].mxu0  ;;  %3520 = vmatpush3.bf16.msra.mxu0 %v2062_v58 }
 0x8ff   : > { %3521 = vmatprep.subr.bf16.mxu0 %v2063_v57 }
 0x902   : > { %3522 = vmatpush3.bf16.msra.mxu0 %v2063_v57 }
 0x926   : > { %v3513_v14 = vpop.f32.mrb[64].mxu1 }
 0x927   : > { %v1931_v20 = vpop.f32.mrb[65].mxu1  ;;  %v1964_v25 = vmul.f32 0.35355338, %v3513_v14 }
 0x928   : > { %v1962_v21 = vmul.f32 0.35355338, %v1931_v20  ;;  %v3514_v22 = vpop.f32.mrb[66].mxu1 }
 0x929   : > { %v1934_v24 = vpop.f32.mrb[67].mxu1  ;;  %v1965_v29 = vmul.f32 0.35355338, %v3514_v22  ;;  %v1976_v33 = vsel %vm802_vm2, %v1964_v25, -inf }
 0x92a   : > { %v1963_v27 = vmul.f32 0.35355338, %v1934_v24  ;;  %v1970_v28 = vsel %vm802_vm2, %v1962_v21, -inf }
 0x92b   : > { %1971 = vmax.xlane.f32.xlu0 %v1970_v28  ;;  %v1979_v38 = vsel %vm802_vm2, %v1965_v29, -inf }
 0x92c   : > { %v1973_v30 = vsel %vm802_vm2, %v1963_v27, -inf }
 0x92d   : > { %1974 = vmax.xlane.f32.xlu1 %v1973_v30 }
 0x92e   : > { %v3517_v17 = vpop.f32.mrb[68].mxu1 }
 0x92f   : > { %1977 = vmax.xlane.f32.xlu0 %v1976_v33  ;;  %v1947_v34 = vpop.f32.mrb[69].mxu1  ;;  %v1968_v40 = vmul.f32 0.35355338, %v3517_v17 }
 0x930   : > { %v1966_v36 = vmul.f32 0.35355338, %v1947_v34  ;;  %v3518_v37 = vpop.f32.mrb[70].mxu1 }
 0x931   : > { %1980 = vmax.xlane.f32.xlu1 %v1979_v38  ;;  %v1950_v39 = vpop.f32.mrb[71].mxu1  ;;  %v1969_v43 = vmul.f32 0.35355338, %v3518_v37  ;;  %v1988_v45 = vsel %vm802_vm2, %v1968_v40, -inf }
 0x932   : > { %v1967_v41 = vmul.f32 0.35355338, %v1950_v39  ;;  %v1982_v42 = vsel %vm802_vm2, %v1966_v36, -inf }
 0x933   : > { %1983 = vmax.xlane.f32.xlu0 %v1982_v42  ;;  %v1991_v46 = vsel %vm802_vm2, %v1969_v43, -inf  ;;  %v1859_v42 = vadd.f32 %v3501_v59, %v4293_v47 }
 0x934   : > { %v1985_v44 = vsel %vm802_vm2, %v1967_v41, -inf }
 0x935   : > { %1986 = vmax.xlane.f32.xlu1 %v1985_v44  ;;  %v1851_v44 = vadd.f32 %v4293_v47, %v1850_v60 }
 0x937   : > { %1989 = vmax.xlane.f32.xlu0 %v1988_v45  ;;  %v3502_v45 = vpop.f32.mrb[46].mxu0 }
 0x938   : > { %v1853_v48 = vpop.f32.mrb[47].mxu0 }
 0x939   : > { %1992 = vmax.xlane.f32.xlu1 %v1991_v46  ;;  %v1862_v46 = vadd.f32 %v3502_v45, %v4293_v47  ;;  %v1854_v49 = vadd.f32 %v4293_v47, %v1853_v48  ;;  %v3121_v48 = vld [vmem:[%s4547_s3 + $0x3] ss:$0 sm:$0xff] }
 0x93b   : > { %v2065_v50 = vpack.c.bf16 %v1862_v46, %v1859_v42  ;;  %v2064_v51 = vpack.c.bf16 %v1854_v49, %v1851_v44 }
 0x93d   : > { %3523 = vmatprep.subr.bf16.mxu0 %v2064_v51 }
 0x93e   : > { %3524 = vmatpush3.bf16.msra.mxu0 %v2064_v51 }
 0x93f   : > { %3525 = vmatprep.subr.bf16.mxu0 %v2065_v50 }
 0x942   : > { %3526 = vmatpush3.bf16.msra.mxu0 %v2065_v50 }
 0x943   : > { %3669 = vmatprep.subr.msk.bf16.mxu0 %vm992_vm3, %v441_v53 }
 0x9b8   : > { %v1972_v61 = vpop.xlane.xlu0 %1971 }
 0x9b9   : > { %v1994_v63 = vsub.f32 %v1962_v21, %v1972_v61 }
 0x9ba   : > { %v1975_v0 = vpop.xlane.xlu1 %1974 }
 0x9bb   : > { %v2002_v62 = vmul.f32 1.442695, %v1994_v63  ;;  %v1995_v2 = vsub.f32 %v1963_v27, %v1975_v0 }
 0x9bc   : > { %v1978_v56 = vpop.xlane.xlu0 %1977 }
 0x9bd   : > { %3747 = vpow2.f32 %v2002_v62  ;;  %v2004_v1 = vmul.f32 1.442695, %v1995_v2  ;;  %v1996_v3 = vsub.f32 %v1964_v25, %v1978_v56 }
 0x9be   : > { %v1981_v4 = vpop.xlane.xlu1 %1980 }
 0x9bf   : > { %3749 = vpow2.f32 %v2004_v1  ;;  %v2006_v5 = vmul.f32 1.442695, %v1996_v3  ;;  %v1997_v6 = vsub.f32 %v1965_v29, %v1981_v4 }
 0x9c0   : > { %v1984_v7 = vpop.xlane.xlu0 %1983 }
 0x9c1   : > { %3751 = vpow2.f32 %v2006_v5  ;;  %v2008_v8 = vmul.f32 1.442695, %v1997_v6  ;;  %v1998_v9 = vsub.f32 %v1966_v36, %v1984_v7 }
 0x9c2   : > { %v1987_v10 = vpop.xlane.xlu1 %1986 }
 0x9c3   : > { %3753 = vpow2.f32 %v2008_v8  ;;  %v2010_v11 = vmul.f32 1.442695, %v1998_v9  ;;  %v1999_v12 = vsub.f32 %v1967_v41, %v1987_v10  ;;  %v2160_v8 = vsel %vm992_vm3, %v441_v53, 0 }
 0x9c4   : > { %v1990_v13 = vpop.xlane.xlu0 %1989 }
 0x9c5   : > { %3755 = vpow2.f32 %v2010_v11  ;;  %v2012_v15 = vmul.f32 1.442695, %v1999_v12  ;;  %v2000_v16 = vsub.f32 %v1968_v40, %v1990_v13 }
 0x9c6   : > { %v1993_v14 = vpop.xlane.xlu1 %1992 }
 0x9c7   : > { %v3748_v20 = vpop.eup %3747  ;;  %3757 = vpow2.f32 %v2012_v15  ;;  %v2014_v21 = vmul.f32 1.442695, %v2000_v16  ;;  %v2001_v22 = vsub.f32 %v1969_v43, %v1993_v14 }
 0x9c8   : > { %v2018_v24 = vsel %vm802_vm2, %v3748_v20, 0.0 }
 0x9c9   : > { %v3750_v25 = vpop.eup %3749  ;;  %3759 = vpow2.f32 %v2014_v21  ;;  %v2016_v27 = vmul.f32 1.442695, %v2001_v22  ;;  %2019 = vadd.xlane.f32.xlu0 %v2018_v24  ;;  %v379_v21 = vld [vmem:[%s4546_s2 + $0xe0] sm:$0xff]  ;;  %v380_v22 = vld [vmem:[%s4546_s2 + $0xe8] sm:$0xff] }
 0x9ca   : > { %v2021_v28 = vsel %vm802_vm2, %v3750_v25, 0.0  ;;  %v413_v24 = vpack.c.bf16 %v380_v22, %v379_v21 }
 0x9cb   : > { %v3752_v29 = vpop.eup %3751  ;;  %3761 = vpow2.f32 %v2016_v27  ;;  %2022 = vadd.xlane.f32.xlu1 %v2021_v28  ;;  %v364_v27 = vld [vmem:[%s4546_s2 + $0x68] sm:$0xff]  ;;  %v365_v28 = vld [vmem:[%s4546_s2 + $0x70] sm:$0xff] }
 0x9cc   : > { %v2024_v30 = vsel %vm802_vm2, %v3752_v29, 0.0 }
 0x9cd   : > { %v3754_v17 = vpop.eup %3753  ;;  %2025 = vadd.xlane.f32.xlu0 %v2024_v30  ;;  %v366_v30 = vld [vmem:[%s4546_s2 + $0x78] sm:$0xff] }
 0x9ce   : > { %v2027_v33 = vsel %vm802_vm2, %v3754_v17, 0.0 }
 0x9cf   : > { %v3756_v34 = vpop.eup %3755  ;;  %2028 = vadd.xlane.f32.xlu1 %v2027_v33 }
 0x9d0   : > { %v2030_v36 = vsel %vm802_vm2, %v3756_v34, 0.0 }
 0x9d1   : > { %v3758_v37 = vpop.eup %3757  ;;  %2031 = vadd.xlane.f32.xlu0 %v2030_v36 }
 0x9d2   : > { %v2033_v38 = vsel %vm802_vm2, %v3758_v37, 0.0 }
 0x9d3   : > { %v3760_v39 = vpop.eup %3759  ;;  %2034 = vadd.xlane.f32.xlu1 %v2033_v38 }
 0x9d4   : > { %v2036_v40 = vsel %vm802_vm2, %v3760_v39, 0.0 }
 0x9d5   : > { %v3762_v41 = vpop.eup %3761  ;;  %2037 = vadd.xlane.f32.xlu0 %v2036_v40 }
 0x9d6   : > { %v2039_v43 = vsel %vm802_vm2, %v3762_v41, 0.0 }
 0x9d7   : > { %2040 = vadd.xlane.f32.xlu1 %v2039_v43 }
 0xa56   : > { %v2020_v54 = vpop.xlane.xlu0 %2019 }
 0xa57   : > { %3763 = vrcp.f32 %v2020_v54 }
 0xa58   : > { %v2023_v55 = vpop.xlane.xlu1 %2022 }
 0xa59   : > { %3765 = vrcp.f32 %v2023_v55 }
 0xa5a   : > { %v2026_v57 = vpop.xlane.xlu0 %2025 }
 0xa5b   : > { %3767 = vrcp.f32 %v2026_v57 }
 0xa5c   : > { %v2029_v47 = vpop.xlane.xlu1 %2028 }
 0xa5d   : > { %3769 = vrcp.f32 %v2029_v47 }
 0xa5e   : > { %v2032_v58 = vpop.xlane.xlu0 %2031 }
 0xa5f   : > { %3771 = vrcp.f32 %v2032_v58 }
 0xa60   : > { %v2035_v59 = vpop.xlane.xlu1 %2034 }
 0xa61   : > { %v3764_v60 = vpop.eup %3763  ;;  %3773 = vrcp.f32 %v2035_v59 }
 0xa62   : > { %v2038_v61 = vpop.xlane.xlu0 %2037  ;;  %v2050_v62 = vmul.f32 %v3764_v60, %v3748_v20 }
 0xa63   : > { %v3766_v63 = vpop.eup %3765  ;;  %3775 = vrcp.f32 %v2038_v61 }
 0xa64   : > { %v2041_v0 = vpop.xlane.xlu1 %2040  ;;  %v2051_v2 = vmul.f32 %v3766_v63, %v3750_v25  ;;  %v363_v25 = vld [vmem:[%s4546_s2 + $0x60] sm:$0xff] }
 0xa65   : > { %v3768_v56 = vpop.eup %3767  ;;  %3777 = vrcp.f32 %v2041_v0 }
 0xa66   : > { %v2058_v1 = vpack.c.bf16 %v2051_v2, %v2050_v62  ;;  %v2052_v4 = vmul.f32 %v3768_v56, %v3752_v29  ;;  %v405_v29 = vpack.c.bf16 %v364_v27, %v363_v25 }
 0xa67   : > { %v3770_v3 = vpop.eup %3769 }
 0xa68   : > { %v2053_v5 = vmul.f32 %v3770_v3, %v3754_v17  ;;  %3527 = vmatprep.mubr.msk.bf16.mxu0 %vm802_vm2, %v2058_v1  ;;  %v406_v17 = vpack.c.bf16 %v366_v30, %v365_v28  ;;  %3545 = vmatprep.subr.bf16.mxu1 %v405_v29  ;;  %v3126_v3 = vld [vmem:[%s4547_s3 + $0x7] ss:$0 sm:$0xff] }
 0xa69   : > { %v3772_v6 = vpop.eup %3771  ;;  %3546 = vmatpush3.bf16.msra.mxu1 %v405_v29 }
 0xa6a   : > { %v2059_v7 = vpack.c.bf16 %v2053_v5, %v2052_v4  ;;  %v2054_v10 = vmul.f32 %v3772_v6, %v3756_v34  ;;  %3547 = vmatprep.subr.bf16.mxu1 %v406_v17 }
 0xa6b   : > { %v3774_v9 = vpop.eup %3773 }
 0xa6c   : > { %3528 = vmatmul.mubr.msk.bf16.vlgmr.msra.gmra.mrb[48].mxu0 %vm802_vm2, %v2059_v7  ;;  %v2055_v11 = vmul.f32 %v3774_v9, %v3758_v37  ;;  %v381_v37 = vld [vmem:[%s4546_s2 + $0xf0] sm:$0xff] }
 0xa6d   : > { %v3776_v12 = vpop.eup %3775  ;;  %3536 = vmatpush3.bf16.msra.mxu0 %v2160_v8  ;;  %3548 = vmatpush3.bf16.msra.mxu1 %v406_v17 }
 0xa6e   : > { %v2060_v13 = vpack.c.bf16 %v2055_v11, %v2054_v10  ;;  %v2056_v16 = vmul.f32 %v3776_v12, %v3760_v39  ;;  %3557 = vmatprep.subr.bf16.mxu0 %v413_v24 }
 0xa6f   : > { %v3778_v15 = vpop.eup %3777 }
 0xa70   : > { %3531 = vmatprep.mubr.msk.bf16.mxu0 %vm802_vm2, %v2060_v13  ;;  %v2057_v14 = vmul.f32 %v3778_v15, %v3762_v41  ;;  %3550 = vmatmul.mubr.msk.bf16.vlgmr.msra.gmra.mrb[72].mxu1 %vm464_vm0, %v3942_v18  ;;  %v382_v18 = vld [vmem:[%s4546_s2 + $0xf8] sm:$0xff] }
 0xa71   : > { %3553 = vmatprep.mubr.msk.bf16.mxu1 %vm464_vm0, %v3944_v19  ;;  %v414_v40 = vpack.c.bf16 %v382_v18, %v381_v37  ;;  %v398_v18 = vld [vmem:[%s4546_s2 + $0x178] sm:$0xff] }
 0xa72   : > { %v2061_v20 = vpack.c.bf16 %v2057_v14, %v2056_v16 }
 0xa74   : > { %3532 = vmatmul.mubr.msk.bf16.gmra.mrb[52].mxu0 %vm802_vm2, %v2061_v20 }
 0xa78   : > { %3554 = vmatmul.mubr.msk.bf16.gmra.mrb[76].mxu1 %vm464_vm0, %v3960_v26 }
 0xa79   : > { %3573 = vmatprep.mubr.msk.bf16.mxu1 %vm464_vm0, %v3952_v23 }
 0xb3f   : > { %v3529_v33 = vpop.f32.mrb[48].mxu0 }
 0xb40   : > { %v2112_v34 = vpop.f32.mrb[49].mxu0 }
 0xb41   : > { %v3530_v36 = vpop.f32.mrb[50].mxu0 }
 0xb42   : > { %v2144_v38 = vpack.c.bf16 %v3530_v36, %v3529_v33  ;;  %v2115_v39 = vpop.f32.mrb[51].mxu0  ;;  %v395_v33 = vld [vmem:[%s4546_s2 + $0x160] sm:$0xff]  ;;  %v397_v36 = vld [vmem:[%s4546_s2 + $0x170] sm:$0xff] }
 0xb43   : > { %v2143_v19 = vpack.c.bf16 %v2115_v39, %v2112_v34  ;;  %v3551_v46 = vpop.f32.mrb[72].mxu1  ;;  %v396_v34 = vld [vmem:[%s4546_s2 + $0x168] sm:$0xff] }
 0xb44   : > { %v2284_v49 = vadd.f32 %v3551_v46, %v3121_v48  ;;  %v2275_v50 = vpop.f32.mrb[73].mxu1  ;;  %v421_v37 = vpack.c.bf16 %v396_v34, %v395_v33 }
 0xb45   : > { %3537 = vmatprep.mubr.msk.bf16.mxu0 %vm704_vm1, %v2143_v19  ;;  %v2276_v51 = vadd.f32 %v3121_v48, %v2275_v50  ;;  %v3552_v52 = vpop.f32.mrb[74].mxu1 }
 0xb46   : > { %3538 = vmatmul.mubr.msk.bf16.vlgmr.msra.gmra.mrb[16].mxu0 %vm704_vm1, %v2144_v38  ;;  %v2287_v53 = vadd.f32 %v3552_v52, %v3121_v48  ;;  %v422_v38 = vpack.c.bf16 %v398_v18, %v397_v36  ;;  %3569 = vmatprep.subr.bf16.mxu1 %v421_v37 }
 0xb47   : > { %v3533_v26 = vpop.f32.mrb[52].mxu0  ;;  %3558 = vmatpush3.bf16.msra.mxu0 %v413_v24  ;;  %3570 = vmatpush3.bf16.msra.mxu1 %v421_v37 }
 0xb48   : > { %v2128_v41 = vpop.f32.mrb[53].mxu0  ;;  %3559 = vmatprep.subr.bf16.mxu0 %v414_v40  ;;  %v2449_v55 = vpack.c.bf16 %v2287_v53, %v2284_v49  ;;  %3571 = vmatprep.subr.bf16.mxu1 %v422_v38 }
 0xb49   : > { %v3534_v42 = vpop.f32.mrb[54].mxu0 }
 0xb4a   : > { %v2146_v43 = vpack.c.bf16 %v3534_v42, %v3533_v26  ;;  %v2131_v44 = vpop.f32.mrb[55].mxu0 }
 0xb4b   : > { %v2145_v45 = vpack.c.bf16 %v2131_v44, %v2128_v41  ;;  %3560 = vmatpush3.bf16.msra.mxu0 %v414_v40  ;;  %3572 = vmatpush3.bf16.msra.mxu1 %v422_v38 }
 0xb4d   : > { %3541 = vmatprep.mubr.msk.bf16.mxu0 %vm704_vm1, %v2145_v45 }
 0xb4e   : > { %3542 = vmatmul.mubr.msk.bf16.gmra.mrb[20].mxu0 %vm704_vm1, %v2146_v43  ;;  %3574 = vmatmul.mubr.msk.bf16.vlgmr.msra.gmra.mrb[80].mxu1 %vm464_vm0, %v3970_v31 }
 0xb4f   : > { %3561 = vmatprep.mubr.msk.bf16.mxu0 %vm464_vm0, %v3952_v23  ;;  %v2278_v23 = vpop.f32.mrb[75].mxu1  ;;  %3577 = vmatprep.mubr.msk.bf16.mxu1 %vm464_vm0, %v3972_v32 }
 0xb50   : > { %v2279_v54 = vadd.f32 %v3121_v48, %v2278_v23  ;;  %v3555_v47 = vpop.f32.mrb[76].mxu1 }
 0xb51   : > { %v2300_v58 = vadd.f32 %v3555_v47, %v3121_v48  ;;  %v2291_v59 = vpop.f32.mrb[77].mxu1 }
 0xb52   : > { %v2448_v57 = vpack.c.bf16 %v2279_v54, %v2276_v51  ;;  %v2292_v60 = vadd.f32 %v3121_v48, %v2291_v59  ;;  %v3556_v61 = vpop.f32.mrb[78].mxu1 }
 0xb53   : > { %v2303_v63 = vadd.f32 %v3556_v61, %v3121_v48  ;;  %v2294_v0 = vpop.f32.mrb[79].mxu1 }
 0xb54   : > { %v2295_v62 = vadd.f32 %v3121_v48, %v2294_v0 }
 0xb55   : > { %v2451_v2 = vpack.c.bf16 %v2303_v63, %v2300_v58  ;;  %v4411_v58 = vld [vmem:[%s4547_s3 + $0xb] ss:$0 sm:$0xff] }
 0xb56   : > { %3562 = vmatmul.mubr.msk.bf16.vlgmr.msra.gmra.mrb[56].mxu0 %vm464_vm0, %v3970_v31  ;;  %v2450_v56 = vpack.c.bf16 %v2295_v62, %v2292_v60  ;;  %3578 = vmatmul.mubr.msk.bf16.gmra.mrb[84].mxu1 %vm464_vm0, %v3980_v35 }
 0xb57   : > { %3565 = vmatprep.mubr.msk.bf16.mxu0 %vm464_vm0, %v3972_v32 }
 0xb5e   : > { %3566 = vmatmul.mubr.msk.bf16.gmra.mrb[60].mxu0 %vm464_vm0, %v3980_v35 }
 0xb5f   : > { %3589 = vmatprep.mubr.msk.bf16.mxu0 %vm704_vm1, %v2448_v57 }
 0xc21   : > { %v3575_v59 = vpop.f32.mrb[80].mxu1 }
 0xc22   : > { %v2426_v60 = vadd.f32 %v3575_v59, %v4411_v58  ;;  %v2417_v61 = vpop.f32.mrb[81].mxu1 }
 0xc23   : > { %v2418_v63 = vadd.f32 %v4411_v58, %v2417_v61  ;;  %v3576_v0 = vpop.f32.mrb[82].mxu1 }
 0xc24   : > { %v2429_v62 = vadd.f32 %v3576_v0, %v4411_v58 }
 0xc29   : > { %v3563_v1 = vpop.f32.mrb[56].mxu0 }
 0xc2a   : > { %v2346_v4 = vpop.f32.mrb[57].mxu0  ;;  %v2355_v6 = vadd.f32 %v3563_v1, %v3126_v3  ;;  %v2646_v1 = vpack.c.bf16 %v2429_v62, %v2426_v60 }
 0xc2b   : > { %v3564_v5 = vpop.f32.mrb[58].mxu0  ;;  %v2347_v9 = vadd.f32 %v3126_v3, %v2346_v4 }
 0xc2c   : > { %v2358_v7 = vadd.f32 %v3564_v5, %v3126_v3  ;;  %v2349_v8 = vpop.f32.mrb[59].mxu0 }
 0xc2d   : > { %v2350_v10 = vadd.f32 %v3126_v3, %v2349_v8 }
 0xc2e   : > { %v2453_v11 = vpack.c.bf16 %v2358_v7, %v2355_v6 }
 0xc2f   : > { %v2452_v12 = vpack.c.bf16 %v2350_v10, %v2347_v9 }
 0xc30   : > { %v2472_v29 = vsel %vm704_vm1, %v2453_v11, 0 }
 0xc31   : > { %3670 = vmatprep.subr.msk.bf16.mxu0 %vm704_vm1, %v2452_v12  ;;  %v2469_v13 = vsel %vm704_vm1, %v2452_v12, 0  ;;  %v3567_v15 = vpop.f32.mrb[60].mxu0 }
 0xc32   : > { %3582 = vmatpush3.bf16.xpose.msra.mxu0 %v2469_v13  ;;  %v2371_v16 = vadd.f32 %v3567_v15, %v3126_v3  ;;  %v2362_v14 = vpop.f32.mrb[61].mxu0 }
 0xc33   : > { %3671 = vmatprep.subr.msk.bf16.mxu0 %vm704_vm1, %v2453_v11  ;;  %v2363_v20 = vadd.f32 %v3126_v3, %v2362_v14  ;;  %v3568_v21 = vpop.f32.mrb[62].mxu0 }
 0xc34   : > { %v2374_v22 = vadd.f32 %v3568_v21, %v3126_v3  ;;  %v2365_v24 = vpop.f32.mrb[63].mxu0 }
 0xc35   : > { %v2366_v25 = vadd.f32 %v3126_v3, %v2365_v24 }
 0xc36   : > { %v2455_v27 = vpack.c.bf16 %v2374_v22, %v2371_v16 }
 0xc37   : > { %v2454_v28 = vpack.c.bf16 %v2366_v25, %v2363_v20 }
 0xc38   : > { %v2478_v17 = vsel %vm704_vm1, %v2455_v27, 0 }
 0xc39   : > { %v2475_v30 = vsel %vm704_vm1, %v2454_v28, 0 }
 0xc3a   : > { %3584 = vmatpush3.bf16.xpose.msra.mxu0 %v2472_v29 }
 0xc3b   : > { %3672 = vmatprep.subr.msk.bf16.mxu0 %vm704_vm1, %v2454_v28 }
 0xc42   : > { %3586 = vmatpush3.bf16.xpose.msra.mxu0 %v2475_v30 }
 0xc43   : > { %3673 = vmatprep.subr.msk.bf16.mxu0 %vm704_vm1, %v2455_v27 }
 0xc4a   : > { %3588 = vmatpush3.bf16.xpose.msra.mxu0 %v2478_v17 }
 0xc51   : > { %3590 = vmatmul.mubr.msk.bf16.vlgmr.msra.gmra.mrb[64].mxu0 %vm704_vm1, %v2449_v55 }
 0xc52   : > { %3593 = vmatprep.mubr.msk.bf16.mxu0 %vm704_vm1, %v2450_v56 }
 0xc59   : > { %3594 = vmatmul.mubr.msk.bf16.gmra.mrb[68].mxu0 %vm704_vm1, %v2451_v2  ;;  %v2420_v2 = vpop.f32.mrb[83].mxu1 }
 0xc5a   : > { %v2421_v56 = vadd.f32 %v4411_v58, %v2420_v2  ;;  %v3579_v4 = vpop.f32.mrb[84].mxu1 }
 0xc5b   : > { %v2442_v5 = vadd.f32 %v3579_v4, %v4411_v58  ;;  %v2433_v6 = vpop.f32.mrb[85].mxu1 }
 0xc5c   : > { %v2645_v3 = vpack.c.bf16 %v2421_v56, %v2418_v63  ;;  %v3580_v7 = vpop.f32.mrb[86].mxu1 }
 0xc5d   : > { %v2445_v8 = vadd.f32 %v3580_v7, %v4411_v58 }
 0xc5e   : > { %3597 = vmatprep.subr.bf16.mxu1 %v2645_v3 }
 0xc5f   : > { %3598 = vmatpush3.bf16.msra.mxu1 %v2645_v3  ;;  %v4419_v9 = vpack.c.bf16 %v2445_v8, %v2442_v5 }
 0xc60   : > { %3599 = vmatprep.subr.bf16.mxu1 %v2646_v1 }
 0xc63   : > { %3600 = vmatpush3.bf16.msra.mxu1 %v2646_v1 }
 0xd24   : > { %v3591_v39 = vpop.f32.mrb[64].mxu0 }
 0xd25   : > { %v2514_v19 = vpop.f32.mrb[65].mxu0  ;;  %v2547_v42 = vmul.f32 0.35355338, %v3591_v39 }
 0xd26   : > { %v2545_v40 = vmul.f32 0.35355338, %v2514_v19  ;;  %v3592_v26 = vpop.f32.mrb[66].mxu0 }
 0xd27   : > { %v2517_v41 = vpop.f32.mrb[67].mxu0  ;;  %v2548_v45 = vmul.f32 0.35355338, %v3592_v26  ;;  %v2559_v32 = vsel %vm802_vm2, %v2547_v42, -inf }
 0xd28   : > { %v2546_v43 = vmul.f32 0.35355338, %v2517_v41  ;;  %v2553_v44 = vsel %vm802_vm2, %v2545_v40, -inf }
 0xd29   : > { %2554 = vmax.xlane.f32.xlu0 %v2553_v44  ;;  %v2562_v50 = vsel %vm802_vm2, %v2548_v45, -inf }
 0xd2a   : > { %v2556_v46 = vsel %vm802_vm2, %v2546_v43, -inf }
 0xd2b   : > { %2557 = vmax.xlane.f32.xlu1 %v2556_v46 }
 0xd2c   : > { %v3595_v31 = vpop.f32.mrb[68].mxu0 }
 0xd2d   : > { %2560 = vmax.xlane.f32.xlu0 %v2559_v32  ;;  %v2530_v48 = vpop.f32.mrb[69].mxu0  ;;  %v2551_v52 = vmul.f32 0.35355338, %v3595_v31 }
 0xd2e   : > { %v2549_v35 = vmul.f32 0.35355338, %v2530_v48  ;;  %v3596_v49 = vpop.f32.mrb[70].mxu0 }
 0xd2f   : > { %2563 = vmax.xlane.f32.xlu1 %v2562_v50  ;;  %v2533_v51 = vpop.f32.mrb[71].mxu0  ;;  %v2552_v54 = vmul.f32 0.35355338, %v3596_v49  ;;  %v2571_v57 = vsel %vm802_vm2, %v2551_v52, -inf }
 0xd30   : > { %v2550_v53 = vmul.f32 0.35355338, %v2533_v51  ;;  %v2565_v23 = vsel %vm802_vm2, %v2549_v35, -inf }
 0xd31   : > { %2566 = vmax.xlane.f32.xlu0 %v2565_v23  ;;  %v2574_v47 = vsel %vm802_vm2, %v2552_v54, -inf }
 0xd32   : > { %v2568_v55 = vsel %vm802_vm2, %v2550_v53, -inf }
 0xd33   : > { %2569 = vmax.xlane.f32.xlu1 %v2568_v55  ;;  %v438_v55 = vld [vmem:[%s4548_s4 + $0x18] sm:$0xff] }
 0xd35   : > { %2572 = vmax.xlane.f32.xlu0 %v2571_v57  ;;  %v442_v57 = vpack.c.bf16 %v438_v55, %v438_v55 }
 0xd37   : > { %2575 = vmax.xlane.f32.xlu1 %v2574_v47  ;;  %3674 = vmatprep.subr.msk.bf16.mxu0 %vm992_vm3, %v442_v57  ;;  %v2743_v47 = vsel %vm992_vm3, %v442_v57, 0  ;;  %v3832_v57 = vld [vmem:[%s3920_s22 + $0x30] sm:$0xff] }
 0xd38   : > { %3614 = vmatpush3.bf16.msra.mxu0 %v2743_v47 }
 0xdb6   : > { %v2555_v10 = vpop.xlane.xlu0 %2554 }
 0xdb7   : > { %v2577_v11 = vsub.f32 %v2545_v40, %v2555_v10 }
 0xdb8   : > { %v2558_v12 = vpop.xlane.xlu1 %2557 }
 0xdb9   : > { %v2585_v13 = vmul.f32 1.442695, %v2577_v11  ;;  %v2578_v15 = vsub.f32 %v2546_v43, %v2558_v12 }
 0xdba   : > { %v2561_v16 = vpop.xlane.xlu0 %2560 }
 0xdbb   : > { %3779 = vpow2.f32 %v2585_v13  ;;  %v2587_v14 = vmul.f32 1.442695, %v2578_v15  ;;  %v2579_v20 = vsub.f32 %v2547_v42, %v2561_v16 }
 0xdbc   : > { %v2564_v21 = vpop.xlane.xlu1 %2563 }
 0xdbd   : > { %3781 = vpow2.f32 %v2587_v14  ;;  %v2589_v22 = vmul.f32 1.442695, %v2579_v20  ;;  %v2580_v24 = vsub.f32 %v2548_v45, %v2564_v21 }
 0xdbe   : > { %v2567_v25 = vpop.xlane.xlu0 %2566 }
 0xdbf   : > { %3783 = vpow2.f32 %v2589_v22  ;;  %v2591_v27 = vmul.f32 1.442695, %v2580_v24  ;;  %v2581_v28 = vsub.f32 %v2549_v35, %v2567_v25 }
 0xdc0   : > { %v2570_v29 = vpop.xlane.xlu1 %2569 }
 0xdc1   : > { %3785 = vpow2.f32 %v2591_v27  ;;  %v2593_v30 = vmul.f32 1.442695, %v2581_v28  ;;  %v2582_v17 = vsub.f32 %v2550_v53, %v2570_v29  ;;  %v2436_v53 = vpop.f32.mrb[87].mxu1 }
 0xdc2   : > { %v2573_v33 = vpop.xlane.xlu0 %2572  ;;  %v2437_v23 = vadd.f32 %v4411_v58, %v2436_v53 }
 0xdc3   : > { %3787 = vpow2.f32 %v2593_v30  ;;  %v2595_v34 = vmul.f32 1.442695, %v2582_v17  ;;  %v2583_v36 = vsub.f32 %v2551_v52, %v2573_v33  ;;  %v2434_v52 = vadd.f32 %v4411_v58, %v2433_v6 }
 0xdc4   : > { %v2576_v37 = vpop.xlane.xlu1 %2575 }
 0xdc5   : > { %v3780_v18 = vpop.eup %3779  ;;  %3789 = vpow2.f32 %v2595_v34  ;;  %v2597_v38 = vmul.f32 1.442695, %v2583_v36  ;;  %v2584_v39 = vsub.f32 %v2552_v54, %v2576_v37  ;;  %v2647_v54 = vpack.c.bf16 %v2437_v23, %v2434_v52  ;;  %v3831_v23 = vld [vmem:[%s3920_s22 + $0x20] sm:$0xff] }
 0xdc6   : > { %v2601_v19 = vsel %vm802_vm2, %v3780_v18, 0.0 }
 0xdc7   : > { %v3782_v40 = vpop.eup %3781  ;;  %3791 = vpow2.f32 %v2597_v38  ;;  %v2599_v26 = vmul.f32 1.442695, %v2584_v39  ;;  %2602 = vadd.xlane.f32.xlu0 %v2601_v19  ;;  %3601 = vmatprep.subr.bf16.mxu1 %v2647_v54  ;;  %v3039_v39 = vld [vmem:[%s4549_s5] ss:$0 sm:$0xff]  ;;  %v3827_v19 = vld [vmem:[%s3920_s22 + $0x10] sm:$0xff] }
 0xdc8   : > { %v2604_v41 = vsel %vm802_vm2, %v3782_v40, 0.0  ;;  %3602 = vmatpush3.bf16.msra.mxu1 %v2647_v54  ;;  %v454_v54 = vadd.f32 %v3831_v23, %v3039_v39  ;;  %v456_v47 = vadd.f32 %v3832_v57, %v3039_v39 }
 0xdc9   : > { %v3784_v42 = vpop.eup %3783  ;;  %3793 = vpow2.f32 %v2599_v26  ;;  %2605 = vadd.xlane.f32.xlu1 %v2604_v41  ;;  %3603 = vmatprep.subr.bf16.mxu1 %v4419_v9  ;;  %v3828_v26 = vld [vmem:[%s3920_s22] sm:$0xff] }
 0xdca   : > { %v2607_v43 = vsel %vm802_vm2, %v3784_v42, 0.0  ;;  %v450_v41 = vadd.f32 %v3828_v26, %v3039_v39 }
 0xdcb   : > { %v3786_v44 = vpop.eup %3785  ;;  %2608 = vadd.xlane.f32.xlu0 %v2607_v43 }
 0xdcc   : > { %v2610_v45 = vsel %vm802_vm2, %v3786_v44, 0.0  ;;  %3604 = vmatpush3.bf16.msra.mxu1 %v4419_v9 }
 0xdcd   : > { %v3788_v46 = vpop.eup %3787  ;;  %2611 = vadd.xlane.f32.xlu1 %v2610_v45 }
 0xdce   : > { %v2613_v31 = vsel %vm802_vm2, %v3788_v46, 0.0 }
 0xdcf   : > { %v3790_v32 = vpop.eup %3789  ;;  %2614 = vadd.xlane.f32.xlu0 %v2613_v31  ;;  %v3830_v31 = vld [vmem:[%s3920_s22 + $0x8] sm:$0xff] }
 0xdd0   : > { %v2616_v48 = vsel %vm802_vm2, %v3790_v32, 0.0 }
 0xdd1   : > { %v3792_v35 = vpop.eup %3791  ;;  %2617 = vadd.xlane.f32.xlu1 %v2616_v48 }
 0xdd2   : > { %v2619_v49 = vsel %vm802_vm2, %v3792_v35, 0.0 }
 0xdd3   : > { %v3794_v50 = vpop.eup %3793  ;;  %2620 = vadd.xlane.f32.xlu0 %v2619_v49 }
 0xdd4   : > { %v2622_v51 = vsel %vm802_vm2, %v3794_v50, 0.0 }
 0xdd5   : > { %2623 = vadd.xlane.f32.xlu1 %v2622_v51 }
 0xe54   : > { %v2603_v59 = vpop.xlane.xlu0 %2602 }
 0xe55   : > { %3795 = vrcp.f32 %v2603_v59 }
 0xe56   : > { %v2606_v58 = vpop.xlane.xlu1 %2605 }
 0xe57   : > { %3797 = vrcp.f32 %v2606_v58  ;;  %v3833_v58 = vld [vmem:[%s3920_s22 + $0x28] sm:$0xff] }
 0xe58   : > { %v2609_v60 = vpop.xlane.xlu0 %2608 }
 0xe59   : > { %3799 = vrcp.f32 %v2609_v60  ;;  %v455_v60 = vadd.f32 %v3833_v58, %v3039_v39 }
 0xe5a   : > { %v2612_v61 = vpop.xlane.xlu1 %2611 }
 0xe5b   : > { %3801 = vrcp.f32 %v2612_v61 }
 0xe5c   : > { %v2615_v63 = vpop.xlane.xlu0 %2614 }
 0xe5d   : > { %3803 = vrcp.f32 %v2615_v63 }
 0xe5e   : > { %v2618_v0 = vpop.xlane.xlu1 %2617 }
 0xe5f   : > { %v3796_v62 = vpop.eup %3795  ;;  %3805 = vrcp.f32 %v2618_v0 }
 0xe60   : > { %v2621_v2 = vpop.xlane.xlu0 %2620  ;;  %v2633_v3 = vmul.f32 %v3796_v62, %v3780_v18  ;;  %v3834_v62 = vld [vmem:[%s3920_s22 + $0x38] sm:$0xff] }
 0xe61   : > { %v3798_v56 = vpop.eup %3797  ;;  %3807 = vrcp.f32 %v2621_v2  ;;  %v457_v2 = vadd.f32 %v3834_v62, %v3039_v39 }
 0xe62   : > { %v2624_v1 = vpop.xlane.xlu1 %2623  ;;  %v2634_v4 = vmul.f32 %v3798_v56, %v3782_v40  ;;  %v452_v40 = vadd.f32 %v3827_v19, %v3039_v39 }
 0xe63   : > { %v3800_v5 = vpop.eup %3799  ;;  %3809 = vrcp.f32 %v2624_v1 }
 0xe64   : > { %v2641_v6 = vpack.c.bf16 %v2634_v4, %v2633_v3  ;;  %v2635_v8 = vmul.f32 %v3800_v5, %v3784_v42  ;;  %v3829_v42 = vld [vmem:[%s3920_s22 + $0x18] sm:$0xff] }
 0xe65   : > { %v3802_v7 = vpop.eup %3801  ;;  %v453_v43 = vadd.f32 %v3829_v42, %v3039_v39 }
 0xe66   : > { %v2636_v9 = vmul.f32 %v3802_v7, %v3786_v44  ;;  %3605 = vmatprep.mubr.msk.bf16.mxu1 %vm802_vm2, %v2641_v6 }
 0xe67   : > { %v3804_v10 = vpop.eup %3803 }
 0xe68   : > { %v2642_v11 = vpack.c.bf16 %v2636_v9, %v2635_v8  ;;  %v2637_v13 = vmul.f32 %v3804_v10, %v3788_v46 }
 0xe69   : > { %v3806_v12 = vpop.eup %3805 }
 0xe6a   : > { %3606 = vmatmul.mubr.msk.bf16.vlgmr.msra.gmra.mrb[88].mxu1 %vm802_vm2, %v2642_v11  ;;  %v2638_v15 = vmul.f32 %v3806_v12, %v3790_v32  ;;  %v451_v32 = vadd.f32 %v3830_v31, %v3039_v39 }
 0xe6b   : > { %v3808_v16 = vpop.eup %3807 }
 0xe6c   : > { %v2643_v14 = vpack.c.bf16 %v2638_v15, %v2637_v13  ;;  %v2639_v21 = vmul.f32 %v3808_v16, %v3792_v35 }
 0xe6d   : > { %v3810_v20 = vpop.eup %3809 }
 0xe6e   : > { %3609 = vmatprep.mubr.msk.bf16.mxu1 %vm802_vm2, %v2643_v14  ;;  %v2640_v22 = vmul.f32 %v3810_v20, %v3794_v50 }
 0xe70   : > { %v2644_v24 = vpack.c.bf16 %v2640_v22, %v2639_v21 }
 0xe72   : > { %3610 = vmatmul.mubr.msk.bf16.gmra.mrb[92].mxu1 %vm802_vm2, %v2644_v24 }
 0xf3d   : > { %v3607_v25 = vpop.f32.mrb[88].mxu1 }
 0xf3e   : > { %v2695_v27 = vpop.f32.mrb[89].mxu1 }
 0xf3f   : > { %v3608_v28 = vpop.f32.mrb[90].mxu1 }
 0xf40   : > { %v2727_v29 = vpack.c.bf16 %v3608_v28, %v3607_v25  ;;  %v2698_v30 = vpop.f32.mrb[91].mxu1 }
 0xf41   : > { %v2726_v17 = vpack.c.bf16 %v2698_v30, %v2695_v27 }
 0xf43   : > { %3615 = vmatprep.mubr.msk.bf16.mxu0 %vm704_vm1, %v2726_v17 }
 0xf44   : > { %3616 = vmatmul.mubr.msk.bf16.vlgmr.msra.gmra.mrb[16].mxu0 %vm704_vm1, %v2727_v29 }
 0xf45   : > { %v3611_v33 = vpop.f32.mrb[92].mxu1 }
 0xf46   : > { %v2711_v34 = vpop.f32.mrb[93].mxu1 }
 0xf47   : > { %v3612_v36 = vpop.f32.mrb[94].mxu1 }
 0xf48   : > { %v2729_v37 = vpack.c.bf16 %v3612_v36, %v3611_v33  ;;  %v2714_v18 = vpop.f32.mrb[95].mxu1 }
 0xf49   : > { %v2728_v38 = vpack.c.bf16 %v2714_v18, %v2711_v34 }
 0xf4b   : > { %3619 = vmatprep.mubr.msk.bf16.mxu0 %vm704_vm1, %v2728_v38 }
 0xf4c   : > { %3620 = vmatmul.mubr.msk.bf16.gmra.mrb[20].mxu0 %vm704_vm1, %v2729_v37 }
0x1017   : > { %v3617_v44 = vpop.f32.mrb[16].mxu0 }
0x1018   : > { %v3623_v45 = vadd.f32 %v3617_v44, %v452_v40  ;;  %v2779_v46 = vpop.f32.mrb[17].mxu0 }
0x1019   : > { %v3618_v48 = vpop.f32.mrb[18].mxu0  ;;  %v3624_v35 = vadd.f32 %v2779_v46, %v450_v41 }
0x101a   : > { %v3625_v49 = vadd.f32 %v3618_v48, %v453_v43  ;;  %v2782_v50 = vpop.f32.mrb[19].mxu0  ;;  %v2824_v51 = vsel %vm464_vm0, %v3623_v45, 0.0 }
0x101b   : > { %2825 = vadd.xlane.f32.xlu0 %v2824_v51  ;;  %v3626_v52 = vadd.f32 %v2782_v50, %v451_v32  ;;  %v2818_v55 = vsel %vm464_vm0, %v3624_v35, 0.0 }
0x101c   : > { %v2827_v53 = vsel %vm464_vm0, %v3625_v49, 0.0 }
0x101d   : > { %2828 = vadd.xlane.f32.xlu1 %v2827_v53  ;;  %v2821_v63 = vsel %vm464_vm0, %v3626_v52, 0.0 }
0x101f   : > { %2819 = vadd.xlane.f32.xlu0 %v2818_v55  ;;  %v3621_v59 = vpop.f32.mrb[20].mxu0 }
0x1020   : > { %v2795_v61 = vpop.f32.mrb[21].mxu0  ;;  %v3627_v3 = vadd.f32 %v3621_v59, %v456_v47 }
0x1021   : > { %v3628_v0 = vadd.f32 %v2795_v61, %v454_v54  ;;  %2822 = vadd.xlane.f32.xlu1 %v2821_v63  ;;  %v3622_v56 = vpop.f32.mrb[22].mxu0 }
0x1022   : > { %v2798_v1 = vpop.f32.mrb[23].mxu0  ;;  %v3629_v6 = vadd.f32 %v3622_v56, %v457_v2  ;;  %v2836_v8 = vsel %vm464_vm0, %v3627_v3, 0.0 }
0x1023   : > { %v3630_v4 = vadd.f32 %v2798_v1, %v455_v60  ;;  %v2830_v5 = vsel %vm464_vm0, %v3628_v0, 0.0 }
0x1024   : > { %2831 = vadd.xlane.f32.xlu0 %v2830_v5  ;;  %v2839_v9 = vsel %vm464_vm0, %v3629_v6, 0.0 }
0x1025   : > { %v2833_v7 = vsel %vm464_vm0, %v3630_v4, 0.0 }
0x1026   : > { %2834 = vadd.xlane.f32.xlu1 %v2833_v7  ;;  %v3148_v7 = vld [vmem:[%s4550_s6] ss:$0 sm:$0xff] }
0x1028   : > { %2837 = vadd.xlane.f32.xlu0 %v2836_v8 }
0x102a   : > { %2840 = vadd.xlane.f32.xlu1 %v2839_v9 }
0x10a8   : > { %v2826_v10 = vpop.xlane.xlu0 %2825 }
0x10a9   : > { %v2845_v11 = vmul.f32 0.03125, %v2826_v10 }
0x10aa   : > { %v2829_v12 = vpop.xlane.xlu1 %2828 }
0x10ab   : > { %v4465_v13 = vsub.f32 %v3623_v45, %v2845_v11  ;;  %v2846_v15 = vmul.f32 0.03125, %v2829_v12 }
0x10ac   : > { %v2820_v16 = vpop.xlane.xlu0 %2819 }
0x10ad   : > { %v4467_v14 = vsub.f32 %v3625_v49, %v2846_v15  ;;  %v2843_v20 = vmul.f32 0.03125, %v2820_v16  ;;  %v2861_v21 = vmul.f32 %v4465_v13, %v4465_v13  ;;  %v3149_v15 = vld [vmem:[%s4551_s7] ss:$0 sm:$0xff] }
0x10ae   : > { %v2823_v22 = vpop.xlane.xlu1 %2822 }
0x10af   : > { %v4471_v24 = vsub.f32 %v3624_v35, %v2843_v20  ;;  %v2844_v25 = vmul.f32 0.03125, %v2823_v22  ;;  %v2873_v27 = vsel %vm464_vm0, %v2861_v21, 0.0  ;;  %v2862_v28 = vmul.f32 %v4467_v14, %v4467_v14 }
0x10b0   : > { %2874 = vadd.xlane.f32.xlu0 %v2873_v27 }
0x10b1   : > { %v4476_v29 = vsub.f32 %v3626_v52, %v2844_v25  ;;  %v2832_v30 = vpop.xlane.xlu0 %2831  ;;  %v2876_v17 = vsel %vm464_vm0, %v2862_v28, 0.0  ;;  %v2859_v33 = vmul.f32 %v4471_v24, %v4471_v24 }
0x10b2   : > { %v2847_v34 = vmul.f32 0.03125, %v2832_v30  ;;  %2877 = vadd.xlane.f32.xlu1 %v2876_v17 }
0x10b3   : > { %v2835_v36 = vpop.xlane.xlu1 %2834  ;;  %v2867_v37 = vsel %vm464_vm0, %v2859_v33, 0.0  ;;  %v2860_v18 = vmul.f32 %v4476_v29, %v4476_v29 }
0x10b4   : > { %v4484_v38 = vsub.f32 %v3628_v0, %v2847_v34  ;;  %v2848_v39 = vmul.f32 0.03125, %v2835_v36  ;;  %2868 = vadd.xlane.f32.xlu0 %v2867_v37 }
0x10b5   : > { %v2838_v19 = vpop.xlane.xlu0 %2837  ;;  %v2870_v40 = vsel %vm464_vm0, %v2860_v18, 0.0 }
0x10b6   : > { %v4487_v26 = vsub.f32 %v3630_v4, %v2848_v39  ;;  %v2849_v41 = vmul.f32 0.03125, %v2838_v19  ;;  %2871 = vadd.xlane.f32.xlu1 %v2870_v40  ;;  %v2863_v42 = vmul.f32 %v4484_v38, %v4484_v38 }
0x10b7   : > { %v2841_v43 = vpop.xlane.xlu1 %2840 }
0x10b8   : > { %v4491_v44 = vsub.f32 %v3627_v3, %v2849_v41  ;;  %v2850_v45 = vmul.f32 0.03125, %v2841_v43  ;;  %v2879_v46 = vsel %vm464_vm0, %v2863_v42, 0.0  ;;  %v2864_v31 = vmul.f32 %v4487_v26, %v4487_v26 }
0x10b9   : > { %2880 = vadd.xlane.f32.xlu0 %v2879_v46 }
0x10ba   : > { %v4496_v32 = vsub.f32 %v3629_v6, %v2850_v45  ;;  %v2882_v48 = vsel %vm464_vm0, %v2864_v31, 0.0  ;;  %v2865_v35 = vmul.f32 %v4491_v44, %v4491_v44 }
0x10bb   : > { %2883 = vadd.xlane.f32.xlu1 %v2882_v48 }
0x10bc   : > { %v2885_v49 = vsel %vm464_vm0, %v2865_v35, 0.0  ;;  %v2866_v50 = vmul.f32 %v4496_v32, %v4496_v32 }
0x10bd   : > { %2886 = vadd.xlane.f32.xlu0 %v2885_v49 }
0x10be   : > { %v2888_v51 = vsel %vm464_vm0, %v2866_v50, 0.0 }
0x10bf   : > { %2889 = vadd.xlane.f32.xlu1 %v2888_v51 }
0x113d   : > { %v2875_v52 = vpop.xlane.xlu0 %2874 }
0x113e   : > { %v2893_v53 = vmul.f32 0.03125, %v2875_v52 }
0x113f   : > { %v2878_v23 = vpop.xlane.xlu1 %2877 }
0x1140   : > { %v2901_v54 = vadd.f32 1e-05, %v2893_v53  ;;  %v2894_v55 = vmul.f32 0.03125, %v2878_v23 }
0x1141   : > { %v2869_v57 = vpop.xlane.xlu0 %2868 }
0x1142   : > { %3811 = vrsqrt.f32 %v2901_v54  ;;  %v2902_v47 = vadd.f32 1e-05, %v2894_v55  ;;  %v2891_v59 = vmul.f32 0.03125, %v2869_v57 }
0x1143   : > { %v2872_v58 = vpop.xlane.xlu1 %2871 }
0x1144   : > { %3813 = vrsqrt.f32 %v2902_v47  ;;  %v2899_v60 = vadd.f32 1e-05, %v2891_v59  ;;  %v2892_v61 = vmul.f32 0.03125, %v2872_v58 }
0x1146   : > { %3815 = vrsqrt.f32 %v2899_v60  ;;  %v2900_v63 = vadd.f32 1e-05, %v2892_v61  ;;  %v2881_v0 = vpop.xlane.xlu0 %2880 }
0x1147   : > { %v2895_v62 = vmul.f32 0.03125, %v2881_v0 }
0x1148   : > { %3817 = vrsqrt.f32 %v2900_v63  ;;  %v2884_v2 = vpop.xlane.xlu1 %2883 }
0x1149   : > { %v2903_v56 = vadd.f32 1e-05, %v2895_v62  ;;  %v2896_v1 = vmul.f32 0.03125, %v2884_v2 }
0x114a   : > { %v2887_v3 = vpop.xlane.xlu0 %2886 }
0x114b   : > { %3819 = vrsqrt.f32 %v2903_v56  ;;  %v2904_v4 = vadd.f32 1e-05, %v2896_v1  ;;  %v2897_v5 = vmul.f32 0.03125, %v2887_v3 }
0x114c   : > { %v3812_v6 = vpop.eup %3811  ;;  %v2890_v8 = vpop.xlane.xlu1 %2889 }
0x114d   : > { %v2917_v9 = vmul.f32 %v3812_v6, %v4465_v13  ;;  %3821 = vrsqrt.f32 %v2904_v4  ;;  %v2905_v10 = vadd.f32 1e-05, %v2897_v5  ;;  %v2898_v11 = vmul.f32 0.03125, %v2890_v8 }
0x114e   : > { %v3814_v12 = vpop.eup %3813 }
0x114f   : > { %v2932_v16 = vmul.f32 %v3148_v7, %v2917_v9  ;;  %v2918_v20 = vmul.f32 %v3814_v12, %v4467_v14  ;;  %3823 = vrsqrt.f32 %v2905_v10  ;;  %v2906_v21 = vadd.f32 1e-05, %v2898_v11 }
0x1150   : > { %v3816_v22 = vpop.eup %3815 }
0x1151   : > { %v2947_v13 = vadd.f32 %v3149_v15, %v2932_v16  ;;  %v2933_v25 = vmul.f32 %v3148_v7, %v2918_v20  ;;  %v2915_v27 = vmul.f32 %v3816_v22, %v4471_v24  ;;  %3825 = vrsqrt.f32 %v2906_v21 }
0x1152   : > { %v3818_v28 = vpop.eup %3817 }
0x1153   : > { %2955 = vst.msk [vmem:[%s4517_s14 + $0x10] sm:$0xff] %vm464_vm0, %v2947_v13  ;;  %v2948_v14 = vadd.f32 %v3149_v15, %v2933_v25  ;;  %v2930_v30 = vmul.f32 %v3148_v7, %v2915_v27  ;;  %v2916_v17 = vmul.f32 %v3818_v28, %v4476_v29 }
0x1155   : > { %v3820_v33 = vpop.eup %3819  ;;  %2956 = vst.msk [vmem:[%s4517_s14 + $0x18] sm:$0xff] %vm464_vm0, %v2948_v14  ;;  %v2945_v34 = vadd.f32 %v3149_v15, %v2930_v30  ;;  %v2931_v36 = vmul.f32 %v3148_v7, %v2916_v17 }
0x1156   : > { %v2919_v37 = vmul.f32 %v3820_v33, %v4484_v38 }
0x1157   : > { %v3822_v18 = vpop.eup %3821  ;;  %2953 = vst.msk [vmem:[%s4517_s14] sm:$0xff] %vm464_vm0, %v2945_v34  ;;  %v2946_v24 = vadd.f32 %v3149_v15, %v2931_v36 }
0x1158   : > { %v2934_v39 = vmul.f32 %v3148_v7, %v2919_v37  ;;  %v2920_v19 = vmul.f32 %v3822_v18, %v4487_v26 }
0x1159   : > { %v3824_v40 = vpop.eup %3823  ;;  %2954 = vst.msk [vmem:[%s4517_s14 + $0x8] sm:$0xff] %vm464_vm0, %v2946_v24 }
0x115a   : > { %v2949_v29 = vadd.f32 %v3149_v15, %v2934_v39  ;;  %v2935_v41 = vmul.f32 %v3148_v7, %v2920_v19  ;;  %v2921_v42 = vmul.f32 %v3824_v40, %v4491_v44 }
0x115b   : > { %v3826_v43 = vpop.eup %3825 }
0x115c   : > { %2957 = vst.msk [vmem:[%s4517_s14 + $0x20] sm:$0xff] %vm464_vm0, %v2949_v29  ;;  %v2950_v38 = vadd.f32 %v3149_v15, %v2935_v41  ;;  %v2936_v45 = vmul.f32 %v3148_v7, %v2921_v42  ;;  %v2922_v46 = vmul.f32 %v3826_v43, %v4496_v32 }
0x115e   : > { %2958 = vst.msk [vmem:[%s4517_s14 + $0x28] sm:$0xff] %vm464_vm0, %v2950_v38  ;;  %v2951_v31 = vadd.f32 %v3149_v15, %v2936_v45  ;;  %v2937_v48 = vmul.f32 %v3148_v7, %v2922_v46 }
0x1160   : > { %2959 = vst.msk [vmem:[%s4517_s14 + $0x30] sm:$0xff] %vm464_vm0, %v2951_v31  ;;  %v2952_v26 = vadd.f32 %v3149_v15, %v2937_v48 }
0x1162   : > { %2960 = vst.msk [vmem:[%s4517_s14 + $0x38] sm:$0xff] %vm464_vm0, %v2952_v26 }
0x1163 PF: > { %s18_s27 = sadd.s32 1, %s3841_s27  }
0x1164   : > { %p15_p4 = scmp.ge.s32.totalorder %s18_s27, 4  }
0x1166   :  { %17 = sbr.rel (!%p15_p4) target bundleno = 1 (0x1), region = 85 }

</bundles_post_ra>
